<compile_context>
chip_gen: v7x
topology: tpu7x:2x2x1
jax: 0.10.0
libtpu: 0.0.40
codegen_flags: <defaults>
</compile_context>

<pallas_src>
import math
import functools

import jax
import jax.numpy as jnp
from jax import lax
from jax.experimental import pallas as pl
from jax.experimental.pallas import tpu as pltpu

# ----------------------------- config ---------------------------------------
NUM_HEADS = 8          # stands in for T5_CONFIG.num_heads
NUM_BUCKETS = 32
MAX_DISTANCE = 128
BIDIRECTIONAL = True


def _relative_position_bucket(rel, *, bidirectional, num_buckets, max_distance):
    """Elementwise bucket mapping, identical semantics to the torch version."""
    rel = rel.astype(jnp.int32)
    if bidirectional:
        nb = num_buckets // 2
        rel_buckets = (rel > 0).astype(jnp.int32) * nb
        rel = jnp.abs(rel)
    else:
        nb = num_buckets
        rel_buckets = jnp.zeros_like(rel)
        rel = -jnp.minimum(rel, jnp.zeros_like(rel))
    max_exact = nb // 2
    is_small = rel < max_exact
    # clamp to >=1 to avoid log(0); those positions are masked by `is_small`
    rel_f = jnp.maximum(rel.astype(jnp.float32), 1.0)
    rel_if_large = max_exact + (
        jnp.log(rel_f / max_exact)
        / math.log(max_distance / max_exact)
        * (nb - max_exact)
    ).astype(jnp.int32)                      # trunc-toward-zero == torch .to(long)
    rel_if_large = jnp.minimum(rel_if_large, nb - 1)
    return rel_buckets + jnp.where(is_small, rel, rel_if_large)


# ----------------------------- kernel ---------------------------------------
def rpb_kernel(emb_ref, out_ref, *, tq, key_length, num_buckets,
               max_distance, bidirectional):
    """emb_ref: SMEM (num_buckets, num_heads); out_ref: VMEM (num_heads, tq, K)."""
    num_heads = out_ref.shape[0]
    q0 = pl.program_id(0) * tq

    # Natural (sublane=tq, lane=K) layout: no integer div/mod per lane.
    qpos = q0 + lax.broadcasted_iota(jnp.int32, (tq, key_length), 0)
    kpos = lax.broadcasted_iota(jnp.int32, (tq, key_length), 1)
    bucket = _relative_position_bucket(
        kpos - qpos, bidirectional=bidirectional, num_buckets=num_buckets,
        max_distance=max_distance)                       # (tq, K) int32

    # Embedding lookup as a VPU select chain. Every bucket index lands in
    # exactly one of the num_buckets branches, so the running where() chain per
    # head reproduces emb[bucket, h] exactly (f32, bit-exact). The per-bucket
    # mask is computed once and reused for all heads.
    accs = [jnp.zeros((tq, key_length), jnp.float32) for _ in range(num_heads)]
    for b in range(num_buckets):
        mask = bucket == b
        for h in range(num_heads):
            accs[h] = jnp.where(mask, emb_ref[b, h], accs[h])

    for h in range(num_heads):
        out_ref[h, :, :] = accs[h].astype(out_ref.dtype)


# ----------------------------- tiling heuristics ------------------------------
def _device_budget():
    """(lane budget per block, scoped-VMEM limit) chosen per TPU generation."""
    try:
        kind = jax.devices()[0].device_kind.lower()
    except Exception:
        kind = ""
    is_v7 = ("v7" in kind) or ("7x" in kind)
    lane_budget = (16 if is_v7 else 32) * 1024          # max tq * key_length
    vmem_limit = (32 if is_v7 else 64) * 1024 * 1024    # headroom under 64/128 MiB
    return lane_budget, vmem_limit


def _pick_tq(query_length, key_length, lane_budget):
    """Largest tq dividing Q with tq % 8 == 0 (or tq == Q) s.t. tq*K <= budget."""
    cands = [d for d in range(1, query_length + 1)
             if query_length % d == 0 and (d % 8 == 0 or d == query_length)]
    fitting = [d for d in cands if d * key_length <= lane_budget]
    return max(fitting) if fitting else min(cands)


# ----------------------------- wrapper ---------------------------------------
def relative_position_bias(emb, query_length, key_length, *,
                           bidirectional=BIDIRECTIONAL,
                           num_buckets=NUM_BUCKETS,
                           max_distance=MAX_DISTANCE,
                           tq=None):
    """emb: (num_buckets, num_heads) embedding table.
    Returns (1, num_heads, query_length, key_length), like the torch module."""
    nb, num_heads = emb.shape
    assert nb == num_buckets
    lane_budget, vmem_limit = _device_budget()
    if tq is None:
        tq = _pick_tq(query_length, key_length, lane_budget)
    assert query_length % tq == 0
    assert tq % 8 == 0 or tq == query_length, "block sublane dim must be *8 or full"
    grid = (query_length // tq,)

    out = pl.pallas_call(
        functools.partial(rpb_kernel, tq=tq, key_length=key_length,
                          num_buckets=num_buckets, max_distance=max_distance,
                          bidirectional=bidirectional),
        out_shape=jax.ShapeDtypeStruct(
            (num_heads, query_length, key_length), emb.dtype),
        grid=grid,
        in_specs=[pl.BlockSpec(memory_space=pltpu.MemorySpace.SMEM)],
        out_specs=pl.BlockSpec((num_heads, tq, key_length),
                               lambda qi: (0, qi, 0)),
        compiler_params=pltpu.CompilerParams(
            dimension_semantics=("parallel",),
            vmem_limit_bytes=vmem_limit),
    )(emb)

    return out[None]                                     # (1, H, Q, K)


# ----------------------------- reference -------------------------------------
def relative_position_bias_ref(emb, query_length, key_length):
    ctx = jnp.arange(query_length, dtype=jnp.int32)[:, None]
    mem = jnp.arange(key_length, dtype=jnp.int32)[None, :]
    rel = mem - ctx
    bucket = _relative_position_bucket(
        rel, bidirectional=BIDIRECTIONAL, num_buckets=NUM_BUCKETS,
        max_distance=MAX_DISTANCE)
    vals = jnp.take(emb, bucket, axis=0)          # (Q, K, H)
    return jnp.transpose(vals, (2, 0, 1))[None]   # (1, H, Q, K)


# ----------------------------- main -------------------------------------------
if __name__ == "__main__":
    key = jax.random.PRNGKey(0)
    # nn.Embedding(num_buckets, num_heads) weight, deterministic synthetic init.
    emb = (jax.random.normal(key, (NUM_BUCKETS, NUM_HEADS), dtype=jnp.float32)
           * 0.02)

    # Case 1: small square shape, single tile.
    Q1, K1 = 8, 8
    out1 = jax.block_until_ready(relative_position_bias(emb, Q1, K1))
    ref1 = relative_position_bias_ref(emb, Q1, K1)
    assert out1.shape == (1, NUM_HEADS, Q1, K1), out1.shape
    assert jnp.allclose(out1, ref1, atol=1e-6), "mismatch vs reference (case 1)"

    # Case 2: lane-dense K (multiple of 128) with an explicit query tiling,
    # exercising grid > 1 and the pipelined/parallel output writeback path.
    Q2, K2 = 32, 128
    out2 = jax.block_until_ready(relative_position_bias(emb, Q2, K2, tq=8))
    ref2 = relative_position_bias_ref(emb, Q2, K2)
    assert out2.shape == (1, NUM_HEADS, Q2, K2), out2.shape
    assert jnp.allclose(out2, ref2, atol=1e-6), "mismatch vs reference (case 2)"

    print("KERNEL_OK")
</pallas_src>

<mosaic_0001>
module attributes {stable_mosaic.version = 11 : i64} {
  func.func @rpb_kernel(%arg0: i32, %arg1: memref<32x8xf32, #tpu.memory_space<smem>>, %arg2: memref<8x8x8xf32, #tpu.memory_space<vmem>>) attributes {dimension_semantics = [#tpu.dimension_semantics<parallel>], iteration_bounds = array<i64: 1>, scalar_prefetch = 0 : i64, scratch_operands = 0 : i64, tpu.core_type = #tpu.core_type<tc>, window_params = [{transform_indices = @transform_0, window_bounds = array<i64: 32, 8>}, {transform_indices = @transform_1, window_bounds = array<i64: 8, 8, 8>}]} {
    %c8_i32 = arith.constant 8 : i32
    %0 = arith.muli %arg0, %c8_i32 : i32
    %1 = tpu.iota {dimensions = array<i32: 0>} : vector<8x8xi32>
    %2 = vector.broadcast %0 : i32 to vector<8x8xi32>
    %3 = arith.addi %2, %1 : vector<8x8xi32>
    %4 = tpu.iota {dimensions = array<i32: 1>} : vector<8x8xi32>
    %5 = arith.subi %4, %3 : vector<8x8xi32>
    %c0_i32 = arith.constant 0 : i32
    %6 = vector.broadcast %c0_i32 : i32 to vector<8x8xi32>
    %7 = arith.cmpi sgt, %5, %6 : vector<8x8xi32>
    %8 = arith.extui %7 : vector<8x8xi1> to vector<8x8xi32>
    %c16_i32 = arith.constant 16 : i32
    %9 = vector.broadcast %c16_i32 : i32 to vector<8x8xi32>
    %10 = arith.muli %8, %9 : vector<8x8xi32>
    %11 = math.absi %5 : vector<8x8xi32>
    %c8_i32_0 = arith.constant 8 : i32
    %12 = vector.broadcast %c8_i32_0 : i32 to vector<8x8xi32>
    %13 = arith.cmpi slt, %11, %12 : vector<8x8xi32>
    %14 = arith.sitofp %11 : vector<8x8xi32> to vector<8x8xf32>
    %cst = arith.constant 1.000000e+00 : f32
    %15 = vector.broadcast %cst : f32 to vector<8x8xf32>
    %16 = arith.maximumf %14, %15 : vector<8x8xf32>
    %cst_1 = arith.constant 8.000000e+00 : f32
    %17 = vector.broadcast %cst_1 : f32 to vector<8x8xf32>
    %18 = arith.divf %16, %17 : vector<8x8xf32>
    %19 = math.log %18 : vector<8x8xf32>
    %cst_2 = arith.constant 2.77258873 : f32
    %20 = vector.broadcast %cst_2 : f32 to vector<8x8xf32>
    %21 = arith.divf %19, %20 : vector<8x8xf32>
    %cst_3 = arith.constant 8.000000e+00 : f32
    %22 = vector.broadcast %cst_3 : f32 to vector<8x8xf32>
    %23 = arith.mulf %21, %22 : vector<8x8xf32>
    %24 = arith.fptosi %23 : vector<8x8xf32> to vector<8x8xi32>
    %c8_i32_4 = arith.constant 8 : i32
    %25 = vector.broadcast %c8_i32_4 : i32 to vector<8x8xi32>
    %26 = arith.addi %25, %24 : vector<8x8xi32>
    %c15_i32 = arith.constant 15 : i32
    %27 = vector.broadcast %c15_i32 : i32 to vector<8x8xi32>
    %28 = arith.minsi %26, %27 : vector<8x8xi32>
    %29 = arith.select %13, %11, %28 : vector<8x8xi1>, vector<8x8xi32>
    %30 = arith.addi %10, %29 : vector<8x8xi32>
    %cst_5 = arith.constant 0.000000e+00 : f32
    %31 = vector.broadcast %cst_5 : f32 to vector<8x8xf32>
    %cst_6 = arith.constant 0.000000e+00 : f32
    %32 = vector.broadcast %cst_6 : f32 to vector<8x8xf32>
    %cst_7 = arith.constant 0.000000e+00 : f32
    %33 = vector.broadcast %cst_7 : f32 to vector<8x8xf32>
    %cst_8 = arith.constant 0.000000e+00 : f32
    %34 = vector.broadcast %cst_8 : f32 to vector<8x8xf32>
    %cst_9 = arith.constant 0.000000e+00 : f32
    %35 = vector.broadcast %cst_9 : f32 to vector<8x8xf32>
    %cst_10 = arith.constant 0.000000e+00 : f32
    %36 = vector.broadcast %cst_10 : f32 to vector<8x8xf32>
    %cst_11 = arith.constant 0.000000e+00 : f32
    %37 = vector.broadcast %cst_11 : f32 to vector<8x8xf32>
    %cst_12 = arith.constant 0.000000e+00 : f32
    %38 = vector.broadcast %cst_12 : f32 to vector<8x8xf32>
    %c0_i32_13 = arith.constant 0 : i32
    %39 = vector.broadcast %c0_i32_13 : i32 to vector<8x8xi32>
    %40 = arith.cmpi eq, %30, %39 : vector<8x8xi32>
    %c0 = arith.constant 0 : index
    %c0_14 = arith.constant 0 : index
    %41 = memref.load %arg1[%c0, %c0_14] : memref<32x8xf32, #tpu.memory_space<smem>>
    %42 = vector.broadcast %41 : f32 to vector<8x8xf32>
    %43 = arith.select %40, %42, %31 : vector<8x8xi1>, vector<8x8xf32>
    %c0_15 = arith.constant 0 : index
    %c1 = arith.constant 1 : index
    %44 = memref.load %arg1[%c0_15, %c1] : memref<32x8xf32, #tpu.memory_space<smem>>
    %45 = vector.broadcast %44 : f32 to vector<8x8xf32>
    %46 = arith.select %40, %45, %32 : vector<8x8xi1>, vector<8x8xf32>
    %c0_16 = arith.constant 0 : index
    %c2 = arith.constant 2 : index
    %47 = memref.load %arg1[%c0_16, %c2] : memref<32x8xf32, #tpu.memory_space<smem>>
    %48 = vector.broadcast %47 : f32 to vector<8x8xf32>
    %49 = arith.select %40, %48, %33 : vector<8x8xi1>, vector<8x8xf32>
    %c0_17 = arith.constant 0 : index
    %c3 = arith.constant 3 : index
    %50 = memref.load %arg1[%c0_17, %c3] : memref<32x8xf32, #tpu.memory_space<smem>>
    %51 = vector.broadcast %50 : f32 to vector<8x8xf32>
    %52 = arith.select %40, %51, %34 : vector<8x8xi1>, vector<8x8xf32>
    %c0_18 = arith.constant 0 : index
    %c4 = arith.constant 4 : index
    %53 = memref.load %arg1[%c0_18, %c4] : memref<32x8xf32, #tpu.memory_space<smem>>
    %54 = vector.broadcast %53 : f32 to vector<8x8xf32>
    %55 = arith.select %40, %54, %35 : vector<8x8xi1>, vector<8x8xf32>
    %c0_19 = arith.constant 0 : index
    %c5 = arith.constant 5 : index
    %56 = memref.load %arg1[%c0_19, %c5] : memref<32x8xf32, #tpu.memory_space<smem>>
    %57 = vector.broadcast %56 : f32 to vector<8x8xf32>
    %58 = arith.select %40, %57, %36 : vector<8x8xi1>, vector<8x8xf32>
    %c0_20 = arith.constant 0 : index
    %c6 = arith.constant 6 : index
    %59 = memref.load %arg1[%c0_20, %c6] : memref<32x8xf32, #tpu.memory_space<smem>>
    %60 = vector.broadcast %59 : f32 to vector<8x8xf32>
    %61 = arith.select %40, %60, %37 : vector<8x8xi1>, vector<8x8xf32>
    %c0_21 = arith.constant 0 : index
    %c7 = arith.constant 7 : index
    %62 = memref.load %arg1[%c0_21, %c7] : memref<32x8xf32, #tpu.memory_space<smem>>
    %63 = vector.broadcast %62 : f32 to vector<8x8xf32>
    %64 = arith.select %40, %63, %38 : vector<8x8xi1>, vector<8x8xf32>
    %c1_i32 = arith.constant 1 : i32
    %65 = vector.broadcast %c1_i32 : i32 to vector<8x8xi32>
    %66 = arith.cmpi eq, %30, %65 : vector<8x8xi32>
    %c1_22 = arith.constant 1 : index
    %c0_23 = arith.constant 0 : index
    %67 = memref.load %arg1[%c1_22, %c0_23] : memref<32x8xf32, #tpu.memory_space<smem>>
    %68 = vector.broadcast %67 : f32 to vector<8x8xf32>
    %69 = arith.select %66, %68, %43 : vector<8x8xi1>, vector<8x8xf32>
    %c1_24 = arith.constant 1 : index
    %c1_25 = arith.constant 1 : index
    %70 = memref.load %arg1[%c1_24, %c1_25] : memref<32x8xf32, #tpu.memory_space<smem>>
    %71 = vector.broadcast %70 : f32 to vector<8x8xf32>
    %72 = arith.select %66, %71, %46 : vector<8x8xi1>, vector<8x8xf32>
    %c1_26 = arith.constant 1 : index
    %c2_27 = arith.constant 2 : index
    %73 = memref.load %arg1[%c1_26, %c2_27] : memref<32x8xf32, #tpu.memory_space<smem>>
    %74 = vector.broadcast %73 : f32 to vector<8x8xf32>
    %75 = arith.select %66, %74, %49 : vector<8x8xi1>, vector<8x8xf32>
    %c1_28 = arith.constant 1 : index
    %c3_29 = arith.constant 3 : index
    %76 = memref.load %arg1[%c1_28, %c3_29] : memref<32x8xf32, #tpu.memory_space<smem>>
    %77 = vector.broadcast %76 : f32 to vector<8x8xf32>
    %78 = arith.select %66, %77, %52 : vector<8x8xi1>, vector<8x8xf32>
    %c1_30 = arith.constant 1 : index
    %c4_31 = arith.constant 4 : index
    %79 = memref.load %arg1[%c1_30, %c4_31] : memref<32x8xf32, #tpu.memory_space<smem>>
    %80 = vector.broadcast %79 : f32 to vector<8x8xf32>
    %81 = arith.select %66, %80, %55 : vector<8x8xi1>, vector<8x8xf32>
    %c1_32 = arith.constant 1 : index
    %c5_33 = arith.constant 5 : index
    %82 = memref.load %arg1[%c1_32, %c5_33] : memref<32x8xf32, #tpu.memory_space<smem>>
    %83 = vector.broadcast %82 : f32 to vector<8x8xf32>
    %84 = arith.select %66, %83, %58 : vector<8x8xi1>, vector<8x8xf32>
    %c1_34 = arith.constant 1 : index
    %c6_35 = arith.constant 6 : index
    %85 = memref.load %arg1[%c1_34, %c6_35] : memref<32x8xf32, #tpu.memory_space<smem>>
    %86 = vector.broadcast %85 : f32 to vector<8x8xf32>
    %87 = arith.select %66, %86, %61 : vector<8x8xi1>, vector<8x8xf32>
    %c1_36 = arith.constant 1 : index
    %c7_37 = arith.constant 7 : index
    %88 = memref.load %arg1[%c1_36, %c7_37] : memref<32x8xf32, #tpu.memory_space<smem>>
    %89 = vector.broadcast %88 : f32 to vector<8x8xf32>
    %90 = arith.select %66, %89, %64 : vector<8x8xi1>, vector<8x8xf32>
    %c2_i32 = arith.constant 2 : i32
    %91 = vector.broadcast %c2_i32 : i32 to vector<8x8xi32>
    %92 = arith.cmpi eq, %30, %91 : vector<8x8xi32>
    %c2_38 = arith.constant 2 : index
    %c0_39 = arith.constant 0 : index
    %93 = memref.load %arg1[%c2_38, %c0_39] : memref<32x8xf32, #tpu.memory_space<smem>>
    %94 = vector.broadcast %93 : f32 to vector<8x8xf32>
    %95 = arith.select %92, %94, %69 : vector<8x8xi1>, vector<8x8xf32>
    %c2_40 = arith.constant 2 : index
    %c1_41 = arith.constant 1 : index
    %96 = memref.load %arg1[%c2_40, %c1_41] : memref<32x8xf32, #tpu.memory_space<smem>>
    %97 = vector.broadcast %96 : f32 to vector<8x8xf32>
    %98 = arith.select %92, %97, %72 : vector<8x8xi1>, vector<8x8xf32>
    %c2_42 = arith.constant 2 : index
    %c2_43 = arith.constant 2 : index
    %99 = memref.load %arg1[%c2_42, %c2_43] : memref<32x8xf32, #tpu.memory_space<smem>>
    %100 = vector.broadcast %99 : f32 to vector<8x8xf32>
    %101 = arith.select %92, %100, %75 : vector<8x8xi1>, vector<8x8xf32>
    %c2_44 = arith.constant 2 : index
    %c3_45 = arith.constant 3 : index
    %102 = memref.load %arg1[%c2_44, %c3_45] : memref<32x8xf32, #tpu.memory_space<smem>>
    %103 = vector.broadcast %102 : f32 to vector<8x8xf32>
    %104 = arith.select %92, %103, %78 : vector<8x8xi1>, vector<8x8xf32>
    %c2_46 = arith.constant 2 : index
    %c4_47 = arith.constant 4 : index
    %105 = memref.load %arg1[%c2_46, %c4_47] : memref<32x8xf32, #tpu.memory_space<smem>>
    %106 = vector.broadcast %105 : f32 to vector<8x8xf32>
    %107 = arith.select %92, %106, %81 : vector<8x8xi1>, vector<8x8xf32>
    %c2_48 = arith.constant 2 : index
    %c5_49 = arith.constant 5 : index
    %108 = memref.load %arg1[%c2_48, %c5_49] : memref<32x8xf32, #tpu.memory_space<smem>>
    %109 = vector.broadcast %108 : f32 to vector<8x8xf32>
    %110 = arith.select %92, %109, %84 : vector<8x8xi1>, vector<8x8xf32>
    %c2_50 = arith.constant 2 : index
    %c6_51 = arith.constant 6 : index
    %111 = memref.load %arg1[%c2_50, %c6_51] : memref<32x8xf32, #tpu.memory_space<smem>>
    %112 = vector.broadcast %111 : f32 to vector<8x8xf32>
    %113 = arith.select %92, %112, %87 : vector<8x8xi1>, vector<8x8xf32>
    %c2_52 = arith.constant 2 : index
    %c7_53 = arith.constant 7 : index
    %114 = memref.load %arg1[%c2_52, %c7_53] : memref<32x8xf32, #tpu.memory_space<smem>>
    %115 = vector.broadcast %114 : f32 to vector<8x8xf32>
    %116 = arith.select %92, %115, %90 : vector<8x8xi1>, vector<8x8xf32>
    %c3_i32 = arith.constant 3 : i32
    %117 = vector.broadcast %c3_i32 : i32 to vector<8x8xi32>
    %118 = arith.cmpi eq, %30, %117 : vector<8x8xi32>
    %c3_54 = arith.constant 3 : index
    %c0_55 = arith.constant 0 : index
    %119 = memref.load %arg1[%c3_54, %c0_55] : memref<32x8xf32, #tpu.memory_space<smem>>
    %120 = vector.broadcast %119 : f32 to vector<8x8xf32>
    %121 = arith.select %118, %120, %95 : vector<8x8xi1>, vector<8x8xf32>
    %c3_56 = arith.constant 3 : index
    %c1_57 = arith.constant 1 : index
    %122 = memref.load %arg1[%c3_56, %c1_57] : memref<32x8xf32, #tpu.memory_space<smem>>
    %123 = vector.broadcast %122 : f32 to vector<8x8xf32>
    %124 = arith.select %118, %123, %98 : vector<8x8xi1>, vector<8x8xf32>
    %c3_58 = arith.constant 3 : index
    %c2_59 = arith.constant 2 : index
    %125 = memref.load %arg1[%c3_58, %c2_59] : memref<32x8xf32, #tpu.memory_space<smem>>
    %126 = vector.broadcast %125 : f32 to vector<8x8xf32>
    %127 = arith.select %118, %126, %101 : vector<8x8xi1>, vector<8x8xf32>
    %c3_60 = arith.constant 3 : index
    %c3_61 = arith.constant 3 : index
    %128 = memref.load %arg1[%c3_60, %c3_61] : memref<32x8xf32, #tpu.memory_space<smem>>
    %129 = vector.broadcast %128 : f32 to vector<8x8xf32>
    %130 = arith.select %118, %129, %104 : vector<8x8xi1>, vector<8x8xf32>
    %c3_62 = arith.constant 3 : index
    %c4_63 = arith.constant 4 : index
    %131 = memref.load %arg1[%c3_62, %c4_63] : memref<32x8xf32, #tpu.memory_space<smem>>
    %132 = vector.broadcast %131 : f32 to vector<8x8xf32>
    %133 = arith.select %118, %132, %107 : vector<8x8xi1>, vector<8x8xf32>
    %c3_64 = arith.constant 3 : index
    %c5_65 = arith.constant 5 : index
    %134 = memref.load %arg1[%c3_64, %c5_65] : memref<32x8xf32, #tpu.memory_space<smem>>
    %135 = vector.broadcast %134 : f32 to vector<8x8xf32>
    %136 = arith.select %118, %135, %110 : vector<8x8xi1>, vector<8x8xf32>
    %c3_66 = arith.constant 3 : index
    %c6_67 = arith.constant 6 : index
    %137 = memref.load %arg1[%c3_66, %c6_67] : memref<32x8xf32, #tpu.memory_space<smem>>
    %138 = vector.broadcast %137 : f32 to vector<8x8xf32>
    %139 = arith.select %118, %138, %113 : vector<8x8xi1>, vector<8x8xf32>
    %c3_68 = arith.constant 3 : index
    %c7_69 = arith.constant 7 : index
    %140 = memref.load %arg1[%c3_68, %c7_69] : memref<32x8xf32, #tpu.memory_space<smem>>
    %141 = vector.broadcast %140 : f32 to vector<8x8xf32>
    %142 = arith.select %118, %141, %116 : vector<8x8xi1>, vector<8x8xf32>
    %c4_i32 = arith.constant 4 : i32
    %143 = vector.broadcast %c4_i32 : i32 to vector<8x8xi32>
    %144 = arith.cmpi eq, %30, %143 : vector<8x8xi32>
    %c4_70 = arith.constant 4 : index
    %c0_71 = arith.constant 0 : index
    %145 = memref.load %arg1[%c4_70, %c0_71] : memref<32x8xf32, #tpu.memory_space<smem>>
    %146 = vector.broadcast %145 : f32 to vector<8x8xf32>
    %147 = arith.select %144, %146, %121 : vector<8x8xi1>, vector<8x8xf32>
    %c4_72 = arith.constant 4 : index
    %c1_73 = arith.constant 1 : index
    %148 = memref.load %arg1[%c4_72, %c1_73] : memref<32x8xf32, #tpu.memory_space<smem>>
    %149 = vector.broadcast %148 : f32 to vector<8x8xf32>
    %150 = arith.select %144, %149, %124 : vector<8x8xi1>, vector<8x8xf32>
    %c4_74 = arith.constant 4 : index
    %c2_75 = arith.constant 2 : index
    %151 = memref.load %arg1[%c4_74, %c2_75] : memref<32x8xf32, #tpu.memory_space<smem>>
    %152 = vector.broadcast %151 : f32 to vector<8x8xf32>
    %153 = arith.select %144, %152, %127 : vector<8x8xi1>, vector<8x8xf32>
    %c4_76 = arith.constant 4 : index
    %c3_77 = arith.constant 3 : index
    %154 = memref.load %arg1[%c4_76, %c3_77] : memref<32x8xf32, #tpu.memory_space<smem>>
    %155 = vector.broadcast %154 : f32 to vector<8x8xf32>
    %156 = arith.select %144, %155, %130 : vector<8x8xi1>, vector<8x8xf32>
    %c4_78 = arith.constant 4 : index
    %c4_79 = arith.constant 4 : index
    %157 = memref.load %arg1[%c4_78, %c4_79] : memref<32x8xf32, #tpu.memory_space<smem>>
    %158 = vector.broadcast %157 : f32 to vector<8x8xf32>
    %159 = arith.select %144, %158, %133 : vector<8x8xi1>, vector<8x8xf32>
    %c4_80 = arith.constant 4 : index
    %c5_81 = arith.constant 5 : index
    %160 = memref.load %arg1[%c4_80, %c5_81] : memref<32x8xf32, #tpu.memory_space<smem>>
    %161 = vector.broadcast %160 : f32 to vector<8x8xf32>
    %162 = arith.select %144, %161, %136 : vector<8x8xi1>, vector<8x8xf32>
    %c4_82 = arith.constant 4 : index
    %c6_83 = arith.constant 6 : index
    %163 = memref.load %arg1[%c4_82, %c6_83] : memref<32x8xf32, #tpu.memory_space<smem>>
    %164 = vector.broadcast %163 : f32 to vector<8x8xf32>
    %165 = arith.select %144, %164, %139 : vector<8x8xi1>, vector<8x8xf32>
    %c4_84 = arith.constant 4 : index
    %c7_85 = arith.constant 7 : index
    %166 = memref.load %arg1[%c4_84, %c7_85] : memref<32x8xf32, #tpu.memory_space<smem>>
    %167 = vector.broadcast %166 : f32 to vector<8x8xf32>
    %168 = arith.select %144, %167, %142 : vector<8x8xi1>, vector<8x8xf32>
    %c5_i32 = arith.constant 5 : i32
    %169 = vector.broadcast %c5_i32 : i32 to vector<8x8xi32>
    %170 = arith.cmpi eq, %30, %169 : vector<8x8xi32>
    %c5_86 = arith.constant 5 : index
    %c0_87 = arith.constant 0 : index
    %171 = memref.load %arg1[%c5_86, %c0_87] : memref<32x8xf32, #tpu.memory_space<smem>>
    %172 = vector.broadcast %171 : f32 to vector<8x8xf32>
    %173 = arith.select %170, %172, %147 : vector<8x8xi1>, vector<8x8xf32>
    %c5_88 = arith.constant 5 : index
    %c1_89 = arith.constant 1 : index
    %174 = memref.load %arg1[%c5_88, %c1_89] : memref<32x8xf32, #tpu.memory_space<smem>>
    %175 = vector.broadcast %174 : f32 to vector<8x8xf32>
    %176 = arith.select %170, %175, %150 : vector<8x8xi1>, vector<8x8xf32>
    %c5_90 = arith.constant 5 : index
    %c2_91 = arith.constant 2 : index
    %177 = memref.load %arg1[%c5_90, %c2_91] : memref<32x8xf32, #tpu.memory_space<smem>>
    %178 = vector.broadcast %177 : f32 to vector<8x8xf32>
    %179 = arith.select %170, %178, %153 : vector<8x8xi1>, vector<8x8xf32>
    %c5_92 = arith.constant 5 : index
    %c3_93 = arith.constant 3 : index
    %180 = memref.load %arg1[%c5_92, %c3_93] : memref<32x8xf32, #tpu.memory_space<smem>>
    %181 = vector.broadcast %180 : f32 to vector<8x8xf32>
    %182 = arith.select %170, %181, %156 : vector<8x8xi1>, vector<8x8xf32>
    %c5_94 = arith.constant 5 : index
    %c4_95 = arith.constant 4 : index
    %183 = memref.load %arg1[%c5_94, %c4_95] : memref<32x8xf32, #tpu.memory_space<smem>>
    %184 = vector.broadcast %183 : f32 to vector<8x8xf32>
    %185 = arith.select %170, %184, %159 : vector<8x8xi1>, vector<8x8xf32>
    %c5_96 = arith.constant 5 : index
    %c5_97 = arith.constant 5 : index
    %186 = memref.load %arg1[%c5_96, %c5_97] : memref<32x8xf32, #tpu.memory_space<smem>>
    %187 = vector.broadcast %186 : f32 to vector<8x8xf32>
    %188 = arith.select %170, %187, %162 : vector<8x8xi1>, vector<8x8xf32>
    %c5_98 = arith.constant 5 : index
    %c6_99 = arith.constant 6 : index
    %189 = memref.load %arg1[%c5_98, %c6_99] : memref<32x8xf32, #tpu.memory_space<smem>>
    %190 = vector.broadcast %189 : f32 to vector<8x8xf32>
    %191 = arith.select %170, %190, %165 : vector<8x8xi1>, vector<8x8xf32>
    %c5_100 = arith.constant 5 : index
    %c7_101 = arith.constant 7 : index
    %192 = memref.load %arg1[%c5_100, %c7_101] : memref<32x8xf32, #tpu.memory_space<smem>>
    %193 = vector.broadcast %192 : f32 to vector<8x8xf32>
    %194 = arith.select %170, %193, %168 : vector<8x8xi1>, vector<8x8xf32>
    %c6_i32 = arith.constant 6 : i32
    %195 = vector.broadcast %c6_i32 : i32 to vector<8x8xi32>
    %196 = arith.cmpi eq, %30, %195 : vector<8x8xi32>
    %c6_102 = arith.constant 6 : index
    %c0_103 = arith.constant 0 : index
    %197 = memref.load %arg1[%c6_102, %c0_103] : memref<32x8xf32, #tpu.memory_space<smem>>
    %198 = vector.broadcast %197 : f32 to vector<8x8xf32>
    %199 = arith.select %196, %198, %173 : vector<8x8xi1>, vector<8x8xf32>
    %c6_104 = arith.constant 6 : index
    %c1_105 = arith.constant 1 : index
    %200 = memref.load %arg1[%c6_104, %c1_105] : memref<32x8xf32, #tpu.memory_space<smem>>
    %201 = vector.broadcast %200 : f32 to vector<8x8xf32>
    %202 = arith.select %196, %201, %176 : vector<8x8xi1>, vector<8x8xf32>
    %c6_106 = arith.constant 6 : index
    %c2_107 = arith.constant 2 : index
    %203 = memref.load %arg1[%c6_106, %c2_107] : memref<32x8xf32, #tpu.memory_space<smem>>
    %204 = vector.broadcast %203 : f32 to vector<8x8xf32>
    %205 = arith.select %196, %204, %179 : vector<8x8xi1>, vector<8x8xf32>
    %c6_108 = arith.constant 6 : index
    %c3_109 = arith.constant 3 : index
    %206 = memref.load %arg1[%c6_108, %c3_109] : memref<32x8xf32, #tpu.memory_space<smem>>
    %207 = vector.broadcast %206 : f32 to vector<8x8xf32>
    %208 = arith.select %196, %207, %182 : vector<8x8xi1>, vector<8x8xf32>
    %c6_110 = arith.constant 6 : index
    %c4_111 = arith.constant 4 : index
    %209 = memref.load %arg1[%c6_110, %c4_111] : memref<32x8xf32, #tpu.memory_space<smem>>
    %210 = vector.broadcast %209 : f32 to vector<8x8xf32>
    %211 = arith.select %196, %210, %185 : vector<8x8xi1>, vector<8x8xf32>
    %c6_112 = arith.constant 6 : index
    %c5_113 = arith.constant 5 : index
    %212 = memref.load %arg1[%c6_112, %c5_113] : memref<32x8xf32, #tpu.memory_space<smem>>
    %213 = vector.broadcast %212 : f32 to vector<8x8xf32>
    %214 = arith.select %196, %213, %188 : vector<8x8xi1>, vector<8x8xf32>
    %c6_114 = arith.constant 6 : index
    %c6_115 = arith.constant 6 : index
    %215 = memref.load %arg1[%c6_114, %c6_115] : memref<32x8xf32, #tpu.memory_space<smem>>
    %216 = vector.broadcast %215 : f32 to vector<8x8xf32>
    %217 = arith.select %196, %216, %191 : vector<8x8xi1>, vector<8x8xf32>
    %c6_116 = arith.constant 6 : index
    %c7_117 = arith.constant 7 : index
    %218 = memref.load %arg1[%c6_116, %c7_117] : memref<32x8xf32, #tpu.memory_space<smem>>
    %219 = vector.broadcast %218 : f32 to vector<8x8xf32>
    %220 = arith.select %196, %219, %194 : vector<8x8xi1>, vector<8x8xf32>
    %c7_i32 = arith.constant 7 : i32
    %221 = vector.broadcast %c7_i32 : i32 to vector<8x8xi32>
    %222 = arith.cmpi eq, %30, %221 : vector<8x8xi32>
    %c7_118 = arith.constant 7 : index
    %c0_119 = arith.constant 0 : index
    %223 = memref.load %arg1[%c7_118, %c0_119] : memref<32x8xf32, #tpu.memory_space<smem>>
    %224 = vector.broadcast %223 : f32 to vector<8x8xf32>
    %225 = arith.select %222, %224, %199 : vector<8x8xi1>, vector<8x8xf32>
    %c7_120 = arith.constant 7 : index
    %c1_121 = arith.constant 1 : index
    %226 = memref.load %arg1[%c7_120, %c1_121] : memref<32x8xf32, #tpu.memory_space<smem>>
    %227 = vector.broadcast %226 : f32 to vector<8x8xf32>
    %228 = arith.select %222, %227, %202 : vector<8x8xi1>, vector<8x8xf32>
    %c7_122 = arith.constant 7 : index
    %c2_123 = arith.constant 2 : index
    %229 = memref.load %arg1[%c7_122, %c2_123] : memref<32x8xf32, #tpu.memory_space<smem>>
    %230 = vector.broadcast %229 : f32 to vector<8x8xf32>
    %231 = arith.select %222, %230, %205 : vector<8x8xi1>, vector<8x8xf32>
    %c7_124 = arith.constant 7 : index
    %c3_125 = arith.constant 3 : index
    %232 = memref.load %arg1[%c7_124, %c3_125] : memref<32x8xf32, #tpu.memory_space<smem>>
    %233 = vector.broadcast %232 : f32 to vector<8x8xf32>
    %234 = arith.select %222, %233, %208 : vector<8x8xi1>, vector<8x8xf32>
    %c7_126 = arith.constant 7 : index
    %c4_127 = arith.constant 4 : index
    %235 = memref.load %arg1[%c7_126, %c4_127] : memref<32x8xf32, #tpu.memory_space<smem>>
    %236 = vector.broadcast %235 : f32 to vector<8x8xf32>
    %237 = arith.select %222, %236, %211 : vector<8x8xi1>, vector<8x8xf32>
    %c7_128 = arith.constant 7 : index
    %c5_129 = arith.constant 5 : index
    %238 = memref.load %arg1[%c7_128, %c5_129] : memref<32x8xf32, #tpu.memory_space<smem>>
    %239 = vector.broadcast %238 : f32 to vector<8x8xf32>
    %240 = arith.select %222, %239, %214 : vector<8x8xi1>, vector<8x8xf32>
    %c7_130 = arith.constant 7 : index
    %c6_131 = arith.constant 6 : index
    %241 = memref.load %arg1[%c7_130, %c6_131] : memref<32x8xf32, #tpu.memory_space<smem>>
    %242 = vector.broadcast %241 : f32 to vector<8x8xf32>
    %243 = arith.select %222, %242, %217 : vector<8x8xi1>, vector<8x8xf32>
    %c7_132 = arith.constant 7 : index
    %c7_133 = arith.constant 7 : index
    %244 = memref.load %arg1[%c7_132, %c7_133] : memref<32x8xf32, #tpu.memory_space<smem>>
    %245 = vector.broadcast %244 : f32 to vector<8x8xf32>
    %246 = arith.select %222, %245, %220 : vector<8x8xi1>, vector<8x8xf32>
    %c8_i32_134 = arith.constant 8 : i32
    %247 = vector.broadcast %c8_i32_134 : i32 to vector<8x8xi32>
    %248 = arith.cmpi eq, %30, %247 : vector<8x8xi32>
    %c8 = arith.constant 8 : index
    %c0_135 = arith.constant 0 : index
    %249 = memref.load %arg1[%c8, %c0_135] : memref<32x8xf32, #tpu.memory_space<smem>>
    %250 = vector.broadcast %249 : f32 to vector<8x8xf32>
    %251 = arith.select %248, %250, %225 : vector<8x8xi1>, vector<8x8xf32>
    %c8_136 = arith.constant 8 : index
    %c1_137 = arith.constant 1 : index
    %252 = memref.load %arg1[%c8_136, %c1_137] : memref<32x8xf32, #tpu.memory_space<smem>>
    %253 = vector.broadcast %252 : f32 to vector<8x8xf32>
    %254 = arith.select %248, %253, %228 : vector<8x8xi1>, vector<8x8xf32>
    %c8_138 = arith.constant 8 : index
    %c2_139 = arith.constant 2 : index
    %255 = memref.load %arg1[%c8_138, %c2_139] : memref<32x8xf32, #tpu.memory_space<smem>>
    %256 = vector.broadcast %255 : f32 to vector<8x8xf32>
    %257 = arith.select %248, %256, %231 : vector<8x8xi1>, vector<8x8xf32>
    %c8_140 = arith.constant 8 : index
    %c3_141 = arith.constant 3 : index
    %258 = memref.load %arg1[%c8_140, %c3_141] : memref<32x8xf32, #tpu.memory_space<smem>>
    %259 = vector.broadcast %258 : f32 to vector<8x8xf32>
    %260 = arith.select %248, %259, %234 : vector<8x8xi1>, vector<8x8xf32>
    %c8_142 = arith.constant 8 : index
    %c4_143 = arith.constant 4 : index
    %261 = memref.load %arg1[%c8_142, %c4_143] : memref<32x8xf32, #tpu.memory_space<smem>>
    %262 = vector.broadcast %261 : f32 to vector<8x8xf32>
    %263 = arith.select %248, %262, %237 : vector<8x8xi1>, vector<8x8xf32>
    %c8_144 = arith.constant 8 : index
    %c5_145 = arith.constant 5 : index
    %264 = memref.load %arg1[%c8_144, %c5_145] : memref<32x8xf32, #tpu.memory_space<smem>>
    %265 = vector.broadcast %264 : f32 to vector<8x8xf32>
    %266 = arith.select %248, %265, %240 : vector<8x8xi1>, vector<8x8xf32>
    %c8_146 = arith.constant 8 : index
    %c6_147 = arith.constant 6 : index
    %267 = memref.load %arg1[%c8_146, %c6_147] : memref<32x8xf32, #tpu.memory_space<smem>>
    %268 = vector.broadcast %267 : f32 to vector<8x8xf32>
    %269 = arith.select %248, %268, %243 : vector<8x8xi1>, vector<8x8xf32>
    %c8_148 = arith.constant 8 : index
    %c7_149 = arith.constant 7 : index
    %270 = memref.load %arg1[%c8_148, %c7_149] : memref<32x8xf32, #tpu.memory_space<smem>>
    %271 = vector.broadcast %270 : f32 to vector<8x8xf32>
    %272 = arith.select %248, %271, %246 : vector<8x8xi1>, vector<8x8xf32>
    %c9_i32 = arith.constant 9 : i32
    %273 = vector.broadcast %c9_i32 : i32 to vector<8x8xi32>
    %274 = arith.cmpi eq, %30, %273 : vector<8x8xi32>
    %c9 = arith.constant 9 : index
    %c0_150 = arith.constant 0 : index
    %275 = memref.load %arg1[%c9, %c0_150] : memref<32x8xf32, #tpu.memory_space<smem>>
    %276 = vector.broadcast %275 : f32 to vector<8x8xf32>
    %277 = arith.select %274, %276, %251 : vector<8x8xi1>, vector<8x8xf32>
    %c9_151 = arith.constant 9 : index
    %c1_152 = arith.constant 1 : index
    %278 = memref.load %arg1[%c9_151, %c1_152] : memref<32x8xf32, #tpu.memory_space<smem>>
    %279 = vector.broadcast %278 : f32 to vector<8x8xf32>
    %280 = arith.select %274, %279, %254 : vector<8x8xi1>, vector<8x8xf32>
    %c9_153 = arith.constant 9 : index
    %c2_154 = arith.constant 2 : index
    %281 = memref.load %arg1[%c9_153, %c2_154] : memref<32x8xf32, #tpu.memory_space<smem>>
    %282 = vector.broadcast %281 : f32 to vector<8x8xf32>
    %283 = arith.select %274, %282, %257 : vector<8x8xi1>, vector<8x8xf32>
    %c9_155 = arith.constant 9 : index
    %c3_156 = arith.constant 3 : index
    %284 = memref.load %arg1[%c9_155, %c3_156] : memref<32x8xf32, #tpu.memory_space<smem>>
    %285 = vector.broadcast %284 : f32 to vector<8x8xf32>
    %286 = arith.select %274, %285, %260 : vector<8x8xi1>, vector<8x8xf32>
    %c9_157 = arith.constant 9 : index
    %c4_158 = arith.constant 4 : index
    %287 = memref.load %arg1[%c9_157, %c4_158] : memref<32x8xf32, #tpu.memory_space<smem>>
    %288 = vector.broadcast %287 : f32 to vector<8x8xf32>
    %289 = arith.select %274, %288, %263 : vector<8x8xi1>, vector<8x8xf32>
    %c9_159 = arith.constant 9 : index
    %c5_160 = arith.constant 5 : index
    %290 = memref.load %arg1[%c9_159, %c5_160] : memref<32x8xf32, #tpu.memory_space<smem>>
    %291 = vector.broadcast %290 : f32 to vector<8x8xf32>
    %292 = arith.select %274, %291, %266 : vector<8x8xi1>, vector<8x8xf32>
    %c9_161 = arith.constant 9 : index
    %c6_162 = arith.constant 6 : index
    %293 = memref.load %arg1[%c9_161, %c6_162] : memref<32x8xf32, #tpu.memory_space<smem>>
    %294 = vector.broadcast %293 : f32 to vector<8x8xf32>
    %295 = arith.select %274, %294, %269 : vector<8x8xi1>, vector<8x8xf32>
    %c9_163 = arith.constant 9 : index
    %c7_164 = arith.constant 7 : index
    %296 = memref.load %arg1[%c9_163, %c7_164] : memref<32x8xf32, #tpu.memory_space<smem>>
    %297 = vector.broadcast %296 : f32 to vector<8x8xf32>
    %298 = arith.select %274, %297, %272 : vector<8x8xi1>, vector<8x8xf32>
    %c10_i32 = arith.constant 10 : i32
    %299 = vector.broadcast %c10_i32 : i32 to vector<8x8xi32>
    %300 = arith.cmpi eq, %30, %299 : vector<8x8xi32>
    %c10 = arith.constant 10 : index
    %c0_165 = arith.constant 0 : index
    %301 = memref.load %arg1[%c10, %c0_165] : memref<32x8xf32, #tpu.memory_space<smem>>
    %302 = vector.broadcast %301 : f32 to vector<8x8xf32>
    %303 = arith.select %300, %302, %277 : vector<8x8xi1>, vector<8x8xf32>
    %c10_166 = arith.constant 10 : index
    %c1_167 = arith.constant 1 : index
    %304 = memref.load %arg1[%c10_166, %c1_167] : memref<32x8xf32, #tpu.memory_space<smem>>
    %305 = vector.broadcast %304 : f32 to vector<8x8xf32>
    %306 = arith.select %300, %305, %280 : vector<8x8xi1>, vector<8x8xf32>
    %c10_168 = arith.constant 10 : index
    %c2_169 = arith.constant 2 : index
    %307 = memref.load %arg1[%c10_168, %c2_169] : memref<32x8xf32, #tpu.memory_space<smem>>
    %308 = vector.broadcast %307 : f32 to vector<8x8xf32>
    %309 = arith.select %300, %308, %283 : vector<8x8xi1>, vector<8x8xf32>
    %c10_170 = arith.constant 10 : index
    %c3_171 = arith.constant 3 : index
    %310 = memref.load %arg1[%c10_170, %c3_171] : memref<32x8xf32, #tpu.memory_space<smem>>
    %311 = vector.broadcast %310 : f32 to vector<8x8xf32>
    %312 = arith.select %300, %311, %286 : vector<8x8xi1>, vector<8x8xf32>
    %c10_172 = arith.constant 10 : index
    %c4_173 = arith.constant 4 : index
    %313 = memref.load %arg1[%c10_172, %c4_173] : memref<32x8xf32, #tpu.memory_space<smem>>
    %314 = vector.broadcast %313 : f32 to vector<8x8xf32>
    %315 = arith.select %300, %314, %289 : vector<8x8xi1>, vector<8x8xf32>
    %c10_174 = arith.constant 10 : index
    %c5_175 = arith.constant 5 : index
    %316 = memref.load %arg1[%c10_174, %c5_175] : memref<32x8xf32, #tpu.memory_space<smem>>
    %317 = vector.broadcast %316 : f32 to vector<8x8xf32>
    %318 = arith.select %300, %317, %292 : vector<8x8xi1>, vector<8x8xf32>
    %c10_176 = arith.constant 10 : index
    %c6_177 = arith.constant 6 : index
    %319 = memref.load %arg1[%c10_176, %c6_177] : memref<32x8xf32, #tpu.memory_space<smem>>
    %320 = vector.broadcast %319 : f32 to vector<8x8xf32>
    %321 = arith.select %300, %320, %295 : vector<8x8xi1>, vector<8x8xf32>
    %c10_178 = arith.constant 10 : index
    %c7_179 = arith.constant 7 : index
    %322 = memref.load %arg1[%c10_178, %c7_179] : memref<32x8xf32, #tpu.memory_space<smem>>
    %323 = vector.broadcast %322 : f32 to vector<8x8xf32>
    %324 = arith.select %300, %323, %298 : vector<8x8xi1>, vector<8x8xf32>
    %c11_i32 = arith.constant 11 : i32
    %325 = vector.broadcast %c11_i32 : i32 to vector<8x8xi32>
    %326 = arith.cmpi eq, %30, %325 : vector<8x8xi32>
    %c11 = arith.constant 11 : index
    %c0_180 = arith.constant 0 : index
    %327 = memref.load %arg1[%c11, %c0_180] : memref<32x8xf32, #tpu.memory_space<smem>>
    %328 = vector.broadcast %327 : f32 to vector<8x8xf32>
    %329 = arith.select %326, %328, %303 : vector<8x8xi1>, vector<8x8xf32>
    %c11_181 = arith.constant 11 : index
    %c1_182 = arith.constant 1 : index
    %330 = memref.load %arg1[%c11_181, %c1_182] : memref<32x8xf32, #tpu.memory_space<smem>>
    %331 = vector.broadcast %330 : f32 to vector<8x8xf32>
    %332 = arith.select %326, %331, %306 : vector<8x8xi1>, vector<8x8xf32>
    %c11_183 = arith.constant 11 : index
    %c2_184 = arith.constant 2 : index
    %333 = memref.load %arg1[%c11_183, %c2_184] : memref<32x8xf32, #tpu.memory_space<smem>>
    %334 = vector.broadcast %333 : f32 to vector<8x8xf32>
    %335 = arith.select %326, %334, %309 : vector<8x8xi1>, vector<8x8xf32>
    %c11_185 = arith.constant 11 : index
    %c3_186 = arith.constant 3 : index
    %336 = memref.load %arg1[%c11_185, %c3_186] : memref<32x8xf32, #tpu.memory_space<smem>>
    %337 = vector.broadcast %336 : f32 to vector<8x8xf32>
    %338 = arith.select %326, %337, %312 : vector<8x8xi1>, vector<8x8xf32>
    %c11_187 = arith.constant 11 : index
    %c4_188 = arith.constant 4 : index
    %339 = memref.load %arg1[%c11_187, %c4_188] : memref<32x8xf32, #tpu.memory_space<smem>>
    %340 = vector.broadcast %339 : f32 to vector<8x8xf32>
    %341 = arith.select %326, %340, %315 : vector<8x8xi1>, vector<8x8xf32>
    %c11_189 = arith.constant 11 : index
    %c5_190 = arith.constant 5 : index
    %342 = memref.load %arg1[%c11_189, %c5_190] : memref<32x8xf32, #tpu.memory_space<smem>>
    %343 = vector.broadcast %342 : f32 to vector<8x8xf32>
    %344 = arith.select %326, %343, %318 : vector<8x8xi1>, vector<8x8xf32>
    %c11_191 = arith.constant 11 : index
    %c6_192 = arith.constant 6 : index
    %345 = memref.load %arg1[%c11_191, %c6_192] : memref<32x8xf32, #tpu.memory_space<smem>>
    %346 = vector.broadcast %345 : f32 to vector<8x8xf32>
    %347 = arith.select %326, %346, %321 : vector<8x8xi1>, vector<8x8xf32>
    %c11_193 = arith.constant 11 : index
    %c7_194 = arith.constant 7 : index
    %348 = memref.load %arg1[%c11_193, %c7_194] : memref<32x8xf32, #tpu.memory_space<smem>>
    %349 = vector.broadcast %348 : f32 to vector<8x8xf32>
    %350 = arith.select %326, %349, %324 : vector<8x8xi1>, vector<8x8xf32>
    %c12_i32 = arith.constant 12 : i32
    %351 = vector.broadcast %c12_i32 : i32 to vector<8x8xi32>
    %352 = arith.cmpi eq, %30, %351 : vector<8x8xi32>
    %c12 = arith.constant 12 : index
    %c0_195 = arith.constant 0 : index
    %353 = memref.load %arg1[%c12, %c0_195] : memref<32x8xf32, #tpu.memory_space<smem>>
    %354 = vector.broadcast %353 : f32 to vector<8x8xf32>
    %355 = arith.select %352, %354, %329 : vector<8x8xi1>, vector<8x8xf32>
    %c12_196 = arith.constant 12 : index
    %c1_197 = arith.constant 1 : index
    %356 = memref.load %arg1[%c12_196, %c1_197] : memref<32x8xf32, #tpu.memory_space<smem>>
    %357 = vector.broadcast %356 : f32 to vector<8x8xf32>
    %358 = arith.select %352, %357, %332 : vector<8x8xi1>, vector<8x8xf32>
    %c12_198 = arith.constant 12 : index
    %c2_199 = arith.constant 2 : index
    %359 = memref.load %arg1[%c12_198, %c2_199] : memref<32x8xf32, #tpu.memory_space<smem>>
    %360 = vector.broadcast %359 : f32 to vector<8x8xf32>
    %361 = arith.select %352, %360, %335 : vector<8x8xi1>, vector<8x8xf32>
    %c12_200 = arith.constant 12 : index
    %c3_201 = arith.constant 3 : index
    %362 = memref.load %arg1[%c12_200, %c3_201] : memref<32x8xf32, #tpu.memory_space<smem>>
    %363 = vector.broadcast %362 : f32 to vector<8x8xf32>
    %364 = arith.select %352, %363, %338 : vector<8x8xi1>, vector<8x8xf32>
    %c12_202 = arith.constant 12 : index
    %c4_203 = arith.constant 4 : index
    %365 = memref.load %arg1[%c12_202, %c4_203] : memref<32x8xf32, #tpu.memory_space<smem>>
    %366 = vector.broadcast %365 : f32 to vector<8x8xf32>
    %367 = arith.select %352, %366, %341 : vector<8x8xi1>, vector<8x8xf32>
    %c12_204 = arith.constant 12 : index
    %c5_205 = arith.constant 5 : index
    %368 = memref.load %arg1[%c12_204, %c5_205] : memref<32x8xf32, #tpu.memory_space<smem>>
    %369 = vector.broadcast %368 : f32 to vector<8x8xf32>
    %370 = arith.select %352, %369, %344 : vector<8x8xi1>, vector<8x8xf32>
    %c12_206 = arith.constant 12 : index
    %c6_207 = arith.constant 6 : index
    %371 = memref.load %arg1[%c12_206, %c6_207] : memref<32x8xf32, #tpu.memory_space<smem>>
    %372 = vector.broadcast %371 : f32 to vector<8x8xf32>
    %373 = arith.select %352, %372, %347 : vector<8x8xi1>, vector<8x8xf32>
    %c12_208 = arith.constant 12 : index
    %c7_209 = arith.constant 7 : index
    %374 = memref.load %arg1[%c12_208, %c7_209] : memref<32x8xf32, #tpu.memory_space<smem>>
    %375 = vector.broadcast %374 : f32 to vector<8x8xf32>
    %376 = arith.select %352, %375, %350 : vector<8x8xi1>, vector<8x8xf32>
    %c13_i32 = arith.constant 13 : i32
    %377 = vector.broadcast %c13_i32 : i32 to vector<8x8xi32>
    %378 = arith.cmpi eq, %30, %377 : vector<8x8xi32>
    %c13 = arith.constant 13 : index
    %c0_210 = arith.constant 0 : index
    %379 = memref.load %arg1[%c13, %c0_210] : memref<32x8xf32, #tpu.memory_space<smem>>
    %380 = vector.broadcast %379 : f32 to vector<8x8xf32>
    %381 = arith.select %378, %380, %355 : vector<8x8xi1>, vector<8x8xf32>
    %c13_211 = arith.constant 13 : index
    %c1_212 = arith.constant 1 : index
    %382 = memref.load %arg1[%c13_211, %c1_212] : memref<32x8xf32, #tpu.memory_space<smem>>
    %383 = vector.broadcast %382 : f32 to vector<8x8xf32>
    %384 = arith.select %378, %383, %358 : vector<8x8xi1>, vector<8x8xf32>
    %c13_213 = arith.constant 13 : index
    %c2_214 = arith.constant 2 : index
    %385 = memref.load %arg1[%c13_213, %c2_214] : memref<32x8xf32, #tpu.memory_space<smem>>
    %386 = vector.broadcast %385 : f32 to vector<8x8xf32>
    %387 = arith.select %378, %386, %361 : vector<8x8xi1>, vector<8x8xf32>
    %c13_215 = arith.constant 13 : index
    %c3_216 = arith.constant 3 : index
    %388 = memref.load %arg1[%c13_215, %c3_216] : memref<32x8xf32, #tpu.memory_space<smem>>
    %389 = vector.broadcast %388 : f32 to vector<8x8xf32>
    %390 = arith.select %378, %389, %364 : vector<8x8xi1>, vector<8x8xf32>
    %c13_217 = arith.constant 13 : index
    %c4_218 = arith.constant 4 : index
    %391 = memref.load %arg1[%c13_217, %c4_218] : memref<32x8xf32, #tpu.memory_space<smem>>
    %392 = vector.broadcast %391 : f32 to vector<8x8xf32>
    %393 = arith.select %378, %392, %367 : vector<8x8xi1>, vector<8x8xf32>
    %c13_219 = arith.constant 13 : index
    %c5_220 = arith.constant 5 : index
    %394 = memref.load %arg1[%c13_219, %c5_220] : memref<32x8xf32, #tpu.memory_space<smem>>
    %395 = vector.broadcast %394 : f32 to vector<8x8xf32>
    %396 = arith.select %378, %395, %370 : vector<8x8xi1>, vector<8x8xf32>
    %c13_221 = arith.constant 13 : index
    %c6_222 = arith.constant 6 : index
    %397 = memref.load %arg1[%c13_221, %c6_222] : memref<32x8xf32, #tpu.memory_space<smem>>
    %398 = vector.broadcast %397 : f32 to vector<8x8xf32>
    %399 = arith.select %378, %398, %373 : vector<8x8xi1>, vector<8x8xf32>
    %c13_223 = arith.constant 13 : index
    %c7_224 = arith.constant 7 : index
    %400 = memref.load %arg1[%c13_223, %c7_224] : memref<32x8xf32, #tpu.memory_space<smem>>
    %401 = vector.broadcast %400 : f32 to vector<8x8xf32>
    %402 = arith.select %378, %401, %376 : vector<8x8xi1>, vector<8x8xf32>
    %c14_i32 = arith.constant 14 : i32
    %403 = vector.broadcast %c14_i32 : i32 to vector<8x8xi32>
    %404 = arith.cmpi eq, %30, %403 : vector<8x8xi32>
    %c14 = arith.constant 14 : index
    %c0_225 = arith.constant 0 : index
    %405 = memref.load %arg1[%c14, %c0_225] : memref<32x8xf32, #tpu.memory_space<smem>>
    %406 = vector.broadcast %405 : f32 to vector<8x8xf32>
    %407 = arith.select %404, %406, %381 : vector<8x8xi1>, vector<8x8xf32>
    %c14_226 = arith.constant 14 : index
    %c1_227 = arith.constant 1 : index
    %408 = memref.load %arg1[%c14_226, %c1_227] : memref<32x8xf32, #tpu.memory_space<smem>>
    %409 = vector.broadcast %408 : f32 to vector<8x8xf32>
    %410 = arith.select %404, %409, %384 : vector<8x8xi1>, vector<8x8xf32>
    %c14_228 = arith.constant 14 : index
    %c2_229 = arith.constant 2 : index
    %411 = memref.load %arg1[%c14_228, %c2_229] : memref<32x8xf32, #tpu.memory_space<smem>>
    %412 = vector.broadcast %411 : f32 to vector<8x8xf32>
    %413 = arith.select %404, %412, %387 : vector<8x8xi1>, vector<8x8xf32>
    %c14_230 = arith.constant 14 : index
    %c3_231 = arith.constant 3 : index
    %414 = memref.load %arg1[%c14_230, %c3_231] : memref<32x8xf32, #tpu.memory_space<smem>>
    %415 = vector.broadcast %414 : f32 to vector<8x8xf32>
    %416 = arith.select %404, %415, %390 : vector<8x8xi1>, vector<8x8xf32>
    %c14_232 = arith.constant 14 : index
    %c4_233 = arith.constant 4 : index
    %417 = memref.load %arg1[%c14_232, %c4_233] : memref<32x8xf32, #tpu.memory_space<smem>>
    %418 = vector.broadcast %417 : f32 to vector<8x8xf32>
    %419 = arith.select %404, %418, %393 : vector<8x8xi1>, vector<8x8xf32>
    %c14_234 = arith.constant 14 : index
    %c5_235 = arith.constant 5 : index
    %420 = memref.load %arg1[%c14_234, %c5_235] : memref<32x8xf32, #tpu.memory_space<smem>>
    %421 = vector.broadcast %420 : f32 to vector<8x8xf32>
    %422 = arith.select %404, %421, %396 : vector<8x8xi1>, vector<8x8xf32>
    %c14_236 = arith.constant 14 : index
    %c6_237 = arith.constant 6 : index
    %423 = memref.load %arg1[%c14_236, %c6_237] : memref<32x8xf32, #tpu.memory_space<smem>>
    %424 = vector.broadcast %423 : f32 to vector<8x8xf32>
    %425 = arith.select %404, %424, %399 : vector<8x8xi1>, vector<8x8xf32>
    %c14_238 = arith.constant 14 : index
    %c7_239 = arith.constant 7 : index
    %426 = memref.load %arg1[%c14_238, %c7_239] : memref<32x8xf32, #tpu.memory_space<smem>>
    %427 = vector.broadcast %426 : f32 to vector<8x8xf32>
    %428 = arith.select %404, %427, %402 : vector<8x8xi1>, vector<8x8xf32>
    %c15_i32_240 = arith.constant 15 : i32
    %429 = vector.broadcast %c15_i32_240 : i32 to vector<8x8xi32>
    %430 = arith.cmpi eq, %30, %429 : vector<8x8xi32>
    %c15 = arith.constant 15 : index
    %c0_241 = arith.constant 0 : index
    %431 = memref.load %arg1[%c15, %c0_241] : memref<32x8xf32, #tpu.memory_space<smem>>
    %432 = vector.broadcast %431 : f32 to vector<8x8xf32>
    %433 = arith.select %430, %432, %407 : vector<8x8xi1>, vector<8x8xf32>
    %c15_242 = arith.constant 15 : index
    %c1_243 = arith.constant 1 : index
    %434 = memref.load %arg1[%c15_242, %c1_243] : memref<32x8xf32, #tpu.memory_space<smem>>
    %435 = vector.broadcast %434 : f32 to vector<8x8xf32>
    %436 = arith.select %430, %435, %410 : vector<8x8xi1>, vector<8x8xf32>
    %c15_244 = arith.constant 15 : index
    %c2_245 = arith.constant 2 : index
    %437 = memref.load %arg1[%c15_244, %c2_245] : memref<32x8xf32, #tpu.memory_space<smem>>
    %438 = vector.broadcast %437 : f32 to vector<8x8xf32>
    %439 = arith.select %430, %438, %413 : vector<8x8xi1>, vector<8x8xf32>
    %c15_246 = arith.constant 15 : index
    %c3_247 = arith.constant 3 : index
    %440 = memref.load %arg1[%c15_246, %c3_247] : memref<32x8xf32, #tpu.memory_space<smem>>
    %441 = vector.broadcast %440 : f32 to vector<8x8xf32>
    %442 = arith.select %430, %441, %416 : vector<8x8xi1>, vector<8x8xf32>
    %c15_248 = arith.constant 15 : index
    %c4_249 = arith.constant 4 : index
    %443 = memref.load %arg1[%c15_248, %c4_249] : memref<32x8xf32, #tpu.memory_space<smem>>
    %444 = vector.broadcast %443 : f32 to vector<8x8xf32>
    %445 = arith.select %430, %444, %419 : vector<8x8xi1>, vector<8x8xf32>
    %c15_250 = arith.constant 15 : index
    %c5_251 = arith.constant 5 : index
    %446 = memref.load %arg1[%c15_250, %c5_251] : memref<32x8xf32, #tpu.memory_space<smem>>
    %447 = vector.broadcast %446 : f32 to vector<8x8xf32>
    %448 = arith.select %430, %447, %422 : vector<8x8xi1>, vector<8x8xf32>
    %c15_252 = arith.constant 15 : index
    %c6_253 = arith.constant 6 : index
    %449 = memref.load %arg1[%c15_252, %c6_253] : memref<32x8xf32, #tpu.memory_space<smem>>
    %450 = vector.broadcast %449 : f32 to vector<8x8xf32>
    %451 = arith.select %430, %450, %425 : vector<8x8xi1>, vector<8x8xf32>
    %c15_254 = arith.constant 15 : index
    %c7_255 = arith.constant 7 : index
    %452 = memref.load %arg1[%c15_254, %c7_255] : memref<32x8xf32, #tpu.memory_space<smem>>
    %453 = vector.broadcast %452 : f32 to vector<8x8xf32>
    %454 = arith.select %430, %453, %428 : vector<8x8xi1>, vector<8x8xf32>
    %c16_i32_256 = arith.constant 16 : i32
    %455 = vector.broadcast %c16_i32_256 : i32 to vector<8x8xi32>
    %456 = arith.cmpi eq, %30, %455 : vector<8x8xi32>
    %c16 = arith.constant 16 : index
    %c0_257 = arith.constant 0 : index
    %457 = memref.load %arg1[%c16, %c0_257] : memref<32x8xf32, #tpu.memory_space<smem>>
    %458 = vector.broadcast %457 : f32 to vector<8x8xf32>
    %459 = arith.select %456, %458, %433 : vector<8x8xi1>, vector<8x8xf32>
    %c16_258 = arith.constant 16 : index
    %c1_259 = arith.constant 1 : index
    %460 = memref.load %arg1[%c16_258, %c1_259] : memref<32x8xf32, #tpu.memory_space<smem>>
    %461 = vector.broadcast %460 : f32 to vector<8x8xf32>
    %462 = arith.select %456, %461, %436 : vector<8x8xi1>, vector<8x8xf32>
    %c16_260 = arith.constant 16 : index
    %c2_261 = arith.constant 2 : index
    %463 = memref.load %arg1[%c16_260, %c2_261] : memref<32x8xf32, #tpu.memory_space<smem>>
    %464 = vector.broadcast %463 : f32 to vector<8x8xf32>
    %465 = arith.select %456, %464, %439 : vector<8x8xi1>, vector<8x8xf32>
    %c16_262 = arith.constant 16 : index
    %c3_263 = arith.constant 3 : index
    %466 = memref.load %arg1[%c16_262, %c3_263] : memref<32x8xf32, #tpu.memory_space<smem>>
    %467 = vector.broadcast %466 : f32 to vector<8x8xf32>
    %468 = arith.select %456, %467, %442 : vector<8x8xi1>, vector<8x8xf32>
    %c16_264 = arith.constant 16 : index
    %c4_265 = arith.constant 4 : index
    %469 = memref.load %arg1[%c16_264, %c4_265] : memref<32x8xf32, #tpu.memory_space<smem>>
    %470 = vector.broadcast %469 : f32 to vector<8x8xf32>
    %471 = arith.select %456, %470, %445 : vector<8x8xi1>, vector<8x8xf32>
    %c16_266 = arith.constant 16 : index
    %c5_267 = arith.constant 5 : index
    %472 = memref.load %arg1[%c16_266, %c5_267] : memref<32x8xf32, #tpu.memory_space<smem>>
    %473 = vector.broadcast %472 : f32 to vector<8x8xf32>
    %474 = arith.select %456, %473, %448 : vector<8x8xi1>, vector<8x8xf32>
    %c16_268 = arith.constant 16 : index
    %c6_269 = arith.constant 6 : index
    %475 = memref.load %arg1[%c16_268, %c6_269] : memref<32x8xf32, #tpu.memory_space<smem>>
    %476 = vector.broadcast %475 : f32 to vector<8x8xf32>
    %477 = arith.select %456, %476, %451 : vector<8x8xi1>, vector<8x8xf32>
    %c16_270 = arith.constant 16 : index
    %c7_271 = arith.constant 7 : index
    %478 = memref.load %arg1[%c16_270, %c7_271] : memref<32x8xf32, #tpu.memory_space<smem>>
    %479 = vector.broadcast %478 : f32 to vector<8x8xf32>
    %480 = arith.select %456, %479, %454 : vector<8x8xi1>, vector<8x8xf32>
    %c17_i32 = arith.constant 17 : i32
    %481 = vector.broadcast %c17_i32 : i32 to vector<8x8xi32>
    %482 = arith.cmpi eq, %30, %481 : vector<8x8xi32>
    %c17 = arith.constant 17 : index
    %c0_272 = arith.constant 0 : index
    %483 = memref.load %arg1[%c17, %c0_272] : memref<32x8xf32, #tpu.memory_space<smem>>
    %484 = vector.broadcast %483 : f32 to vector<8x8xf32>
    %485 = arith.select %482, %484, %459 : vector<8x8xi1>, vector<8x8xf32>
    %c17_273 = arith.constant 17 : index
    %c1_274 = arith.constant 1 : index
    %486 = memref.load %arg1[%c17_273, %c1_274] : memref<32x8xf32, #tpu.memory_space<smem>>
    %487 = vector.broadcast %486 : f32 to vector<8x8xf32>
    %488 = arith.select %482, %487, %462 : vector<8x8xi1>, vector<8x8xf32>
    %c17_275 = arith.constant 17 : index
    %c2_276 = arith.constant 2 : index
    %489 = memref.load %arg1[%c17_275, %c2_276] : memref<32x8xf32, #tpu.memory_space<smem>>
    %490 = vector.broadcast %489 : f32 to vector<8x8xf32>
    %491 = arith.select %482, %490, %465 : vector<8x8xi1>, vector<8x8xf32>
    %c17_277 = arith.constant 17 : index
    %c3_278 = arith.constant 3 : index
    %492 = memref.load %arg1[%c17_277, %c3_278] : memref<32x8xf32, #tpu.memory_space<smem>>
    %493 = vector.broadcast %492 : f32 to vector<8x8xf32>
    %494 = arith.select %482, %493, %468 : vector<8x8xi1>, vector<8x8xf32>
    %c17_279 = arith.constant 17 : index
    %c4_280 = arith.constant 4 : index
    %495 = memref.load %arg1[%c17_279, %c4_280] : memref<32x8xf32, #tpu.memory_space<smem>>
    %496 = vector.broadcast %495 : f32 to vector<8x8xf32>
    %497 = arith.select %482, %496, %471 : vector<8x8xi1>, vector<8x8xf32>
    %c17_281 = arith.constant 17 : index
    %c5_282 = arith.constant 5 : index
    %498 = memref.load %arg1[%c17_281, %c5_282] : memref<32x8xf32, #tpu.memory_space<smem>>
    %499 = vector.broadcast %498 : f32 to vector<8x8xf32>
    %500 = arith.select %482, %499, %474 : vector<8x8xi1>, vector<8x8xf32>
    %c17_283 = arith.constant 17 : index
    %c6_284 = arith.constant 6 : index
    %501 = memref.load %arg1[%c17_283, %c6_284] : memref<32x8xf32, #tpu.memory_space<smem>>
    %502 = vector.broadcast %501 : f32 to vector<8x8xf32>
    %503 = arith.select %482, %502, %477 : vector<8x8xi1>, vector<8x8xf32>
    %c17_285 = arith.constant 17 : index
    %c7_286 = arith.constant 7 : index
    %504 = memref.load %arg1[%c17_285, %c7_286] : memref<32x8xf32, #tpu.memory_space<smem>>
    %505 = vector.broadcast %504 : f32 to vector<8x8xf32>
    %506 = arith.select %482, %505, %480 : vector<8x8xi1>, vector<8x8xf32>
    %c18_i32 = arith.constant 18 : i32
    %507 = vector.broadcast %c18_i32 : i32 to vector<8x8xi32>
    %508 = arith.cmpi eq, %30, %507 : vector<8x8xi32>
    %c18 = arith.constant 18 : index
    %c0_287 = arith.constant 0 : index
    %509 = memref.load %arg1[%c18, %c0_287] : memref<32x8xf32, #tpu.memory_space<smem>>
    %510 = vector.broadcast %509 : f32 to vector<8x8xf32>
    %511 = arith.select %508, %510, %485 : vector<8x8xi1>, vector<8x8xf32>
    %c18_288 = arith.constant 18 : index
    %c1_289 = arith.constant 1 : index
    %512 = memref.load %arg1[%c18_288, %c1_289] : memref<32x8xf32, #tpu.memory_space<smem>>
    %513 = vector.broadcast %512 : f32 to vector<8x8xf32>
    %514 = arith.select %508, %513, %488 : vector<8x8xi1>, vector<8x8xf32>
    %c18_290 = arith.constant 18 : index
    %c2_291 = arith.constant 2 : index
    %515 = memref.load %arg1[%c18_290, %c2_291] : memref<32x8xf32, #tpu.memory_space<smem>>
    %516 = vector.broadcast %515 : f32 to vector<8x8xf32>
    %517 = arith.select %508, %516, %491 : vector<8x8xi1>, vector<8x8xf32>
    %c18_292 = arith.constant 18 : index
    %c3_293 = arith.constant 3 : index
    %518 = memref.load %arg1[%c18_292, %c3_293] : memref<32x8xf32, #tpu.memory_space<smem>>
    %519 = vector.broadcast %518 : f32 to vector<8x8xf32>
    %520 = arith.select %508, %519, %494 : vector<8x8xi1>, vector<8x8xf32>
    %c18_294 = arith.constant 18 : index
    %c4_295 = arith.constant 4 : index
    %521 = memref.load %arg1[%c18_294, %c4_295] : memref<32x8xf32, #tpu.memory_space<smem>>
    %522 = vector.broadcast %521 : f32 to vector<8x8xf32>
    %523 = arith.select %508, %522, %497 : vector<8x8xi1>, vector<8x8xf32>
    %c18_296 = arith.constant 18 : index
    %c5_297 = arith.constant 5 : index
    %524 = memref.load %arg1[%c18_296, %c5_297] : memref<32x8xf32, #tpu.memory_space<smem>>
    %525 = vector.broadcast %524 : f32 to vector<8x8xf32>
    %526 = arith.select %508, %525, %500 : vector<8x8xi1>, vector<8x8xf32>
    %c18_298 = arith.constant 18 : index
    %c6_299 = arith.constant 6 : index
    %527 = memref.load %arg1[%c18_298, %c6_299] : memref<32x8xf32, #tpu.memory_space<smem>>
    %528 = vector.broadcast %527 : f32 to vector<8x8xf32>
    %529 = arith.select %508, %528, %503 : vector<8x8xi1>, vector<8x8xf32>
    %c18_300 = arith.constant 18 : index
    %c7_301 = arith.constant 7 : index
    %530 = memref.load %arg1[%c18_300, %c7_301] : memref<32x8xf32, #tpu.memory_space<smem>>
    %531 = vector.broadcast %530 : f32 to vector<8x8xf32>
    %532 = arith.select %508, %531, %506 : vector<8x8xi1>, vector<8x8xf32>
    %c19_i32 = arith.constant 19 : i32
    %533 = vector.broadcast %c19_i32 : i32 to vector<8x8xi32>
    %534 = arith.cmpi eq, %30, %533 : vector<8x8xi32>
    %c19 = arith.constant 19 : index
    %c0_302 = arith.constant 0 : index
    %535 = memref.load %arg1[%c19, %c0_302] : memref<32x8xf32, #tpu.memory_space<smem>>
    %536 = vector.broadcast %535 : f32 to vector<8x8xf32>
    %537 = arith.select %534, %536, %511 : vector<8x8xi1>, vector<8x8xf32>
    %c19_303 = arith.constant 19 : index
    %c1_304 = arith.constant 1 : index
    %538 = memref.load %arg1[%c19_303, %c1_304] : memref<32x8xf32, #tpu.memory_space<smem>>
    %539 = vector.broadcast %538 : f32 to vector<8x8xf32>
    %540 = arith.select %534, %539, %514 : vector<8x8xi1>, vector<8x8xf32>
    %c19_305 = arith.constant 19 : index
    %c2_306 = arith.constant 2 : index
    %541 = memref.load %arg1[%c19_305, %c2_306] : memref<32x8xf32, #tpu.memory_space<smem>>
    %542 = vector.broadcast %541 : f32 to vector<8x8xf32>
    %543 = arith.select %534, %542, %517 : vector<8x8xi1>, vector<8x8xf32>
    %c19_307 = arith.constant 19 : index
    %c3_308 = arith.constant 3 : index
    %544 = memref.load %arg1[%c19_307, %c3_308] : memref<32x8xf32, #tpu.memory_space<smem>>
    %545 = vector.broadcast %544 : f32 to vector<8x8xf32>
    %546 = arith.select %534, %545, %520 : vector<8x8xi1>, vector<8x8xf32>
    %c19_309 = arith.constant 19 : index
    %c4_310 = arith.constant 4 : index
    %547 = memref.load %arg1[%c19_309, %c4_310] : memref<32x8xf32, #tpu.memory_space<smem>>
    %548 = vector.broadcast %547 : f32 to vector<8x8xf32>
    %549 = arith.select %534, %548, %523 : vector<8x8xi1>, vector<8x8xf32>
    %c19_311 = arith.constant 19 : index
    %c5_312 = arith.constant 5 : index
    %550 = memref.load %arg1[%c19_311, %c5_312] : memref<32x8xf32, #tpu.memory_space<smem>>
    %551 = vector.broadcast %550 : f32 to vector<8x8xf32>
    %552 = arith.select %534, %551, %526 : vector<8x8xi1>, vector<8x8xf32>
    %c19_313 = arith.constant 19 : index
    %c6_314 = arith.constant 6 : index
    %553 = memref.load %arg1[%c19_313, %c6_314] : memref<32x8xf32, #tpu.memory_space<smem>>
    %554 = vector.broadcast %553 : f32 to vector<8x8xf32>
    %555 = arith.select %534, %554, %529 : vector<8x8xi1>, vector<8x8xf32>
    %c19_315 = arith.constant 19 : index
    %c7_316 = arith.constant 7 : index
    %556 = memref.load %arg1[%c19_315, %c7_316] : memref<32x8xf32, #tpu.memory_space<smem>>
    %557 = vector.broadcast %556 : f32 to vector<8x8xf32>
    %558 = arith.select %534, %557, %532 : vector<8x8xi1>, vector<8x8xf32>
    %c20_i32 = arith.constant 20 : i32
    %559 = vector.broadcast %c20_i32 : i32 to vector<8x8xi32>
    %560 = arith.cmpi eq, %30, %559 : vector<8x8xi32>
    %c20 = arith.constant 20 : index
    %c0_317 = arith.constant 0 : index
    %561 = memref.load %arg1[%c20, %c0_317] : memref<32x8xf32, #tpu.memory_space<smem>>
    %562 = vector.broadcast %561 : f32 to vector<8x8xf32>
    %563 = arith.select %560, %562, %537 : vector<8x8xi1>, vector<8x8xf32>
    %c20_318 = arith.constant 20 : index
    %c1_319 = arith.constant 1 : index
    %564 = memref.load %arg1[%c20_318, %c1_319] : memref<32x8xf32, #tpu.memory_space<smem>>
    %565 = vector.broadcast %564 : f32 to vector<8x8xf32>
    %566 = arith.select %560, %565, %540 : vector<8x8xi1>, vector<8x8xf32>
    %c20_320 = arith.constant 20 : index
    %c2_321 = arith.constant 2 : index
    %567 = memref.load %arg1[%c20_320, %c2_321] : memref<32x8xf32, #tpu.memory_space<smem>>
    %568 = vector.broadcast %567 : f32 to vector<8x8xf32>
    %569 = arith.select %560, %568, %543 : vector<8x8xi1>, vector<8x8xf32>
    %c20_322 = arith.constant 20 : index
    %c3_323 = arith.constant 3 : index
    %570 = memref.load %arg1[%c20_322, %c3_323] : memref<32x8xf32, #tpu.memory_space<smem>>
    %571 = vector.broadcast %570 : f32 to vector<8x8xf32>
    %572 = arith.select %560, %571, %546 : vector<8x8xi1>, vector<8x8xf32>
    %c20_324 = arith.constant 20 : index
    %c4_325 = arith.constant 4 : index
    %573 = memref.load %arg1[%c20_324, %c4_325] : memref<32x8xf32, #tpu.memory_space<smem>>
    %574 = vector.broadcast %573 : f32 to vector<8x8xf32>
    %575 = arith.select %560, %574, %549 : vector<8x8xi1>, vector<8x8xf32>
    %c20_326 = arith.constant 20 : index
    %c5_327 = arith.constant 5 : index
    %576 = memref.load %arg1[%c20_326, %c5_327] : memref<32x8xf32, #tpu.memory_space<smem>>
    %577 = vector.broadcast %576 : f32 to vector<8x8xf32>
    %578 = arith.select %560, %577, %552 : vector<8x8xi1>, vector<8x8xf32>
    %c20_328 = arith.constant 20 : index
    %c6_329 = arith.constant 6 : index
    %579 = memref.load %arg1[%c20_328, %c6_329] : memref<32x8xf32, #tpu.memory_space<smem>>
    %580 = vector.broadcast %579 : f32 to vector<8x8xf32>
    %581 = arith.select %560, %580, %555 : vector<8x8xi1>, vector<8x8xf32>
    %c20_330 = arith.constant 20 : index
    %c7_331 = arith.constant 7 : index
    %582 = memref.load %arg1[%c20_330, %c7_331] : memref<32x8xf32, #tpu.memory_space<smem>>
    %583 = vector.broadcast %582 : f32 to vector<8x8xf32>
    %584 = arith.select %560, %583, %558 : vector<8x8xi1>, vector<8x8xf32>
    %c21_i32 = arith.constant 21 : i32
    %585 = vector.broadcast %c21_i32 : i32 to vector<8x8xi32>
    %586 = arith.cmpi eq, %30, %585 : vector<8x8xi32>
    %c21 = arith.constant 21 : index
    %c0_332 = arith.constant 0 : index
    %587 = memref.load %arg1[%c21, %c0_332] : memref<32x8xf32, #tpu.memory_space<smem>>
    %588 = vector.broadcast %587 : f32 to vector<8x8xf32>
    %589 = arith.select %586, %588, %563 : vector<8x8xi1>, vector<8x8xf32>
    %c21_333 = arith.constant 21 : index
    %c1_334 = arith.constant 1 : index
    %590 = memref.load %arg1[%c21_333, %c1_334] : memref<32x8xf32, #tpu.memory_space<smem>>
    %591 = vector.broadcast %590 : f32 to vector<8x8xf32>
    %592 = arith.select %586, %591, %566 : vector<8x8xi1>, vector<8x8xf32>
    %c21_335 = arith.constant 21 : index
    %c2_336 = arith.constant 2 : index
    %593 = memref.load %arg1[%c21_335, %c2_336] : memref<32x8xf32, #tpu.memory_space<smem>>
    %594 = vector.broadcast %593 : f32 to vector<8x8xf32>
    %595 = arith.select %586, %594, %569 : vector<8x8xi1>, vector<8x8xf32>
    %c21_337 = arith.constant 21 : index
    %c3_338 = arith.constant 3 : index
    %596 = memref.load %arg1[%c21_337, %c3_338] : memref<32x8xf32, #tpu.memory_space<smem>>
    %597 = vector.broadcast %596 : f32 to vector<8x8xf32>
    %598 = arith.select %586, %597, %572 : vector<8x8xi1>, vector<8x8xf32>
    %c21_339 = arith.constant 21 : index
    %c4_340 = arith.constant 4 : index
    %599 = memref.load %arg1[%c21_339, %c4_340] : memref<32x8xf32, #tpu.memory_space<smem>>
    %600 = vector.broadcast %599 : f32 to vector<8x8xf32>
    %601 = arith.select %586, %600, %575 : vector<8x8xi1>, vector<8x8xf32>
    %c21_341 = arith.constant 21 : index
    %c5_342 = arith.constant 5 : index
    %602 = memref.load %arg1[%c21_341, %c5_342] : memref<32x8xf32, #tpu.memory_space<smem>>
    %603 = vector.broadcast %602 : f32 to vector<8x8xf32>
    %604 = arith.select %586, %603, %578 : vector<8x8xi1>, vector<8x8xf32>
    %c21_343 = arith.constant 21 : index
    %c6_344 = arith.constant 6 : index
    %605 = memref.load %arg1[%c21_343, %c6_344] : memref<32x8xf32, #tpu.memory_space<smem>>
    %606 = vector.broadcast %605 : f32 to vector<8x8xf32>
    %607 = arith.select %586, %606, %581 : vector<8x8xi1>, vector<8x8xf32>
    %c21_345 = arith.constant 21 : index
    %c7_346 = arith.constant 7 : index
    %608 = memref.load %arg1[%c21_345, %c7_346] : memref<32x8xf32, #tpu.memory_space<smem>>
    %609 = vector.broadcast %608 : f32 to vector<8x8xf32>
    %610 = arith.select %586, %609, %584 : vector<8x8xi1>, vector<8x8xf32>
    %c22_i32 = arith.constant 22 : i32
    %611 = vector.broadcast %c22_i32 : i32 to vector<8x8xi32>
    %612 = arith.cmpi eq, %30, %611 : vector<8x8xi32>
    %c22 = arith.constant 22 : index
    %c0_347 = arith.constant 0 : index
    %613 = memref.load %arg1[%c22, %c0_347] : memref<32x8xf32, #tpu.memory_space<smem>>
    %614 = vector.broadcast %613 : f32 to vector<8x8xf32>
    %615 = arith.select %612, %614, %589 : vector<8x8xi1>, vector<8x8xf32>
    %c22_348 = arith.constant 22 : index
    %c1_349 = arith.constant 1 : index
    %616 = memref.load %arg1[%c22_348, %c1_349] : memref<32x8xf32, #tpu.memory_space<smem>>
    %617 = vector.broadcast %616 : f32 to vector<8x8xf32>
    %618 = arith.select %612, %617, %592 : vector<8x8xi1>, vector<8x8xf32>
    %c22_350 = arith.constant 22 : index
    %c2_351 = arith.constant 2 : index
    %619 = memref.load %arg1[%c22_350, %c2_351] : memref<32x8xf32, #tpu.memory_space<smem>>
    %620 = vector.broadcast %619 : f32 to vector<8x8xf32>
    %621 = arith.select %612, %620, %595 : vector<8x8xi1>, vector<8x8xf32>
    %c22_352 = arith.constant 22 : index
    %c3_353 = arith.constant 3 : index
    %622 = memref.load %arg1[%c22_352, %c3_353] : memref<32x8xf32, #tpu.memory_space<smem>>
    %623 = vector.broadcast %622 : f32 to vector<8x8xf32>
    %624 = arith.select %612, %623, %598 : vector<8x8xi1>, vector<8x8xf32>
    %c22_354 = arith.constant 22 : index
    %c4_355 = arith.constant 4 : index
    %625 = memref.load %arg1[%c22_354, %c4_355] : memref<32x8xf32, #tpu.memory_space<smem>>
    %626 = vector.broadcast %625 : f32 to vector<8x8xf32>
    %627 = arith.select %612, %626, %601 : vector<8x8xi1>, vector<8x8xf32>
    %c22_356 = arith.constant 22 : index
    %c5_357 = arith.constant 5 : index
    %628 = memref.load %arg1[%c22_356, %c5_357] : memref<32x8xf32, #tpu.memory_space<smem>>
    %629 = vector.broadcast %628 : f32 to vector<8x8xf32>
    %630 = arith.select %612, %629, %604 : vector<8x8xi1>, vector<8x8xf32>
    %c22_358 = arith.constant 22 : index
    %c6_359 = arith.constant 6 : index
    %631 = memref.load %arg1[%c22_358, %c6_359] : memref<32x8xf32, #tpu.memory_space<smem>>
    %632 = vector.broadcast %631 : f32 to vector<8x8xf32>
    %633 = arith.select %612, %632, %607 : vector<8x8xi1>, vector<8x8xf32>
    %c22_360 = arith.constant 22 : index
    %c7_361 = arith.constant 7 : index
    %634 = memref.load %arg1[%c22_360, %c7_361] : memref<32x8xf32, #tpu.memory_space<smem>>
    %635 = vector.broadcast %634 : f32 to vector<8x8xf32>
    %636 = arith.select %612, %635, %610 : vector<8x8xi1>, vector<8x8xf32>
    %c23_i32 = arith.constant 23 : i32
    %637 = vector.broadcast %c23_i32 : i32 to vector<8x8xi32>
    %638 = arith.cmpi eq, %30, %637 : vector<8x8xi32>
    %c23 = arith.constant 23 : index
    %c0_362 = arith.constant 0 : index
    %639 = memref.load %arg1[%c23, %c0_362] : memref<32x8xf32, #tpu.memory_space<smem>>
    %640 = vector.broadcast %639 : f32 to vector<8x8xf32>
    %641 = arith.select %638, %640, %615 : vector<8x8xi1>, vector<8x8xf32>
    %c23_363 = arith.constant 23 : index
    %c1_364 = arith.constant 1 : index
    %642 = memref.load %arg1[%c23_363, %c1_364] : memref<32x8xf32, #tpu.memory_space<smem>>
    %643 = vector.broadcast %642 : f32 to vector<8x8xf32>
    %644 = arith.select %638, %643, %618 : vector<8x8xi1>, vector<8x8xf32>
    %c23_365 = arith.constant 23 : index
    %c2_366 = arith.constant 2 : index
    %645 = memref.load %arg1[%c23_365, %c2_366] : memref<32x8xf32, #tpu.memory_space<smem>>
    %646 = vector.broadcast %645 : f32 to vector<8x8xf32>
    %647 = arith.select %638, %646, %621 : vector<8x8xi1>, vector<8x8xf32>
    %c23_367 = arith.constant 23 : index
    %c3_368 = arith.constant 3 : index
    %648 = memref.load %arg1[%c23_367, %c3_368] : memref<32x8xf32, #tpu.memory_space<smem>>
    %649 = vector.broadcast %648 : f32 to vector<8x8xf32>
    %650 = arith.select %638, %649, %624 : vector<8x8xi1>, vector<8x8xf32>
    %c23_369 = arith.constant 23 : index
    %c4_370 = arith.constant 4 : index
    %651 = memref.load %arg1[%c23_369, %c4_370] : memref<32x8xf32, #tpu.memory_space<smem>>
    %652 = vector.broadcast %651 : f32 to vector<8x8xf32>
    %653 = arith.select %638, %652, %627 : vector<8x8xi1>, vector<8x8xf32>
    %c23_371 = arith.constant 23 : index
    %c5_372 = arith.constant 5 : index
    %654 = memref.load %arg1[%c23_371, %c5_372] : memref<32x8xf32, #tpu.memory_space<smem>>
    %655 = vector.broadcast %654 : f32 to vector<8x8xf32>
    %656 = arith.select %638, %655, %630 : vector<8x8xi1>, vector<8x8xf32>
    %c23_373 = arith.constant 23 : index
    %c6_374 = arith.constant 6 : index
    %657 = memref.load %arg1[%c23_373, %c6_374] : memref<32x8xf32, #tpu.memory_space<smem>>
    %658 = vector.broadcast %657 : f32 to vector<8x8xf32>
    %659 = arith.select %638, %658, %633 : vector<8x8xi1>, vector<8x8xf32>
    %c23_375 = arith.constant 23 : index
    %c7_376 = arith.constant 7 : index
    %660 = memref.load %arg1[%c23_375, %c7_376] : memref<32x8xf32, #tpu.memory_space<smem>>
    %661 = vector.broadcast %660 : f32 to vector<8x8xf32>
    %662 = arith.select %638, %661, %636 : vector<8x8xi1>, vector<8x8xf32>
    %c24_i32 = arith.constant 24 : i32
    %663 = vector.broadcast %c24_i32 : i32 to vector<8x8xi32>
    %664 = arith.cmpi eq, %30, %663 : vector<8x8xi32>
    %c24 = arith.constant 24 : index
    %c0_377 = arith.constant 0 : index
    %665 = memref.load %arg1[%c24, %c0_377] : memref<32x8xf32, #tpu.memory_space<smem>>
    %666 = vector.broadcast %665 : f32 to vector<8x8xf32>
    %667 = arith.select %664, %666, %641 : vector<8x8xi1>, vector<8x8xf32>
    %c24_378 = arith.constant 24 : index
    %c1_379 = arith.constant 1 : index
    %668 = memref.load %arg1[%c24_378, %c1_379] : memref<32x8xf32, #tpu.memory_space<smem>>
    %669 = vector.broadcast %668 : f32 to vector<8x8xf32>
    %670 = arith.select %664, %669, %644 : vector<8x8xi1>, vector<8x8xf32>
    %c24_380 = arith.constant 24 : index
    %c2_381 = arith.constant 2 : index
    %671 = memref.load %arg1[%c24_380, %c2_381] : memref<32x8xf32, #tpu.memory_space<smem>>
    %672 = vector.broadcast %671 : f32 to vector<8x8xf32>
    %673 = arith.select %664, %672, %647 : vector<8x8xi1>, vector<8x8xf32>
    %c24_382 = arith.constant 24 : index
    %c3_383 = arith.constant 3 : index
    %674 = memref.load %arg1[%c24_382, %c3_383] : memref<32x8xf32, #tpu.memory_space<smem>>
    %675 = vector.broadcast %674 : f32 to vector<8x8xf32>
    %676 = arith.select %664, %675, %650 : vector<8x8xi1>, vector<8x8xf32>
    %c24_384 = arith.constant 24 : index
    %c4_385 = arith.constant 4 : index
    %677 = memref.load %arg1[%c24_384, %c4_385] : memref<32x8xf32, #tpu.memory_space<smem>>
    %678 = vector.broadcast %677 : f32 to vector<8x8xf32>
    %679 = arith.select %664, %678, %653 : vector<8x8xi1>, vector<8x8xf32>
    %c24_386 = arith.constant 24 : index
    %c5_387 = arith.constant 5 : index
    %680 = memref.load %arg1[%c24_386, %c5_387] : memref<32x8xf32, #tpu.memory_space<smem>>
    %681 = vector.broadcast %680 : f32 to vector<8x8xf32>
    %682 = arith.select %664, %681, %656 : vector<8x8xi1>, vector<8x8xf32>
    %c24_388 = arith.constant 24 : index
    %c6_389 = arith.constant 6 : index
    %683 = memref.load %arg1[%c24_388, %c6_389] : memref<32x8xf32, #tpu.memory_space<smem>>
    %684 = vector.broadcast %683 : f32 to vector<8x8xf32>
    %685 = arith.select %664, %684, %659 : vector<8x8xi1>, vector<8x8xf32>
    %c24_390 = arith.constant 24 : index
    %c7_391 = arith.constant 7 : index
    %686 = memref.load %arg1[%c24_390, %c7_391] : memref<32x8xf32, #tpu.memory_space<smem>>
    %687 = vector.broadcast %686 : f32 to vector<8x8xf32>
    %688 = arith.select %664, %687, %662 : vector<8x8xi1>, vector<8x8xf32>
    %c25_i32 = arith.constant 25 : i32
    %689 = vector.broadcast %c25_i32 : i32 to vector<8x8xi32>
    %690 = arith.cmpi eq, %30, %689 : vector<8x8xi32>
    %c25 = arith.constant 25 : index
    %c0_392 = arith.constant 0 : index
    %691 = memref.load %arg1[%c25, %c0_392] : memref<32x8xf32, #tpu.memory_space<smem>>
    %692 = vector.broadcast %691 : f32 to vector<8x8xf32>
    %693 = arith.select %690, %692, %667 : vector<8x8xi1>, vector<8x8xf32>
    %c25_393 = arith.constant 25 : index
    %c1_394 = arith.constant 1 : index
    %694 = memref.load %arg1[%c25_393, %c1_394] : memref<32x8xf32, #tpu.memory_space<smem>>
    %695 = vector.broadcast %694 : f32 to vector<8x8xf32>
    %696 = arith.select %690, %695, %670 : vector<8x8xi1>, vector<8x8xf32>
    %c25_395 = arith.constant 25 : index
    %c2_396 = arith.constant 2 : index
    %697 = memref.load %arg1[%c25_395, %c2_396] : memref<32x8xf32, #tpu.memory_space<smem>>
    %698 = vector.broadcast %697 : f32 to vector<8x8xf32>
    %699 = arith.select %690, %698, %673 : vector<8x8xi1>, vector<8x8xf32>
    %c25_397 = arith.constant 25 : index
    %c3_398 = arith.constant 3 : index
    %700 = memref.load %arg1[%c25_397, %c3_398] : memref<32x8xf32, #tpu.memory_space<smem>>
    %701 = vector.broadcast %700 : f32 to vector<8x8xf32>
    %702 = arith.select %690, %701, %676 : vector<8x8xi1>, vector<8x8xf32>
    %c25_399 = arith.constant 25 : index
    %c4_400 = arith.constant 4 : index
    %703 = memref.load %arg1[%c25_399, %c4_400] : memref<32x8xf32, #tpu.memory_space<smem>>
    %704 = vector.broadcast %703 : f32 to vector<8x8xf32>
    %705 = arith.select %690, %704, %679 : vector<8x8xi1>, vector<8x8xf32>
    %c25_401 = arith.constant 25 : index
    %c5_402 = arith.constant 5 : index
    %706 = memref.load %arg1[%c25_401, %c5_402] : memref<32x8xf32, #tpu.memory_space<smem>>
    %707 = vector.broadcast %706 : f32 to vector<8x8xf32>
    %708 = arith.select %690, %707, %682 : vector<8x8xi1>, vector<8x8xf32>
    %c25_403 = arith.constant 25 : index
    %c6_404 = arith.constant 6 : index
    %709 = memref.load %arg1[%c25_403, %c6_404] : memref<32x8xf32, #tpu.memory_space<smem>>
    %710 = vector.broadcast %709 : f32 to vector<8x8xf32>
    %711 = arith.select %690, %710, %685 : vector<8x8xi1>, vector<8x8xf32>
    %c25_405 = arith.constant 25 : index
    %c7_406 = arith.constant 7 : index
    %712 = memref.load %arg1[%c25_405, %c7_406] : memref<32x8xf32, #tpu.memory_space<smem>>
    %713 = vector.broadcast %712 : f32 to vector<8x8xf32>
    %714 = arith.select %690, %713, %688 : vector<8x8xi1>, vector<8x8xf32>
    %c26_i32 = arith.constant 26 : i32
    %715 = vector.broadcast %c26_i32 : i32 to vector<8x8xi32>
    %716 = arith.cmpi eq, %30, %715 : vector<8x8xi32>
    %c26 = arith.constant 26 : index
    %c0_407 = arith.constant 0 : index
    %717 = memref.load %arg1[%c26, %c0_407] : memref<32x8xf32, #tpu.memory_space<smem>>
    %718 = vector.broadcast %717 : f32 to vector<8x8xf32>
    %719 = arith.select %716, %718, %693 : vector<8x8xi1>, vector<8x8xf32>
    %c26_408 = arith.constant 26 : index
    %c1_409 = arith.constant 1 : index
    %720 = memref.load %arg1[%c26_408, %c1_409] : memref<32x8xf32, #tpu.memory_space<smem>>
    %721 = vector.broadcast %720 : f32 to vector<8x8xf32>
    %722 = arith.select %716, %721, %696 : vector<8x8xi1>, vector<8x8xf32>
    %c26_410 = arith.constant 26 : index
    %c2_411 = arith.constant 2 : index
    %723 = memref.load %arg1[%c26_410, %c2_411] : memref<32x8xf32, #tpu.memory_space<smem>>
    %724 = vector.broadcast %723 : f32 to vector<8x8xf32>
    %725 = arith.select %716, %724, %699 : vector<8x8xi1>, vector<8x8xf32>
    %c26_412 = arith.constant 26 : index
    %c3_413 = arith.constant 3 : index
    %726 = memref.load %arg1[%c26_412, %c3_413] : memref<32x8xf32, #tpu.memory_space<smem>>
    %727 = vector.broadcast %726 : f32 to vector<8x8xf32>
    %728 = arith.select %716, %727, %702 : vector<8x8xi1>, vector<8x8xf32>
    %c26_414 = arith.constant 26 : index
    %c4_415 = arith.constant 4 : index
    %729 = memref.load %arg1[%c26_414, %c4_415] : memref<32x8xf32, #tpu.memory_space<smem>>
    %730 = vector.broadcast %729 : f32 to vector<8x8xf32>
    %731 = arith.select %716, %730, %705 : vector<8x8xi1>, vector<8x8xf32>
    %c26_416 = arith.constant 26 : index
    %c5_417 = arith.constant 5 : index
    %732 = memref.load %arg1[%c26_416, %c5_417] : memref<32x8xf32, #tpu.memory_space<smem>>
    %733 = vector.broadcast %732 : f32 to vector<8x8xf32>
    %734 = arith.select %716, %733, %708 : vector<8x8xi1>, vector<8x8xf32>
    %c26_418 = arith.constant 26 : index
    %c6_419 = arith.constant 6 : index
    %735 = memref.load %arg1[%c26_418, %c6_419] : memref<32x8xf32, #tpu.memory_space<smem>>
    %736 = vector.broadcast %735 : f32 to vector<8x8xf32>
    %737 = arith.select %716, %736, %711 : vector<8x8xi1>, vector<8x8xf32>
    %c26_420 = arith.constant 26 : index
    %c7_421 = arith.constant 7 : index
    %738 = memref.load %arg1[%c26_420, %c7_421] : memref<32x8xf32, #tpu.memory_space<smem>>
    %739 = vector.broadcast %738 : f32 to vector<8x8xf32>
    %740 = arith.select %716, %739, %714 : vector<8x8xi1>, vector<8x8xf32>
    %c27_i32 = arith.constant 27 : i32
    %741 = vector.broadcast %c27_i32 : i32 to vector<8x8xi32>
    %742 = arith.cmpi eq, %30, %741 : vector<8x8xi32>
    %c27 = arith.constant 27 : index
    %c0_422 = arith.constant 0 : index
    %743 = memref.load %arg1[%c27, %c0_422] : memref<32x8xf32, #tpu.memory_space<smem>>
    %744 = vector.broadcast %743 : f32 to vector<8x8xf32>
    %745 = arith.select %742, %744, %719 : vector<8x8xi1>, vector<8x8xf32>
    %c27_423 = arith.constant 27 : index
    %c1_424 = arith.constant 1 : index
    %746 = memref.load %arg1[%c27_423, %c1_424] : memref<32x8xf32, #tpu.memory_space<smem>>
    %747 = vector.broadcast %746 : f32 to vector<8x8xf32>
    %748 = arith.select %742, %747, %722 : vector<8x8xi1>, vector<8x8xf32>
    %c27_425 = arith.constant 27 : index
    %c2_426 = arith.constant 2 : index
    %749 = memref.load %arg1[%c27_425, %c2_426] : memref<32x8xf32, #tpu.memory_space<smem>>
    %750 = vector.broadcast %749 : f32 to vector<8x8xf32>
    %751 = arith.select %742, %750, %725 : vector<8x8xi1>, vector<8x8xf32>
    %c27_427 = arith.constant 27 : index
    %c3_428 = arith.constant 3 : index
    %752 = memref.load %arg1[%c27_427, %c3_428] : memref<32x8xf32, #tpu.memory_space<smem>>
    %753 = vector.broadcast %752 : f32 to vector<8x8xf32>
    %754 = arith.select %742, %753, %728 : vector<8x8xi1>, vector<8x8xf32>
    %c27_429 = arith.constant 27 : index
    %c4_430 = arith.constant 4 : index
    %755 = memref.load %arg1[%c27_429, %c4_430] : memref<32x8xf32, #tpu.memory_space<smem>>
    %756 = vector.broadcast %755 : f32 to vector<8x8xf32>
    %757 = arith.select %742, %756, %731 : vector<8x8xi1>, vector<8x8xf32>
    %c27_431 = arith.constant 27 : index
    %c5_432 = arith.constant 5 : index
    %758 = memref.load %arg1[%c27_431, %c5_432] : memref<32x8xf32, #tpu.memory_space<smem>>
    %759 = vector.broadcast %758 : f32 to vector<8x8xf32>
    %760 = arith.select %742, %759, %734 : vector<8x8xi1>, vector<8x8xf32>
    %c27_433 = arith.constant 27 : index
    %c6_434 = arith.constant 6 : index
    %761 = memref.load %arg1[%c27_433, %c6_434] : memref<32x8xf32, #tpu.memory_space<smem>>
    %762 = vector.broadcast %761 : f32 to vector<8x8xf32>
    %763 = arith.select %742, %762, %737 : vector<8x8xi1>, vector<8x8xf32>
    %c27_435 = arith.constant 27 : index
    %c7_436 = arith.constant 7 : index
    %764 = memref.load %arg1[%c27_435, %c7_436] : memref<32x8xf32, #tpu.memory_space<smem>>
    %765 = vector.broadcast %764 : f32 to vector<8x8xf32>
    %766 = arith.select %742, %765, %740 : vector<8x8xi1>, vector<8x8xf32>
    %c28_i32 = arith.constant 28 : i32
    %767 = vector.broadcast %c28_i32 : i32 to vector<8x8xi32>
    %768 = arith.cmpi eq, %30, %767 : vector<8x8xi32>
    %c28 = arith.constant 28 : index
    %c0_437 = arith.constant 0 : index
    %769 = memref.load %arg1[%c28, %c0_437] : memref<32x8xf32, #tpu.memory_space<smem>>
    %770 = vector.broadcast %769 : f32 to vector<8x8xf32>
    %771 = arith.select %768, %770, %745 : vector<8x8xi1>, vector<8x8xf32>
    %c28_438 = arith.constant 28 : index
    %c1_439 = arith.constant 1 : index
    %772 = memref.load %arg1[%c28_438, %c1_439] : memref<32x8xf32, #tpu.memory_space<smem>>
    %773 = vector.broadcast %772 : f32 to vector<8x8xf32>
    %774 = arith.select %768, %773, %748 : vector<8x8xi1>, vector<8x8xf32>
    %c28_440 = arith.constant 28 : index
    %c2_441 = arith.constant 2 : index
    %775 = memref.load %arg1[%c28_440, %c2_441] : memref<32x8xf32, #tpu.memory_space<smem>>
    %776 = vector.broadcast %775 : f32 to vector<8x8xf32>
    %777 = arith.select %768, %776, %751 : vector<8x8xi1>, vector<8x8xf32>
    %c28_442 = arith.constant 28 : index
    %c3_443 = arith.constant 3 : index
    %778 = memref.load %arg1[%c28_442, %c3_443] : memref<32x8xf32, #tpu.memory_space<smem>>
    %779 = vector.broadcast %778 : f32 to vector<8x8xf32>
    %780 = arith.select %768, %779, %754 : vector<8x8xi1>, vector<8x8xf32>
    %c28_444 = arith.constant 28 : index
    %c4_445 = arith.constant 4 : index
    %781 = memref.load %arg1[%c28_444, %c4_445] : memref<32x8xf32, #tpu.memory_space<smem>>
    %782 = vector.broadcast %781 : f32 to vector<8x8xf32>
    %783 = arith.select %768, %782, %757 : vector<8x8xi1>, vector<8x8xf32>
    %c28_446 = arith.constant 28 : index
    %c5_447 = arith.constant 5 : index
    %784 = memref.load %arg1[%c28_446, %c5_447] : memref<32x8xf32, #tpu.memory_space<smem>>
    %785 = vector.broadcast %784 : f32 to vector<8x8xf32>
    %786 = arith.select %768, %785, %760 : vector<8x8xi1>, vector<8x8xf32>
    %c28_448 = arith.constant 28 : index
    %c6_449 = arith.constant 6 : index
    %787 = memref.load %arg1[%c28_448, %c6_449] : memref<32x8xf32, #tpu.memory_space<smem>>
    %788 = vector.broadcast %787 : f32 to vector<8x8xf32>
    %789 = arith.select %768, %788, %763 : vector<8x8xi1>, vector<8x8xf32>
    %c28_450 = arith.constant 28 : index
    %c7_451 = arith.constant 7 : index
    %790 = memref.load %arg1[%c28_450, %c7_451] : memref<32x8xf32, #tpu.memory_space<smem>>
    %791 = vector.broadcast %790 : f32 to vector<8x8xf32>
    %792 = arith.select %768, %791, %766 : vector<8x8xi1>, vector<8x8xf32>
    %c29_i32 = arith.constant 29 : i32
    %793 = vector.broadcast %c29_i32 : i32 to vector<8x8xi32>
    %794 = arith.cmpi eq, %30, %793 : vector<8x8xi32>
    %c29 = arith.constant 29 : index
    %c0_452 = arith.constant 0 : index
    %795 = memref.load %arg1[%c29, %c0_452] : memref<32x8xf32, #tpu.memory_space<smem>>
    %796 = vector.broadcast %795 : f32 to vector<8x8xf32>
    %797 = arith.select %794, %796, %771 : vector<8x8xi1>, vector<8x8xf32>
    %c29_453 = arith.constant 29 : index
    %c1_454 = arith.constant 1 : index
    %798 = memref.load %arg1[%c29_453, %c1_454] : memref<32x8xf32, #tpu.memory_space<smem>>
    %799 = vector.broadcast %798 : f32 to vector<8x8xf32>
    %800 = arith.select %794, %799, %774 : vector<8x8xi1>, vector<8x8xf32>
    %c29_455 = arith.constant 29 : index
    %c2_456 = arith.constant 2 : index
    %801 = memref.load %arg1[%c29_455, %c2_456] : memref<32x8xf32, #tpu.memory_space<smem>>
    %802 = vector.broadcast %801 : f32 to vector<8x8xf32>
    %803 = arith.select %794, %802, %777 : vector<8x8xi1>, vector<8x8xf32>
    %c29_457 = arith.constant 29 : index
    %c3_458 = arith.constant 3 : index
    %804 = memref.load %arg1[%c29_457, %c3_458] : memref<32x8xf32, #tpu.memory_space<smem>>
    %805 = vector.broadcast %804 : f32 to vector<8x8xf32>
    %806 = arith.select %794, %805, %780 : vector<8x8xi1>, vector<8x8xf32>
    %c29_459 = arith.constant 29 : index
    %c4_460 = arith.constant 4 : index
    %807 = memref.load %arg1[%c29_459, %c4_460] : memref<32x8xf32, #tpu.memory_space<smem>>
    %808 = vector.broadcast %807 : f32 to vector<8x8xf32>
    %809 = arith.select %794, %808, %783 : vector<8x8xi1>, vector<8x8xf32>
    %c29_461 = arith.constant 29 : index
    %c5_462 = arith.constant 5 : index
    %810 = memref.load %arg1[%c29_461, %c5_462] : memref<32x8xf32, #tpu.memory_space<smem>>
    %811 = vector.broadcast %810 : f32 to vector<8x8xf32>
    %812 = arith.select %794, %811, %786 : vector<8x8xi1>, vector<8x8xf32>
    %c29_463 = arith.constant 29 : index
    %c6_464 = arith.constant 6 : index
    %813 = memref.load %arg1[%c29_463, %c6_464] : memref<32x8xf32, #tpu.memory_space<smem>>
    %814 = vector.broadcast %813 : f32 to vector<8x8xf32>
    %815 = arith.select %794, %814, %789 : vector<8x8xi1>, vector<8x8xf32>
    %c29_465 = arith.constant 29 : index
    %c7_466 = arith.constant 7 : index
    %816 = memref.load %arg1[%c29_465, %c7_466] : memref<32x8xf32, #tpu.memory_space<smem>>
    %817 = vector.broadcast %816 : f32 to vector<8x8xf32>
    %818 = arith.select %794, %817, %792 : vector<8x8xi1>, vector<8x8xf32>
    %c30_i32 = arith.constant 30 : i32
    %819 = vector.broadcast %c30_i32 : i32 to vector<8x8xi32>
    %820 = arith.cmpi eq, %30, %819 : vector<8x8xi32>
    %c30 = arith.constant 30 : index
    %c0_467 = arith.constant 0 : index
    %821 = memref.load %arg1[%c30, %c0_467] : memref<32x8xf32, #tpu.memory_space<smem>>
    %822 = vector.broadcast %821 : f32 to vector<8x8xf32>
    %823 = arith.select %820, %822, %797 : vector<8x8xi1>, vector<8x8xf32>
    %c30_468 = arith.constant 30 : index
    %c1_469 = arith.constant 1 : index
    %824 = memref.load %arg1[%c30_468, %c1_469] : memref<32x8xf32, #tpu.memory_space<smem>>
    %825 = vector.broadcast %824 : f32 to vector<8x8xf32>
    %826 = arith.select %820, %825, %800 : vector<8x8xi1>, vector<8x8xf32>
    %c30_470 = arith.constant 30 : index
    %c2_471 = arith.constant 2 : index
    %827 = memref.load %arg1[%c30_470, %c2_471] : memref<32x8xf32, #tpu.memory_space<smem>>
    %828 = vector.broadcast %827 : f32 to vector<8x8xf32>
    %829 = arith.select %820, %828, %803 : vector<8x8xi1>, vector<8x8xf32>
    %c30_472 = arith.constant 30 : index
    %c3_473 = arith.constant 3 : index
    %830 = memref.load %arg1[%c30_472, %c3_473] : memref<32x8xf32, #tpu.memory_space<smem>>
    %831 = vector.broadcast %830 : f32 to vector<8x8xf32>
    %832 = arith.select %820, %831, %806 : vector<8x8xi1>, vector<8x8xf32>
    %c30_474 = arith.constant 30 : index
    %c4_475 = arith.constant 4 : index
    %833 = memref.load %arg1[%c30_474, %c4_475] : memref<32x8xf32, #tpu.memory_space<smem>>
    %834 = vector.broadcast %833 : f32 to vector<8x8xf32>
    %835 = arith.select %820, %834, %809 : vector<8x8xi1>, vector<8x8xf32>
    %c30_476 = arith.constant 30 : index
    %c5_477 = arith.constant 5 : index
    %836 = memref.load %arg1[%c30_476, %c5_477] : memref<32x8xf32, #tpu.memory_space<smem>>
    %837 = vector.broadcast %836 : f32 to vector<8x8xf32>
    %838 = arith.select %820, %837, %812 : vector<8x8xi1>, vector<8x8xf32>
    %c30_478 = arith.constant 30 : index
    %c6_479 = arith.constant 6 : index
    %839 = memref.load %arg1[%c30_478, %c6_479] : memref<32x8xf32, #tpu.memory_space<smem>>
    %840 = vector.broadcast %839 : f32 to vector<8x8xf32>
    %841 = arith.select %820, %840, %815 : vector<8x8xi1>, vector<8x8xf32>
    %c30_480 = arith.constant 30 : index
    %c7_481 = arith.constant 7 : index
    %842 = memref.load %arg1[%c30_480, %c7_481] : memref<32x8xf32, #tpu.memory_space<smem>>
    %843 = vector.broadcast %842 : f32 to vector<8x8xf32>
    %844 = arith.select %820, %843, %818 : vector<8x8xi1>, vector<8x8xf32>
    %c31_i32 = arith.constant 31 : i32
    %845 = vector.broadcast %c31_i32 : i32 to vector<8x8xi32>
    %846 = arith.cmpi eq, %30, %845 : vector<8x8xi32>
    %c31 = arith.constant 31 : index
    %c0_482 = arith.constant 0 : index
    %847 = memref.load %arg1[%c31, %c0_482] : memref<32x8xf32, #tpu.memory_space<smem>>
    %848 = vector.broadcast %847 : f32 to vector<8x8xf32>
    %849 = arith.select %846, %848, %823 : vector<8x8xi1>, vector<8x8xf32>
    %c31_483 = arith.constant 31 : index
    %c1_484 = arith.constant 1 : index
    %850 = memref.load %arg1[%c31_483, %c1_484] : memref<32x8xf32, #tpu.memory_space<smem>>
    %851 = vector.broadcast %850 : f32 to vector<8x8xf32>
    %852 = arith.select %846, %851, %826 : vector<8x8xi1>, vector<8x8xf32>
    %c31_485 = arith.constant 31 : index
    %c2_486 = arith.constant 2 : index
    %853 = memref.load %arg1[%c31_485, %c2_486] : memref<32x8xf32, #tpu.memory_space<smem>>
    %854 = vector.broadcast %853 : f32 to vector<8x8xf32>
    %855 = arith.select %846, %854, %829 : vector<8x8xi1>, vector<8x8xf32>
    %c31_487 = arith.constant 31 : index
    %c3_488 = arith.constant 3 : index
    %856 = memref.load %arg1[%c31_487, %c3_488] : memref<32x8xf32, #tpu.memory_space<smem>>
    %857 = vector.broadcast %856 : f32 to vector<8x8xf32>
    %858 = arith.select %846, %857, %832 : vector<8x8xi1>, vector<8x8xf32>
    %c31_489 = arith.constant 31 : index
    %c4_490 = arith.constant 4 : index
    %859 = memref.load %arg1[%c31_489, %c4_490] : memref<32x8xf32, #tpu.memory_space<smem>>
    %860 = vector.broadcast %859 : f32 to vector<8x8xf32>
    %861 = arith.select %846, %860, %835 : vector<8x8xi1>, vector<8x8xf32>
    %c31_491 = arith.constant 31 : index
    %c5_492 = arith.constant 5 : index
    %862 = memref.load %arg1[%c31_491, %c5_492] : memref<32x8xf32, #tpu.memory_space<smem>>
    %863 = vector.broadcast %862 : f32 to vector<8x8xf32>
    %864 = arith.select %846, %863, %838 : vector<8x8xi1>, vector<8x8xf32>
    %c31_493 = arith.constant 31 : index
    %c6_494 = arith.constant 6 : index
    %865 = memref.load %arg1[%c31_493, %c6_494] : memref<32x8xf32, #tpu.memory_space<smem>>
    %866 = vector.broadcast %865 : f32 to vector<8x8xf32>
    %867 = arith.select %846, %866, %841 : vector<8x8xi1>, vector<8x8xf32>
    %c31_495 = arith.constant 31 : index
    %c7_496 = arith.constant 7 : index
    %868 = memref.load %arg1[%c31_495, %c7_496] : memref<32x8xf32, #tpu.memory_space<smem>>
    %869 = vector.broadcast %868 : f32 to vector<8x8xf32>
    %870 = arith.select %846, %869, %844 : vector<8x8xi1>, vector<8x8xf32>
    %c0_497 = arith.constant 0 : index
    %c0_498 = arith.constant 0 : index
    %c0_499 = arith.constant 0 : index
    %871 = vector.load %arg2[%c0_497, %c0_498, %c0_499] : memref<8x8x8xf32, #tpu.memory_space<vmem>>, vector<1x8x8xf32>
    %872 = vector.shape_cast %871 : vector<1x8x8xf32> to vector<8x8xf32>
    %873 = vector.shape_cast %849 : vector<8x8xf32> to vector<1x8x8xf32>
    tpu.vector_store %arg2[%c0_497, %c0_498, %c0_499], %873 {strides = array<i32>} : memref<8x8x8xf32, #tpu.memory_space<vmem>>, vector<1x8x8xf32>,
    %c1_500 = arith.constant 1 : index
    %c0_501 = arith.constant 0 : index
    %c0_502 = arith.constant 0 : index
    %874 = vector.load %arg2[%c1_500, %c0_501, %c0_502] : memref<8x8x8xf32, #tpu.memory_space<vmem>>, vector<1x8x8xf32>
    %875 = vector.shape_cast %874 : vector<1x8x8xf32> to vector<8x8xf32>
    %876 = vector.shape_cast %852 : vector<8x8xf32> to vector<1x8x8xf32>
    tpu.vector_store %arg2[%c1_500, %c0_501, %c0_502], %876 {strides = array<i32>} : memref<8x8x8xf32, #tpu.memory_space<vmem>>, vector<1x8x8xf32>,
    %c2_503 = arith.constant 2 : index
    %c0_504 = arith.constant 0 : index
    %c0_505 = arith.constant 0 : index
    %877 = vector.load %arg2[%c2_503, %c0_504, %c0_505] : memref<8x8x8xf32, #tpu.memory_space<vmem>>, vector<1x8x8xf32>
    %878 = vector.shape_cast %877 : vector<1x8x8xf32> to vector<8x8xf32>
    %879 = vector.shape_cast %855 : vector<8x8xf32> to vector<1x8x8xf32>
    tpu.vector_store %arg2[%c2_503, %c0_504, %c0_505], %879 {strides = array<i32>} : memref<8x8x8xf32, #tpu.memory_space<vmem>>, vector<1x8x8xf32>,
    %c3_506 = arith.constant 3 : index
    %c0_507 = arith.constant 0 : index
    %c0_508 = arith.constant 0 : index
    %880 = vector.load %arg2[%c3_506, %c0_507, %c0_508] : memref<8x8x8xf32, #tpu.memory_space<vmem>>, vector<1x8x8xf32>
    %881 = vector.shape_cast %880 : vector<1x8x8xf32> to vector<8x8xf32>
    %882 = vector.shape_cast %858 : vector<8x8xf32> to vector<1x8x8xf32>
    tpu.vector_store %arg2[%c3_506, %c0_507, %c0_508], %882 {strides = array<i32>} : memref<8x8x8xf32, #tpu.memory_space<vmem>>, vector<1x8x8xf32>,
    %c4_509 = arith.constant 4 : index
    %c0_510 = arith.constant 0 : index
    %c0_511 = arith.constant 0 : index
    %883 = vector.load %arg2[%c4_509, %c0_510, %c0_511] : memref<8x8x8xf32, #tpu.memory_space<vmem>>, vector<1x8x8xf32>
    %884 = vector.shape_cast %883 : vector<1x8x8xf32> to vector<8x8xf32>
    %885 = vector.shape_cast %861 : vector<8x8xf32> to vector<1x8x8xf32>
    tpu.vector_store %arg2[%c4_509, %c0_510, %c0_511], %885 {strides = array<i32>} : memref<8x8x8xf32, #tpu.memory_space<vmem>>, vector<1x8x8xf32>,
    %c5_512 = arith.constant 5 : index
    %c0_513 = arith.constant 0 : index
    %c0_514 = arith.constant 0 : index
    %886 = vector.load %arg2[%c5_512, %c0_513, %c0_514] : memref<8x8x8xf32, #tpu.memory_space<vmem>>, vector<1x8x8xf32>
    %887 = vector.shape_cast %886 : vector<1x8x8xf32> to vector<8x8xf32>
    %888 = vector.shape_cast %864 : vector<8x8xf32> to vector<1x8x8xf32>
    tpu.vector_store %arg2[%c5_512, %c0_513, %c0_514], %888 {strides = array<i32>} : memref<8x8x8xf32, #tpu.memory_space<vmem>>, vector<1x8x8xf32>,
    %c6_515 = arith.constant 6 : index
    %c0_516 = arith.constant 0 : index
    %c0_517 = arith.constant 0 : index
    %889 = vector.load %arg2[%c6_515, %c0_516, %c0_517] : memref<8x8x8xf32, #tpu.memory_space<vmem>>, vector<1x8x8xf32>
    %890 = vector.shape_cast %889 : vector<1x8x8xf32> to vector<8x8xf32>
    %891 = vector.shape_cast %867 : vector<8x8xf32> to vector<1x8x8xf32>
    tpu.vector_store %arg2[%c6_515, %c0_516, %c0_517], %891 {strides = array<i32>} : memref<8x8x8xf32, #tpu.memory_space<vmem>>, vector<1x8x8xf32>,
    %c7_518 = arith.constant 7 : index
    %c0_519 = arith.constant 0 : index
    %c0_520 = arith.constant 0 : index
    %892 = vector.load %arg2[%c7_518, %c0_519, %c0_520] : memref<8x8x8xf32, #tpu.memory_space<vmem>>, vector<1x8x8xf32>
    %893 = vector.shape_cast %892 : vector<1x8x8xf32> to vector<8x8xf32>
    %894 = vector.shape_cast %870 : vector<8x8xf32> to vector<1x8x8xf32>
    tpu.vector_store %arg2[%c7_518, %c0_519, %c0_520], %894 {strides = array<i32>} : memref<8x8x8xf32, #tpu.memory_space<vmem>>, vector<1x8x8xf32>,
    return
  }
  func.func @transform_0(%arg0: i32) -> (i32, i32) {
    %c0_i32 = arith.constant 0 : i32
    %c0_i32_0 = arith.constant 0 : i32
    %c0_i32_1 = arith.constant 0 : i32
    return %c0_i32, %c0_i32_0 : i32, i32
  }
  func.func @transform_1(%arg0: i32) -> (i32, i32, i32) {
    %c0_i32 = arith.constant 0 : i32
    %c0_i32_0 = arith.constant 0 : i32
    %c0_i32_1 = arith.constant 0 : i32
    return %c0_i32, %arg0, %c0_i32_0 : i32, i32, i32
  }
}

</mosaic_0001>

<bundles_post_ra>
// kernel: tpu_custom_call.1
= control target key start
LH: loop header
LB: loop body
LE: loop exit
PB: predicated region body
PF: predicated region fallthrough
CT: control target
= control target key end

     0   :  { %s2669_s0 = inlined_call_operand.hbm [shape: f32[32,8], index: 0, kind: input, shape index: {}]   ;;  %s2670_s1 = inlined_call_operand.hbm [shape: f32[8,8,8], index: 1, kind: output, shape index: {}]  }
   0x1   :  { %2744 = sst [smem:[#allocation75_spill]] %s2670_s1 }
   0x2   :  { %6 = vsyncpa [#allocation4], 0 }
   0x3   :  { %7 = vsyncpa [#allocation3], 0  ;;  %s1150_s8 = scalar_lea.hbm %s2669_s0, 512 }
   0x4   :  { %p1151_p0 = scmp.ne.s32.totalorder %s2669_s0, %s1150_s8  ;;  %p1154_p1 = scmp.lt.u32.totalorder %s1150_s8, %s2669_s0 }
   0x6   :  { %p1156_p2 = pnand %p1154_p1, %p1151_p0 }
   0x8   :  { %1159 = shalt.err (!%p1156_p2)
}
   0x9   :  { %s1186_s13 = smov [#allocation2]   ;;  %s2671_s14 = smov 128  }
   0xa   :  { %s2672_s15 = smov 8  }
   0xb   :  { %17 = dma.hbm_to_smem %s2669_s0, 512, %s1186_s13, [#allocation4], %s2671_s14, %s2671_s14, %s2672_s15  }
   0xc   :  { %1182 = dma.done.wait [#allocation4], 512  }
   0xd   :  { %1183 = vsyncadd [#allocation4], 4294966784 }
   0xe   :  { %21 = sfence }
   0xf   :  { %v23_v0 = vlaneseq  ;;  %s1216_s18 = sld [smem:[#allocation2]]  ;;  %s1218_s19 = sld [smem:[#allocation2 + $0x1]]  ;;  %v1189_v9 = vmov 0  }
  0x10   :  { %s1220_s20 = sld [smem:[#allocation2 + $0x2]]  ;;  %s1222_s21 = sld [smem:[#allocation2 + $0x3]] }
  0x11   :  { %v24_v1 = vshrl.u32 %v23_v0, 7  ;;  %v28_v2 = vand.u32 127, %v23_v0  ;;  %s1224_s22 = sld [smem:[#allocation2 + $0x4]]  ;;  %s1226_s23 = sld [smem:[#allocation2 + $0x5]] }
  0x12   :  { %s1228_s24 = sld [smem:[#allocation2 + $0x6]]  ;;  %s1230_s0 = sld [smem:[#allocation2 + $0x7]] }
  0x13   :  { %v29_v3 = vsub.s32 %v28_v2, %v24_v1  ;;  %s1232_s25 = sld [smem:[#allocation2 + $0x80]]  ;;  %s1234_s26 = sld [smem:[#allocation2 + $0x81]] }
  0x14   :  { %s1236_s27 = sld [smem:[#allocation2 + $0x82]]  ;;  %s1238_s28 = sld [smem:[#allocation2 + $0x83]] }
  0x15   :  { %2745 = sst [smem:[#allocation8_spill]] %s1216_s18  ;;  %v34_v4 = vsub.s32 0, %v29_v3  ;;  %s1240_s29 = sld [smem:[#allocation2 + $0x84]]  ;;  %vm30_vm0 = vcmp.gt.s32.totalorder %v29_v3, 0  ;;  %v54_v11 = vstv %s1216_s18  ;;  %v57_v12 = vstv %s1218_s19 }
  0x16   :  { %2746 = sst [smem:[#allocation9_spill]] %s1218_s19  ;;  %s1242_s30 = sld [smem:[#allocation2 + $0x85]]  ;;  %v1299_v10 = vsel %vm30_vm0, 1, %v1189_v9  ;;  %v60_v13 = vstv %s1220_s20  ;;  %v63_v15 = vstv %s1222_s21 }
  0x17   :  { %2747 = sst [smem:[#allocation10_spill]] %s1220_s20  ;;  %s1244_s2 = sld [smem:[#allocation2 + $0x86]]  ;;  %v1248_v5 = vmin.u32 %v34_v4, %v29_v3  ;;  %v32_v14 = vmul.u32 16, %v1299_v10  ;;  %v66_v16 = vstv %s1224_s22  ;;  %v69_v17 = vstv %s1226_s23 }
  0x18   :  { %2748 = sst [smem:[#allocation11_spill]] %s1222_s21  ;;  %s1246_s3 = sld [smem:[#allocation2 + $0x87]]  ;;  %v72_v18 = vstv %s1228_s24  ;;  %v75_v19 = vstv %s1230_s0 }
  0x19   :  { %2749 = sst [smem:[#allocation12_spill]] %s1224_s22  ;;  %s1250_s4 = sld [smem:[#allocation2 + $0x100]]  ;;  %v37_v6 = vcvt.s32.f32 %v1248_v5  ;;  %v79_v20 = vstv %s1232_s25  ;;  %v82_v21 = vstv %s1234_s26  ;;  %vm36_vm1 = vcmp.lt.s32.totalorder %v1248_v5, 8 }
  0x1a   :  { %2750 = sst [smem:[#allocation13_spill]] %s1226_s23  ;;  %s1252_s5 = sld [smem:[#allocation2 + $0x101]]  ;;  %v85_v22 = vstv %s1236_s27  ;;  %v88_v23 = vstv %s1238_s28 }
  0x1b   :  { %2751 = sst [smem:[#allocation14_spill]] %s1228_s24  ;;  %s1254_s6 = sld [smem:[#allocation2 + $0x102]]  ;;  %v38_v7 = vmax.f32 %v37_v6, 1.0  ;;  %v91_v24 = vstv %s1240_s29 }
  0x1c   :  { %2752 = sst [smem:[#allocation15_spill]] %s1230_s0  ;;  %s1256_s7 = sld [smem:[#allocation2 + $0x103]]  ;;  %v94_v25 = vstv %s1242_s30 }
  0x1d   :  { %2753 = sst [smem:[#allocation16_spill]] %s1232_s25  ;;  %s1259_s8 = sld [smem:[#allocation2 + $0x104]]  ;;  %v40_v8 = vmul.f32 0.125, %v38_v7  ;;  %v97_v27 = vstv %s1244_s2 }
  0x1e   :  { %2754 = sst [smem:[#allocation17_spill]] %s1234_s26  ;;  %s1261_s9 = sld [smem:[#allocation2 + $0x105]]  ;;  %v100_v28 = vstv %s1246_s3 }
  0x1f   :  { %2755 = sst [smem:[#allocation18_spill]] %s1236_s27  ;;  %s1263_s10 = sld [smem:[#allocation2 + $0x106]]  ;;  %1148 = vlog2.f32 %v40_v8  ;;  %v104_v29 = vstv %s1250_s4 }
  0x20   :  { %2756 = sst [smem:[#allocation19_spill]] %s1238_s28  ;;  %s1265_s11 = sld [smem:[#allocation2 + $0x107]]  ;;  %v107_v30 = vstv %s1252_s5 }
  0x21   :  { %2757 = sst [smem:[#allocation20_spill]] %s1240_s29  ;;  %s1267_s12 = sld [smem:[#allocation2 + $0x180]]  ;;  %v110_v32 = vstv %s1254_s6 }
  0x22   :  { %2758 = sst [smem:[#allocation21_spill]] %s1242_s30  ;;  %s1269_s13 = sld [smem:[#allocation2 + $0x181]]  ;;  %v113_v33 = vstv %s1256_s7 }
  0x23   :  { %2759 = sst [smem:[#allocation22_spill]] %s1244_s2  ;;  %s1271_s16 = sld [smem:[#allocation2 + $0x182]]  ;;  %v116_v34 = vstv %s1259_s8 }
  0x24   :  { %2760 = sst [smem:[#allocation23_spill]] %s1246_s3  ;;  %s1273_s17 = sld [smem:[#allocation2 + $0x183]] }
  0x25   :  { %2761 = sst [smem:[#allocation24_spill]] %s1250_s4  ;;  %s1275_s14 = sld [smem:[#allocation2 + $0x184]]  ;;  %v122_v36 = vstv %s1263_s10 }
  0x26   :  { %2762 = sst [smem:[#allocation25_spill]] %s1252_s5  ;;  %s1277_s15 = sld [smem:[#allocation2 + $0x185]] }
  0x27   :  { %2763 = sst [smem:[#allocation26_spill]] %s1254_s6  ;;  %s1279_s1 = sld [smem:[#allocation2 + $0x186]] }
  0x28   :  { %2764 = sst [smem:[#allocation27_spill]] %s1256_s7  ;;  %s1322_s18 = sld [smem:[#allocation2 + $0x287]]  ;;  %v132_v40 = vstv %s1269_s13 }
  0x29   :  { %2765 = sst [smem:[#allocation28_spill]] %s1259_s8  ;;  %s1328_s20 = sld [smem:[#allocation2 + $0x300]]  ;;  %v1149_v26 = vpop.eup %1148 }
  0x2a   :  { %2766 = sst [smem:[#allocation29_spill]] %s1261_s9  ;;  %s1281_s9 = sld [smem:[#allocation2 + $0x187]]  ;;  %v42_v31 = vmul.f32 0.6931472, %v1149_v26 }
  0x2b   :  { %2767 = sst [smem:[#allocation30_spill]] %s1263_s10  ;;  %s1330_s19 = sld [smem:[#allocation2 + $0x301]] }
  0x2c   :  { %2768 = sst [smem:[#allocation31_spill]] %s1265_s11  ;;  %s1283_s11 = sld [smem:[#allocation2 + $0x200]]  ;;  %v44_v39 = vmul.f32 0.36067376, %v42_v31 }
  0x2d   :  { %2769 = sst [smem:[#allocation32_spill]] %s1267_s12  ;;  %s1285_s12 = sld [smem:[#allocation2 + $0x201]] }
  0x2e   :  { %2770 = sst [smem:[#allocation33_spill]] %s1269_s13  ;;  %s2791_s23 = sld [smem:[#allocation29_spill]]  ;;  %v45_v47 = vmul.f32 8.0, %v44_v39  ;;  %v200_v1 = vstv %s1322_s18 }
  0x2f   :  { %2771 = sst [smem:[#allocation34_spill]] %s1271_s16  ;;  %s1338_s24 = sld [smem:[#allocation2 + $0x303]]  ;;  %v204_v2 = vstv %s1328_s20 }
  0x30   :  { %2772 = sst [smem:[#allocation35_spill]] %s1273_s17  ;;  %s1287_s16 = sld [smem:[#allocation2 + $0x202]]  ;;  %v1141_v55 = vtrunc.f32 %v45_v47 }
  0x31   :  { %2773 = sst [smem:[#allocation36_spill]] %s1275_s14  ;;  %s1289_s17 = sld [smem:[#allocation2 + $0x203]] }
  0x32   :  { %2774 = sst [smem:[#allocation37_spill]] %s1277_s15  ;;  %s1291_s14 = sld [smem:[#allocation2 + $0x204]]  ;;  %v154_v48 = vstv %s1283_s11  ;;  %v1142_v63 = vcvt.f32.s32 %v1141_v55 }
  0x33   :  { %2775 = sst [smem:[#allocation38_spill]] %s1279_s1  ;;  %s1293_s15 = sld [smem:[#allocation2 + $0x205]] }
  0x34   :  { %2776 = sst [smem:[#allocation39_spill]] %s1281_s9  ;;  %s1295_s9 = sld [smem:[#allocation2 + $0x206]]  ;;  %v119_v35 = vstv %s2791_s23  ;;  %v47_v8 = vadd.s32 8, %v1142_v63 }
  0x35   :  { %2777 = sst [smem:[#allocation40_spill]] %s1283_s11  ;;  %s1297_s1 = sld [smem:[#allocation2 + $0x207]] }
  0x36   :  { %2778 = sst [smem:[#allocation41_spill]] %s1285_s12  ;;  %s1301_s12 = sld [smem:[#allocation2 + $0x280]]  ;;  %vm48_vm2 = vcmp.lt.s32.totalorder %v47_v8, 15 }
  0x37   :  { %2779 = sst [smem:[#allocation42_spill]] %s1287_s16  ;;  %s1303_s16 = sld [smem:[#allocation2 + $0x281]]  ;;  %v163_v51 = vstv %s1289_s17  ;;  %v49_v9 = vsel %vm48_vm2, %v47_v8, 15 }
  0x38   :  { %2780 = sst [smem:[#allocation43_spill]] %s1289_s17  ;;  %s1336_s22 = sld [smem:[#allocation2 + $0x302]]  ;;  %v50_v47 = vsel %vm36_vm1, %v1248_v5, %v49_v9 }
  0x39   :  { %2781 = sst [smem:[#allocation44_spill]] %s1291_s14  ;;  %s1305_s14 = sld [smem:[#allocation2 + $0x282]]  ;;  %v1449_v26 = vadd.s32 %v50_v47, %v32_v14 }
  0x3a   :  { %2782 = sst [smem:[#allocation45_spill]] %s1293_s15  ;;  %s1307_s15 = sld [smem:[#allocation2 + $0x283]] }
  0x3b   :  { %2783 = sst [smem:[#allocation46_spill]] %s1295_s9  ;;  %s1314_s9 = sld [smem:[#allocation2 + $0x285]]  ;;  %vm52_vm3 = vcmp.eq.s32.totalorder %v1449_v26, 0  ;;  %vm77_vm4 = vcmp.eq.s32.totalorder %v1449_v26, 1  ;;  %vm102_vm5 = vcmp.eq.s32.totalorder %v1449_v26, 2  ;;  %vm127_vm6 = vcmp.eq.s32.totalorder %v1449_v26, 3 }
  0x3c   :  { %2784 = sst [smem:[#allocation47_spill]] %s1297_s1  ;;  %s1312_s1 = sld [smem:[#allocation2 + $0x284]]  ;;  %v179_v57 = vstv %s1301_s12  ;;  %v55_v10 = vsel %vm52_vm3, %v54_v11, 0.0  ;;  %v58_v14 = vsel %vm52_vm3, %v57_v12, 0.0  ;;  %v61_v47 = vsel %vm52_vm3, %v60_v13, 0.0 }
  0x3d   :  { %2785 = sst [smem:[#allocation48_spill]] %s1301_s12  ;;  %s2794_s0 = sld [smem:[#allocation31_spill]]  ;;  %v182_v58 = vstv %s1303_s16  ;;  %v64_v7 = vsel %vm52_vm3, %v63_v15, 0.0  ;;  %v67_v9 = vsel %vm52_vm3, %v66_v16, 0.0  ;;  %v70_v5 = vsel %vm52_vm3, %v69_v17, 0.0 }
  0x3e   :  { %2786 = sst [smem:[#allocation49_spill]] %s1303_s16  ;;  %s2795_s26 = sld [smem:[#allocation32_spill]]  ;;  %v73_v6 = vsel %vm52_vm3, %v72_v18, 0.0  ;;  %v76_v11 = vsel %vm52_vm3, %v75_v19, 0.0  ;;  %v80_v12 = vsel %vm77_vm4, %v79_v20, %v55_v10  ;;  %v83_v13 = vsel %vm77_vm4, %v82_v21, %v58_v14 }
  0x3f   :  { %2787 = sst [smem:[#allocation50_spill]] %s1305_s14  ;;  %s1320_s14 = sld [smem:[#allocation2 + $0x286]]  ;;  %v86_v15 = vsel %vm77_vm4, %v85_v22, %v61_v47  ;;  %v89_v16 = vsel %vm77_vm4, %v88_v23, %v64_v7  ;;  %v92_v17 = vsel %vm77_vm4, %v91_v24, %v67_v9  ;;  %v95_v18 = vsel %vm77_vm4, %v94_v25, %v70_v5 }
  0x40   :  { %2790 = sst [smem:[#allocation53_spill]] %s1328_s20  ;;  %s1344_s25 = sld [smem:[#allocation2 + $0x304]]  ;;  %v188_v60 = vstv %s1307_s15  ;;  %v98_v19 = vsel %vm77_vm4, %v97_v27, %v73_v6  ;;  %v101_v20 = vsel %vm77_vm4, %v100_v28, %v76_v11  ;;  %v105_v21 = vsel %vm102_vm5, %v104_v29, %v80_v12 }
  0x41   :  { %2788 = sst [smem:[#allocation51_spill]] %s1314_s9  ;;  %s2796_s27 = sld [smem:[#allocation34_spill]]  ;;  %v194_v62 = vstv %s1314_s9  ;;  %v108_v22 = vsel %vm102_vm5, %v107_v30, %v83_v13  ;;  %v111_v23 = vsel %vm102_vm5, %v110_v32, %v86_v15  ;;  %v114_v24 = vsel %vm102_vm5, %v113_v33, %v89_v16 }
  0x42   :  { %2792 = sst [smem:[#allocation54_spill]] %s1336_s22  ;;  %s1346_s28 = sld [smem:[#allocation2 + $0x305]]  ;;  %v191_v61 = vstv %s1312_s1  ;;  %v117_v25 = vsel %vm102_vm5, %v116_v34, %v92_v17  ;;  %v120_v27 = vsel %vm102_vm5, %v119_v35, %v95_v18  ;;  %v123_v28 = vsel %vm102_vm5, %v122_v36, %v98_v19 }
  0x43   :  { %2793 = sst [smem:[#allocation55_spill]] %s1338_s24  ;;  %s2797_s30 = sld [smem:[#allocation35_spill]]  ;;  %v125_v37 = vstv %s2794_s0  ;;  %v133_v32 = vsel %vm127_vm6, %v132_v40, %v108_v22  ;;  %vm152_vm7 = vcmp.eq.s32.totalorder %v1449_v26, 4  ;;  %vm177_vm8 = vcmp.eq.s32.totalorder %v1449_v26, 5 }
  0x44   :  { %s2798_s29 = sld [smem:[#allocation36_spill]]  ;;  %s1351_s21 = sld [smem:[#allocation2 + $0x306]]  ;;  %v129_v38 = vstv %s2795_s26  ;;  %v126_v29 = vsel %vm102_vm5, %v125_v37, %v101_v20  ;;  %vm202_vm9 = vcmp.eq.s32.totalorder %v1449_v26, 6  ;;  %vm227_vm10 = vcmp.eq.s32.totalorder %v1449_v26, 7 }
  0x45   :  { %2789 = sst [smem:[#allocation52_spill]] %s1320_s14  ;;  %s2800_s24 = sld [smem:[#allocation37_spill]]  ;;  %v197_v0 = vstv %s1320_s14  ;;  %v130_v30 = vsel %vm127_vm6, %v129_v38, %v105_v21  ;;  %vm252_vm11 = vcmp.eq.s32.totalorder %v1449_v26, 8  ;;  %vm277_vm12 = vcmp.eq.s32.totalorder %v1449_v26, 9 }
  0x46   :  { %s1353_s22 = sld [smem:[#allocation2 + $0x307]]  ;;  %s2802_s3 = sld [smem:[#allocation38_spill]]  ;;  %v155_v40 = vsel %vm152_vm7, %v154_v48, %v130_v30  ;;  %vm302_vm13 = vcmp.eq.s32.totalorder %v1449_v26, 10  ;;  %vm327_vm14 = vcmp.eq.s32.totalorder %v1449_v26, 11  ;;  %vm352_vm15 = vcmp.eq.s32.totalorder %v1449_v26, 12 }
  0x47   :  { %s2803_s5 = sld [smem:[#allocation39_spill]]  ;;  %s1359_s4 = sld [smem:[#allocation2 + $0x380]]  ;;  %v135_v41 = vstv %s2796_s27  ;;  %vm377_vm0 = vcmp.eq.s32.totalorder %v1449_v26, 13  ;;  %vm402_vm1 = vcmp.eq.s32.totalorder %v1449_v26, 14  ;;  %vm427_vm2 = vcmp.eq.s32.totalorder %v1449_v26, 15 }
  0x48   :  { %s1361_s2 = sld [smem:[#allocation2 + $0x381]]  ;;  %s2807_s8 = sld [smem:[#allocation42_spill]]  ;;  %v136_v33 = vsel %vm127_vm6, %v135_v41, %v111_v23  ;;  %v2894_v7 = vstv %s1346_s28  ;;  %vm452_vm3 = vcmp.eq.s32.totalorder %v1449_v26, 16  ;;  %vm477_vm4 = vcmp.eq.s32.totalorder %v1449_v26, 17 }
  0x49   :  { %s2806_s6 = sld [smem:[#allocation41_spill]]  ;;  %v138_v42 = vstv %s2797_s30  ;;  %s1366_s7 = sld [smem:[#allocation2 + $0x382]]  ;;  %vm502_vm5 = vcmp.eq.s32.totalorder %v1449_v26, 18 }
  0x4a   :  { %2799 = sst [smem:[#allocation56_spill]] %s1351_s21  ;;  %s1368_s23 = sld [smem:[#allocation2 + $0x383]]  ;;  %v141_v43 = vstv %s2798_s29  ;;  %v139_v34 = vsel %vm127_vm6, %v138_v42, %v114_v24 }
  0x4b   :  { %s2811_s0 = sld [smem:[#allocation45_spill]]  ;;  %s2812_s26 = sld [smem:[#allocation46_spill]]  ;;  %v144_v44 = vstv %s2800_s24  ;;  %v142_v35 = vsel %vm127_vm6, %v141_v43, %v117_v25  ;;  %v164_v43 = vsel %vm152_vm7, %v163_v51, %v139_v34 }
  0x4c   :  { %2801 = sst [smem:[#allocation37_spill]] %s1353_s22  ;;  %s2809_s22 = sld [smem:[#allocation44_spill]]  ;;  %v147_v45 = vstv %s2802_s3  ;;  %v145_v36 = vsel %vm127_vm6, %v144_v44, %v120_v27 }
  0x4d   :  { %2804 = sst [smem:[#allocation57_spill]] %s1359_s4  ;;  %v150_v46 = vstv %s2803_s5  ;;  %s2813_s10 = sld [smem:[#allocation47_spill]]  ;;  %v148_v37 = vsel %vm127_vm6, %v147_v45, %v123_v28 }
  0x4e   :  { %2805 = sst [smem:[#allocation58_spill]] %s1361_s2  ;;  %s1375_s2 = sld [smem:[#allocation2 + $0x384]]  ;;  %v160_v50 = vstv %s2807_s8  ;;  %v151_v38 = vsel %vm127_vm6, %v150_v46, %v126_v29  ;;  %vm527_vm6 = vcmp.eq.s32.totalorder %v1449_v26, 19 }
  0x4f   :  { %2808 = sst [smem:[#allocation59_spill]] %s1366_s7  ;;  %s1377_s27 = sld [smem:[#allocation2 + $0x385]]  ;;  %v157_v49 = vstv %s2806_s6  ;;  %v161_v42 = vsel %vm152_vm7, %v160_v50, %v136_v33 }
  0x50   :  { %2810 = sst [smem:[#allocation44_spill]] %s1368_s23  ;;  %s2816_s30 = sld [smem:[#allocation50_spill]]  ;;  %v158_v41 = vsel %vm152_vm7, %v157_v49, %v133_v32  ;;  %v180_v49 = vsel %vm177_vm8, %v179_v57, %v155_v40 }
  0x51   :  { %s1382_s13 = sld [smem:[#allocation2 + $0x386]]  ;;  %s1384_s29 = sld [smem:[#allocation2 + $0x387]]  ;;  %v169_v53 = vstv %s2811_s0  ;;  %v172_v54 = vstv %s2812_s26  ;;  %v183_v50 = vsel %vm177_vm8, %v182_v58, %v158_v41  ;;  %v205_v58 = vsel %vm202_vm9, %v204_v2, %v180_v49 }
  0x52   :  { %v166_v52 = vstv %s2809_s22  ;;  %s1390_s5 = sld [smem:[#allocation2 + $0x400]]  ;;  %s1392_s3 = sld [smem:[#allocation2 + $0x401]]  ;;  %v170_v45 = vsel %vm152_vm7, %v169_v53, %v145_v36  ;;  %v173_v46 = vsel %vm152_vm7, %v172_v54, %v148_v37 }
  0x53   :  { %v175_v56 = vstv %s2813_s10  ;;  %s1397_s6 = sld [smem:[#allocation2 + $0x402]]  ;;  %s2823_s11 = sld [smem:[#allocation55_spill]]  ;;  %v167_v44 = vsel %vm152_vm7, %v166_v52, %v142_v35  ;;  %v189_v52 = vsel %vm177_vm8, %v188_v60, %v164_v43  ;;  %v195_v54 = vsel %vm177_vm8, %v194_v62, %v170_v45 }
  0x54   :  { %2814 = sst [smem:[#allocation60_spill]] %s1375_s2  ;;  %s1399_s17 = sld [smem:[#allocation2 + $0x403]]  ;;  %v241_v63 = vstv %s1375_s2  ;;  %v176_v48 = vsel %vm152_vm7, %v175_v56, %v151_v38  ;;  %v192_v53 = vsel %vm177_vm8, %v191_v61, %v167_v44  ;;  %v198_v56 = vsel %vm177_vm8, %v197_v0, %v173_v46 }
  0x55   :  { %2815 = sst [smem:[#allocation61_spill]] %s1377_s27  ;;  %s1405_s26 = sld [smem:[#allocation2 + $0x404]]  ;;  %v201_v57 = vsel %vm177_vm8, %v200_v1, %v176_v48  ;;  %v2892_v1 = vstv %s1344_s25  ;;  %v220_v5 = vsel %vm202_vm9, %v2894_v7, %v195_v54  ;;  %vm552_vm7 = vcmp.eq.s32.totalorder %v1449_v26, 20 }
  0x56   :  { %v185_v59 = vstv %s2816_s30  ;;  %s1407_s0 = sld [smem:[#allocation2 + $0x405]]  ;;  %s1412_s10 = sld [smem:[#allocation2 + $0x406]]  ;;  %v217_v2 = vsel %vm202_vm9, %v2892_v1, %v192_v53 }
  0x57   :  { %2817 = sst [smem:[#allocation62_spill]] %s1382_s13  ;;  %s1414_s30 = sld [smem:[#allocation2 + $0x407]]  ;;  %v247_v31 = vstv %s1382_s13  ;;  %v186_v51 = vsel %vm177_vm8, %v185_v59, %v161_v42  ;;  %v2886_v59 = vstv %s1330_s19  ;;  %v242_v20 = vsel %vm227_vm10, %v241_v63, %v217_v2 }
  0x58   :  { %2818 = sst [smem:[#allocation63_spill]] %s1384_s29  ;;  %s1420_s9 = sld [smem:[#allocation2 + $0x480]]  ;;  %v208_v60 = vsel %vm202_vm9, %v2886_v59, %v183_v50  ;;  %vm577_vm8 = vcmp.eq.s32.totalorder %v1449_v26, 21 }
  0x59   :  { %2819 = sst [smem:[#allocation64_spill]] %s1390_s5  ;;  %s1422_s14 = sld [smem:[#allocation2 + $0x481]]  ;;  %v260_v55 = vstv %s1397_s6  ;;  %v2888_v6 = vstv %s2823_s11 }
  0x5a   :  { %2820 = sst [smem:[#allocation65_spill]] %s1392_s3  ;;  %s1427_s20 = sld [smem:[#allocation2 + $0x482]]  ;;  %v214_v0 = vsel %vm202_vm9, %v2888_v6, %v189_v52 }
  0x5b   :  { %2822 = sst [smem:[#allocation66_spill]] %s1397_s6  ;;  %s1429_s8 = sld [smem:[#allocation2 + $0x483]]  ;;  %v266_v39 = vstv %s1405_s26 }
  0x5c   :  { %2824 = sst [smem:[#allocation55_spill]] %s1399_s17  ;;  %v269_v8 = vstv %s1407_s0  ;;  %v272_v4 = vstv %s1412_s10  ;;  %s1586_s17 = sld [smem:[#allocation2 + $0x484]]  ;;  %v267_v35 = vsel %vm252_vm11, %v266_v39, %v242_v20 }
  0x5d   :  { %2825 = sst [smem:[#allocation67_spill]] %s1405_s26  ;;  %v275_v3 = vstv %s1414_s30  ;;  %s2879_s7 = sld [smem:[#allocation54_spill]] }
  0x5e   :  { %2826 = sst [smem:[#allocation68_spill]] %s1407_s0  ;;  %s1588_s23 = sld [smem:[#allocation2 + $0x485]] }
  0x5f   :  { %2829 = sst [smem:[#allocation69_spill]] %s1412_s10  ;;  %s2880_s27 = sld [smem:[#allocation56_spill]] }
  0x60   :  { %2830 = sst [smem:[#allocation70_spill]] %s1414_s30  ;;  %s2881_s22 = sld [smem:[#allocation37_spill]] }
  0x61   :  { %2831 = sst [smem:[#allocation71_spill]] %s1420_s9  ;;  %s2882_s29 = sld [smem:[#allocation57_spill]] }
  0x62   :  { %2832 = sst [smem:[#allocation72_spill]] %s1422_s14  ;;  %s2883_s3 = sld [smem:[#allocation58_spill]]  ;;  %v291_v63 = vstv %s1586_s17 }
  0x63   :  { %2833 = sst [smem:[#allocation73_spill]] %s1427_s20  ;;  %s2884_s15 = sld [smem:[#allocation59_spill]]  ;;  %v2887_v61 = vstv %s2879_s7  ;;  %v292_v43 = vsel %vm277_vm12, %v291_v63, %v267_v35 }
  0x64   :  { %2834 = sst [smem:[#allocation74_spill]] %s1429_s8  ;;  %s2885_s1 = sld [smem:[#allocation44_spill]]  ;;  %v211_v62 = vsel %vm202_vm9, %v2887_v61, %v186_v51  ;;  %v294_v27 = vstv %s1588_s23 }
  0x65   :  { %s2890_s2 = sld [smem:[#allocation61_spill]]  ;;  %s1646_s5 = sld [smem:[#allocation2 + $0x486]]  ;;  %v2895_v9 = vstv %s2880_s27 }
  0x66   :  { %s1648_s4 = sld [smem:[#allocation2 + $0x487]]  ;;  %v223_v10 = vsel %vm202_vm9, %v2895_v9, %v198_v56  ;;  %v2896_v14 = vstv %s2881_s22  ;;  %s1666_s11 = sld [smem:[#allocation2 + $0x500]] }
  0x67   :  { %s2893_s19 = sld [smem:[#allocation63_spill]]  ;;  %v226_v47 = vsel %vm202_vm9, %v2896_v14, %v201_v57  ;;  %s1668_s25 = sld [smem:[#allocation2 + $0x501]]  ;;  %v2897_v11 = vstv %s2882_s29  ;;  %v248_v23 = vsel %vm227_vm10, %v247_v31, %v223_v10  ;;  %vm602_vm9 = vcmp.eq.s32.totalorder %v1449_v26, 22 }
  0x68   :  { %v230_v12 = vsel %vm227_vm10, %v2897_v11, %v205_v58  ;;  %v2898_v13 = vstv %s2883_s3  ;;  %s2901_s28 = sld [smem:[#allocation64_spill]]  ;;  %s2902_s14 = sld [smem:[#allocation65_spill]]  ;;  %v273_v37 = vsel %vm252_vm11, %v272_v4, %v248_v23 }
  0x69   :  { %v233_v15 = vsel %vm227_vm10, %v2898_v13, %v208_v60  ;;  %v2899_v16 = vstv %s2884_s15  ;;  %s1686_s20 = sld [smem:[#allocation2 + $0x502]]  ;;  %s1688_s30 = sld [smem:[#allocation2 + $0x503]] }
  0x6a   :  { %v236_v17 = vsel %vm227_vm10, %v2899_v16, %v211_v62  ;;  %v2900_v18 = vstv %s2885_s1  ;;  %s2904_s21 = sld [smem:[#allocation55_spill]]  ;;  %s1706_s9 = sld [smem:[#allocation2 + $0x504]] }
  0x6b   :  { %v239_v19 = vsel %vm227_vm10, %v2900_v18, %v214_v0  ;;  %v2905_v21 = vstv %s2890_s2  ;;  %s1708_s12 = sld [smem:[#allocation2 + $0x505]]  ;;  %s2911_s13 = sld [smem:[#allocation71_spill]]  ;;  %v261_v32 = vsel %vm252_vm11, %v260_v55, %v236_v17  ;;  %v297_v45 = vstv %s1646_s5 }
  0x6c   :  { %v245_v22 = vsel %vm227_vm10, %v2905_v21, %v220_v5  ;;  %s2912_s16 = sld [smem:[#allocation72_spill]]  ;;  %s1714_s7 = sld [smem:[#allocation2 + $0x506]]  ;;  %v300_v46 = vstv %s1648_s4  ;;  %v298_v48 = vsel %vm277_vm12, %v297_v45, %v273_v37  ;;  %v304_v50 = vstv %s1666_s11 }
  0x6d   :  { %v2906_v24 = vstv %s2893_s19  ;;  %s2913_s27 = sld [smem:[#allocation73_spill]]  ;;  %s1716_s22 = sld [smem:[#allocation2 + $0x507]]  ;;  %v270_v36 = vsel %vm252_vm11, %v269_v8, %v245_v22  ;;  %v307_v52 = vstv %s1668_s25 }
  0x6e   :  { %v251_v25 = vsel %vm227_vm10, %v2906_v24, %v226_v47  ;;  %v2914_v31 = vstv %s2901_s28  ;;  %s2915_s29 = sld [smem:[#allocation74_spill]]  ;;  %v2916_v29 = vstv %s2902_s14  ;;  %s1726_s3 = sld [smem:[#allocation2 + $0x580]]  ;;  %v295_v44 = vsel %vm277_vm12, %v294_v27, %v270_v36 }
  0x6f   :  { %v255_v28 = vsel %vm252_vm11, %v2914_v31, %v230_v12  ;;  %v258_v30 = vsel %vm252_vm11, %v2916_v29, %v233_v15  ;;  %s1728_s17 = sld [smem:[#allocation2 + $0x581]]  ;;  %v276_v38 = vsel %vm252_vm11, %v275_v3, %v251_v25  ;;  %s1738_s23 = sld [smem:[#allocation2 + $0x582]]  ;;  %v310_v53 = vstv %s1686_s20 }
  0x70   :  { %v2917_v33 = vstv %s2904_s21  ;;  %s1740_s15 = sld [smem:[#allocation2 + $0x583]]  ;;  %s1758_s1 = sld [smem:[#allocation2 + $0x584]]  ;;  %v301_v49 = vsel %vm277_vm12, %v300_v46, %v276_v38  ;;  %v313_v54 = vstv %s1688_s30  ;;  %v316_v59 = vstv %s1706_s9 }
  0x71   :  { %v264_v34 = vsel %vm252_vm11, %v2917_v33, %v239_v19  ;;  %v2918_v55 = vstv %s2911_s13  ;;  %s1760_s18 = sld [smem:[#allocation2 + $0x585]]  ;;  %s1768_s2 = sld [smem:[#allocation2 + $0x586]]  ;;  %v317_v60 = vsel %vm302_vm13, %v316_v59, %v292_v43  ;;  %v319_v61 = vstv %s1708_s12 }
  0x72   :  { %v280_v40 = vsel %vm277_vm12, %v2918_v55, %v255_v28  ;;  %v2919_v41 = vstv %s2912_s16  ;;  %s1770_s26 = sld [smem:[#allocation2 + $0x587]]  ;;  %s1778_s19 = sld [smem:[#allocation2 + $0x600]]  ;;  %v322_v62 = vstv %s1714_s7  ;;  %v320_v0 = vsel %vm302_vm13, %v319_v61, %v295_v44 }
  0x73   :  { %v283_v42 = vsel %vm277_vm12, %v2919_v41, %v258_v30  ;;  %v2920_v39 = vstv %s2913_s27  ;;  %v305_v51 = vsel %vm302_vm13, %v304_v50, %v280_v40  ;;  %s1785_s5 = sld [smem:[#allocation2 + $0x601]]  ;;  %s1787_s4 = sld [smem:[#allocation2 + $0x602]]  ;;  %v325_v6 = vstv %s1716_s22 }
  0x74   :  { %v286_v8 = vsel %vm277_vm12, %v2920_v39, %v261_v32  ;;  %v2921_v4 = vstv %s2915_s29  ;;  %v308_v56 = vsel %vm302_vm13, %v307_v52, %v283_v42  ;;  %s1796_s11 = sld [smem:[#allocation2 + $0x603]]  ;;  %s1798_s25 = sld [smem:[#allocation2 + $0x604]]  ;;  %v323_v1 = vsel %vm302_vm13, %v322_v62, %v298_v48 }
  0x75   :  { %v289_v3 = vsel %vm277_vm12, %v2921_v4, %v264_v34  ;;  %v311_v57 = vsel %vm302_vm13, %v310_v53, %v286_v8  ;;  %s1805_s28 = sld [smem:[#allocation2 + $0x605]]  ;;  %s1807_s14 = sld [smem:[#allocation2 + $0x606]]  ;;  %v326_v2 = vsel %vm302_vm13, %v325_v6, %v301_v49  ;;  %v329_v7 = vstv %s1726_s3 }
  0x76   :  { %v314_v58 = vsel %vm302_vm13, %v313_v54, %v289_v3  ;;  %s1816_s20 = sld [smem:[#allocation2 + $0x607]]  ;;  %v332_v5 = vstv %s1728_s17  ;;  %v335_v9 = vstv %s1738_s23  ;;  %v338_v10 = vstv %s1740_s15  ;;  %s1822_s0 = sld [smem:[#allocation2 + $0x680]] }
  0x77   :  { %s1824_s30 = sld [smem:[#allocation2 + $0x681]]  ;;  %v330_v14 = vsel %vm327_vm14, %v329_v7, %v305_v51  ;;  %v333_v47 = vsel %vm327_vm14, %v332_v5, %v308_v56  ;;  %v336_v11 = vsel %vm327_vm14, %v335_v9, %v311_v57  ;;  %v339_v12 = vsel %vm327_vm14, %v338_v10, %v314_v58  ;;  %s1834_s21 = sld [smem:[#allocation2 + $0x682]] }
  0x78   :  { %s1836_s6 = sld [smem:[#allocation2 + $0x683]]  ;;  %v341_v13 = vstv %s1758_s1  ;;  %v344_v15 = vstv %s1760_s18  ;;  %v347_v16 = vstv %s1768_s2  ;;  %v350_v17 = vstv %s1770_s26  ;;  %s1842_s8 = sld [smem:[#allocation2 + $0x684]] }
  0x79   :  { %s1844_s9 = sld [smem:[#allocation2 + $0x685]]  ;;  %v342_v18 = vsel %vm327_vm14, %v341_v13, %v317_v60  ;;  %v345_v19 = vsel %vm327_vm14, %v344_v15, %v320_v0  ;;  %v348_v20 = vsel %vm327_vm14, %v347_v16, %v323_v1  ;;  %v351_v21 = vsel %vm327_vm14, %v350_v17, %v326_v2  ;;  %s1854_s10 = sld [smem:[#allocation2 + $0x686]] }
  0x7a   :  { %s1856_s12 = sld [smem:[#allocation2 + $0x687]]  ;;  %v354_v22 = vstv %s1778_s19  ;;  %v357_v23 = vstv %s1785_s5  ;;  %v360_v24 = vstv %s1787_s4  ;;  %s1862_s24 = sld [smem:[#allocation2 + $0x700]]  ;;  %v363_v31 = vstv %s1796_s11 }
  0x7b   :  { %s1864_s13 = sld [smem:[#allocation2 + $0x701]]  ;;  %v355_v25 = vsel %vm352_vm15, %v354_v22, %v330_v14  ;;  %v358_v63 = vsel %vm352_vm15, %v357_v23, %v333_v47  ;;  %v361_v27 = vsel %vm352_vm15, %v360_v24, %v336_v11  ;;  %s1873_s16 = sld [smem:[#allocation2 + $0x702]]  ;;  %v364_v28 = vsel %vm352_vm15, %v363_v31, %v339_v12 }
  0x7c   :  { %s1875_s7 = sld [smem:[#allocation2 + $0x703]]  ;;  %v366_v29 = vstv %s1798_s25  ;;  %v369_v30 = vstv %s1805_s28  ;;  %v372_v32 = vstv %s1807_s14  ;;  %s1882_s27 = sld [smem:[#allocation2 + $0x704]]  ;;  %v375_v36 = vstv %s1816_s20 }
  0x7d   :  { %s1884_s22 = sld [smem:[#allocation2 + $0x705]]  ;;  %v367_v33 = vsel %vm352_vm15, %v366_v29, %v342_v18  ;;  %v370_v34 = vsel %vm352_vm15, %v369_v30, %v345_v19  ;;  %v373_v35 = vsel %vm352_vm15, %v372_v32, %v348_v20  ;;  %s1893_s29 = sld [smem:[#allocation2 + $0x706]]  ;;  %v376_v37 = vsel %vm352_vm15, %v375_v36, %v351_v21 }
  0x7e   :  { %s1895_s3 = sld [smem:[#allocation2 + $0x707]]  ;;  %v379_v38 = vstv %s1822_s0  ;;  %v382_v55 = vstv %s1824_s30  ;;  %s1902_s17 = sld [smem:[#allocation2 + $0x780]]  ;;  %v385_v42 = vstv %s1834_s21  ;;  %v388_v39 = vstv %s1836_s6 }
  0x7f   :  { %s1904_s23 = sld [smem:[#allocation2 + $0x781]]  ;;  %v380_v40 = vsel %vm377_vm0, %v379_v38, %v355_v25  ;;  %v383_v41 = vsel %vm377_vm0, %v382_v55, %v358_v63  ;;  %s1912_s15 = sld [smem:[#allocation2 + $0x782]]  ;;  %v386_v8 = vsel %vm377_vm0, %v385_v42, %v361_v27  ;;  %v389_v4 = vsel %vm377_vm0, %v388_v39, %v364_v28 }
  0x80   :  { %s1914_s1 = sld [smem:[#allocation2 + $0x783]]  ;;  %v391_v3 = vstv %s1842_s8  ;;  %v394_v43 = vstv %s1844_s9  ;;  %s1922_s18 = sld [smem:[#allocation2 + $0x784]]  ;;  %v397_v46 = vstv %s1854_s10  ;;  %v400_v48 = vstv %s1856_s12 }
  0x81   :  { %s1924_s2 = sld [smem:[#allocation2 + $0x785]]  ;;  %v392_v44 = vsel %vm377_vm0, %v391_v3, %v367_v33  ;;  %v395_v45 = vsel %vm377_vm0, %v394_v43, %v370_v34  ;;  %s1932_s26 = sld [smem:[#allocation2 + $0x786]]  ;;  %v398_v49 = vsel %vm377_vm0, %v397_v46, %v373_v35  ;;  %v401_v50 = vsel %vm377_vm0, %v400_v48, %v376_v37 }
  0x82   :  { %s1934_s19 = sld [smem:[#allocation2 + $0x787]]  ;;  %v404_v51 = vstv %s1862_s24  ;;  %s1942_s5 = sld [smem:[#allocation2 + $0x800]]  ;;  %v407_v53 = vstv %s1864_s13  ;;  %v410_v54 = vstv %s1873_s16  ;;  %v413_v56 = vstv %s1875_s7 }
  0x83   :  { %v405_v52 = vsel %vm402_vm1, %v404_v51, %v380_v40  ;;  %s1949_s4 = sld [smem:[#allocation2 + $0x801]]  ;;  %s1951_s11 = sld [smem:[#allocation2 + $0x802]]  ;;  %v408_v57 = vsel %vm402_vm1, %v407_v53, %v383_v41  ;;  %v411_v58 = vsel %vm402_vm1, %v410_v54, %v386_v8  ;;  %v414_v59 = vsel %vm402_vm1, %v413_v56, %v389_v4 }
  0x84   :  { %v416_v60 = vstv %s1882_s27  ;;  %s1960_s25 = sld [smem:[#allocation2 + $0x803]]  ;;  %s1962_s28 = sld [smem:[#allocation2 + $0x804]]  ;;  %v419_v62 = vstv %s1884_s22  ;;  %v422_v6 = vstv %s1893_s29  ;;  %v425_v0 = vstv %s1895_s3 }
  0x85   :  { %v417_v61 = vsel %vm402_vm1, %v416_v60, %v392_v44  ;;  %s1969_s14 = sld [smem:[#allocation2 + $0x805]]  ;;  %s1971_s20 = sld [smem:[#allocation2 + $0x806]]  ;;  %v420_v1 = vsel %vm402_vm1, %v419_v62, %v395_v45  ;;  %v423_v2 = vsel %vm402_vm1, %v422_v6, %v398_v49  ;;  %v426_v7 = vsel %vm402_vm1, %v425_v0, %v401_v50 }
  0x86   :  { %s1980_s0 = sld [smem:[#allocation2 + $0x807]]  ;;  %v429_v5 = vstv %s1902_s17  ;;  %v432_v9 = vstv %s1904_s23  ;;  %v435_v10 = vstv %s1912_s15  ;;  %v438_v14 = vstv %s1914_s1  ;;  %s1986_s30 = sld [smem:[#allocation2 + $0x880]] }
  0x87   :  { %s1988_s21 = sld [smem:[#allocation2 + $0x881]]  ;;  %v430_v47 = vsel %vm427_vm2, %v429_v5, %v405_v52  ;;  %v433_v11 = vsel %vm427_vm2, %v432_v9, %v408_v57  ;;  %v436_v12 = vsel %vm427_vm2, %v435_v10, %v411_v58  ;;  %v439_v13 = vsel %vm427_vm2, %v438_v14, %v414_v59  ;;  %s1998_s6 = sld [smem:[#allocation2 + $0x882]] }
  0x88   :  { %s2000_s8 = sld [smem:[#allocation2 + $0x883]]  ;;  %v441_v15 = vstv %s1922_s18  ;;  %v444_v16 = vstv %s1924_s2  ;;  %v447_v17 = vstv %s1932_s26  ;;  %v450_v18 = vstv %s1934_s19  ;;  %s2006_s9 = sld [smem:[#allocation2 + $0x884]] }
  0x89   :  { %s2008_s10 = sld [smem:[#allocation2 + $0x885]]  ;;  %v442_v19 = vsel %vm427_vm2, %v441_v15, %v417_v61  ;;  %v445_v20 = vsel %vm427_vm2, %v444_v16, %v420_v1  ;;  %v448_v21 = vsel %vm427_vm2, %v447_v17, %v423_v2  ;;  %v451_v22 = vsel %vm427_vm2, %v450_v18, %v426_v7  ;;  %s2018_s12 = sld [smem:[#allocation2 + $0x886]] }
  0x8a   :  { %s2020_s24 = sld [smem:[#allocation2 + $0x887]]  ;;  %v454_v23 = vstv %s1942_s5  ;;  %v457_v24 = vstv %s1949_s4  ;;  %v460_v25 = vstv %s1951_s11  ;;  %s2026_s13 = sld [smem:[#allocation2 + $0x900]]  ;;  %v463_v28 = vstv %s1960_s25 }
  0x8b   :  { %s2028_s16 = sld [smem:[#allocation2 + $0x901]]  ;;  %v455_v63 = vsel %vm452_vm3, %v454_v23, %v430_v47  ;;  %v458_v27 = vsel %vm452_vm3, %v457_v24, %v433_v11  ;;  %v461_v31 = vsel %vm452_vm3, %v460_v25, %v436_v12  ;;  %s2037_s7 = sld [smem:[#allocation2 + $0x902]]  ;;  %v464_v29 = vsel %vm452_vm3, %v463_v28, %v439_v13 }
  0x8c   :  { %s2039_s27 = sld [smem:[#allocation2 + $0x903]]  ;;  %v466_v30 = vstv %s1962_s28  ;;  %v469_v32 = vstv %s1969_s14  ;;  %v472_v33 = vstv %s1971_s20  ;;  %s2046_s22 = sld [smem:[#allocation2 + $0x904]]  ;;  %v475_v37 = vstv %s1980_s0 }
  0x8d   :  { %s2048_s29 = sld [smem:[#allocation2 + $0x905]]  ;;  %v467_v34 = vsel %vm452_vm3, %v466_v30, %v442_v19  ;;  %v470_v35 = vsel %vm452_vm3, %v469_v32, %v445_v20  ;;  %v473_v36 = vsel %vm452_vm3, %v472_v33, %v448_v21  ;;  %s2057_s3 = sld [smem:[#allocation2 + $0x906]]  ;;  %v476_v38 = vsel %vm452_vm3, %v475_v37, %v451_v22 }
  0x8e   :  { %s2059_s17 = sld [smem:[#allocation2 + $0x907]]  ;;  %v479_v55 = vstv %s1986_s30  ;;  %v482_v40 = vstv %s1988_s21  ;;  %s2066_s23 = sld [smem:[#allocation2 + $0x980]]  ;;  %v485_v39 = vstv %s1998_s6  ;;  %v488_v8 = vstv %s2000_s8 }
  0x8f   :  { %s2068_s15 = sld [smem:[#allocation2 + $0x981]]  ;;  %v480_v41 = vsel %vm477_vm4, %v479_v55, %v455_v63  ;;  %v483_v42 = vsel %vm477_vm4, %v482_v40, %v458_v27  ;;  %s2076_s1 = sld [smem:[#allocation2 + $0x982]]  ;;  %v486_v4 = vsel %vm477_vm4, %v485_v39, %v461_v31  ;;  %v489_v3 = vsel %vm477_vm4, %v488_v8, %v464_v29 }
  0x90   :  { %s2078_s18 = sld [smem:[#allocation2 + $0x983]]  ;;  %v491_v43 = vstv %s2006_s9  ;;  %v494_v44 = vstv %s2008_s10  ;;  %s2086_s2 = sld [smem:[#allocation2 + $0x984]]  ;;  %v497_v48 = vstv %s2018_s12  ;;  %v500_v49 = vstv %s2020_s24 }
  0x91   :  { %s2088_s26 = sld [smem:[#allocation2 + $0x985]]  ;;  %v492_v45 = vsel %vm477_vm4, %v491_v43, %v467_v34  ;;  %v495_v46 = vsel %vm477_vm4, %v494_v44, %v470_v35  ;;  %s2096_s19 = sld [smem:[#allocation2 + $0x986]]  ;;  %v498_v50 = vsel %vm477_vm4, %v497_v48, %v473_v36  ;;  %v501_v51 = vsel %vm477_vm4, %v500_v49, %v476_v38 }
  0x92   :  { %s2098_s5 = sld [smem:[#allocation2 + $0x987]]  ;;  %v504_v52 = vstv %s2026_s13  ;;  %s2106_s4 = sld [smem:[#allocation2 + $0xa00]]  ;;  %v507_v54 = vstv %s2028_s16  ;;  %v510_v56 = vstv %s2037_s7  ;;  %v513_v57 = vstv %s2039_s27 }
  0x93   :  { %v505_v53 = vsel %vm502_vm5, %v504_v52, %v480_v41  ;;  %s2113_s11 = sld [smem:[#allocation2 + $0xa01]]  ;;  %s2115_s25 = sld [smem:[#allocation2 + $0xa02]]  ;;  %v508_v58 = vsel %vm502_vm5, %v507_v54, %v483_v42  ;;  %v511_v59 = vsel %vm502_vm5, %v510_v56, %v486_v4  ;;  %v514_v60 = vsel %vm502_vm5, %v513_v57, %v489_v3 }
  0x94   :  { %v516_v61 = vstv %s2046_s22  ;;  %s2124_s28 = sld [smem:[#allocation2 + $0xa03]]  ;;  %s2126_s14 = sld [smem:[#allocation2 + $0xa04]]  ;;  %v519_v6 = vstv %s2048_s29  ;;  %v522_v0 = vstv %s2057_s3  ;;  %v525_v1 = vstv %s2059_s17 }
  0x95   :  { %v517_v62 = vsel %vm502_vm5, %v516_v61, %v492_v45  ;;  %s2133_s20 = sld [smem:[#allocation2 + $0xa05]]  ;;  %s2135_s0 = sld [smem:[#allocation2 + $0xa06]]  ;;  %v520_v2 = vsel %vm502_vm5, %v519_v6, %v495_v46  ;;  %v523_v7 = vsel %vm502_vm5, %v522_v0, %v498_v50  ;;  %v526_v5 = vsel %vm502_vm5, %v525_v1, %v501_v51 }
  0x96   :  { %s2144_s30 = sld [smem:[#allocation2 + $0xa07]]  ;;  %v529_v9 = vstv %s2066_s23  ;;  %v532_v10 = vstv %s2068_s15  ;;  %v535_v14 = vstv %s2076_s1  ;;  %v538_v47 = vstv %s2078_s18  ;;  %s2150_s21 = sld [smem:[#allocation2 + $0xa80]] }
  0x97   :  { %s2152_s6 = sld [smem:[#allocation2 + $0xa81]]  ;;  %v530_v11 = vsel %vm527_vm6, %v529_v9, %v505_v53  ;;  %v533_v12 = vsel %vm527_vm6, %v532_v10, %v508_v58  ;;  %v536_v13 = vsel %vm527_vm6, %v535_v14, %v511_v59  ;;  %v539_v15 = vsel %vm527_vm6, %v538_v47, %v514_v60  ;;  %s2162_s8 = sld [smem:[#allocation2 + $0xa82]] }
  0x98   :  { %s2164_s9 = sld [smem:[#allocation2 + $0xa83]]  ;;  %v541_v16 = vstv %s2086_s2  ;;  %v544_v17 = vstv %s2088_s26  ;;  %v547_v18 = vstv %s2096_s19  ;;  %v550_v19 = vstv %s2098_s5  ;;  %s2170_s10 = sld [smem:[#allocation2 + $0xa84]] }
  0x99   :  { %s2172_s12 = sld [smem:[#allocation2 + $0xa85]]  ;;  %v542_v20 = vsel %vm527_vm6, %v541_v16, %v517_v62  ;;  %v545_v21 = vsel %vm527_vm6, %v544_v17, %v520_v2  ;;  %v548_v22 = vsel %vm527_vm6, %v547_v18, %v523_v7  ;;  %v551_v23 = vsel %vm527_vm6, %v550_v19, %v526_v5  ;;  %s2182_s24 = sld [smem:[#allocation2 + $0xa86]] }
  0x9a   :  { %s2184_s13 = sld [smem:[#allocation2 + $0xa87]]  ;;  %v554_v24 = vstv %s2106_s4  ;;  %v557_v25 = vstv %s2113_s11  ;;  %v560_v63 = vstv %s2115_s25  ;;  %s2190_s16 = sld [smem:[#allocation2 + $0xb00]]  ;;  %v563_v29 = vstv %s2124_s28 }
  0x9b   :  { %s2192_s7 = sld [smem:[#allocation2 + $0xb01]]  ;;  %v555_v27 = vsel %vm552_vm7, %v554_v24, %v530_v11  ;;  %v558_v31 = vsel %vm552_vm7, %v557_v25, %v533_v12  ;;  %v561_v28 = vsel %vm552_vm7, %v560_v63, %v536_v13  ;;  %s2201_s27 = sld [smem:[#allocation2 + $0xb02]]  ;;  %v564_v30 = vsel %vm552_vm7, %v563_v29, %v539_v15 }
  0x9c   :  { %s2203_s22 = sld [smem:[#allocation2 + $0xb03]]  ;;  %v566_v32 = vstv %s2126_s14  ;;  %v569_v33 = vstv %s2133_s20  ;;  %v572_v34 = vstv %s2135_s0  ;;  %s2210_s29 = sld [smem:[#allocation2 + $0xb04]]  ;;  %v575_v38 = vstv %s2144_s30 }
  0x9d   :  { %s2212_s3 = sld [smem:[#allocation2 + $0xb05]]  ;;  %v567_v35 = vsel %vm552_vm7, %v566_v32, %v542_v20  ;;  %v570_v36 = vsel %vm552_vm7, %v569_v33, %v545_v21  ;;  %v573_v37 = vsel %vm552_vm7, %v572_v34, %v548_v22  ;;  %s2221_s17 = sld [smem:[#allocation2 + $0xb06]]  ;;  %v576_v55 = vsel %vm552_vm7, %v575_v38, %v551_v23 }
  0x9e   :  { %s2223_s23 = sld [smem:[#allocation2 + $0xb07]]  ;;  %v579_v40 = vstv %s2150_s21  ;;  %v582_v41 = vstv %s2152_s6  ;;  %s2230_s15 = sld [smem:[#allocation2 + $0xb80]]  ;;  %v585_v8 = vstv %s2162_s8  ;;  %v588_v4 = vstv %s2164_s9 }
  0x9f   :  { %s2232_s1 = sld [smem:[#allocation2 + $0xb81]]  ;;  %v580_v42 = vsel %vm577_vm8, %v579_v40, %v555_v27  ;;  %v583_v39 = vsel %vm577_vm8, %v582_v41, %v558_v31  ;;  %s2240_s18 = sld [smem:[#allocation2 + $0xb82]]  ;;  %v586_v3 = vsel %vm577_vm8, %v585_v8, %v561_v28  ;;  %v589_v43 = vsel %vm577_vm8, %v588_v4, %v564_v30 }
  0xa0   :  { %s2242_s2 = sld [smem:[#allocation2 + $0xb83]]  ;;  %v591_v44 = vstv %s2170_s10  ;;  %v594_v45 = vstv %s2172_s12  ;;  %s2250_s26 = sld [smem:[#allocation2 + $0xb84]]  ;;  %v597_v49 = vstv %s2182_s24  ;;  %v600_v50 = vstv %s2184_s13 }
  0xa1   :  { %s2252_s19 = sld [smem:[#allocation2 + $0xb85]]  ;;  %v592_v46 = vsel %vm577_vm8, %v591_v44, %v567_v35  ;;  %v595_v48 = vsel %vm577_vm8, %v594_v45, %v570_v36  ;;  %s2260_s5 = sld [smem:[#allocation2 + $0xb86]]  ;;  %v598_v51 = vsel %vm577_vm8, %v597_v49, %v573_v37  ;;  %v601_v52 = vsel %vm577_vm8, %v600_v50, %v576_v55 }
  0xa2   :  { %s2262_s4 = sld [smem:[#allocation2 + $0xb87]]  ;;  %v604_v53 = vstv %s2190_s16  ;;  %s2270_s11 = sld [smem:[#allocation2 + $0xc00]]  ;;  %v607_v56 = vstv %s2192_s7  ;;  %v610_v57 = vstv %s2201_s27  ;;  %v613_v58 = vstv %s2203_s22 }
  0xa3   :  { %v605_v54 = vsel %vm602_vm9, %v604_v53, %v580_v42  ;;  %s2277_s25 = sld [smem:[#allocation2 + $0xc01]]  ;;  %s2279_s28 = sld [smem:[#allocation2 + $0xc02]]  ;;  %v608_v59 = vsel %vm602_vm9, %v607_v56, %v583_v39  ;;  %v611_v60 = vsel %vm602_vm9, %v610_v57, %v586_v3  ;;  %v614_v61 = vsel %vm602_vm9, %v613_v58, %v589_v43 }
  0xa4   :  { %v616_v62 = vstv %s2210_s29  ;;  %s2288_s14 = sld [smem:[#allocation2 + $0xc03]]  ;;  %s2290_s20 = sld [smem:[#allocation2 + $0xc04]]  ;;  %v619_v0 = vstv %s2212_s3  ;;  %v622_v1 = vstv %s2221_s17  ;;  %v625_v2 = vstv %s2223_s23 }
  0xa5   :  { %v617_v6 = vsel %vm602_vm9, %v616_v62, %v592_v46  ;;  %s2297_s0 = sld [smem:[#allocation2 + $0xc05]]  ;;  %s2299_s30 = sld [smem:[#allocation2 + $0xc06]]  ;;  %v620_v7 = vsel %vm602_vm9, %v619_v0, %v595_v48  ;;  %v623_v5 = vsel %vm602_vm9, %v622_v1, %v598_v51  ;;  %v626_v9 = vsel %vm602_vm9, %v625_v2, %v601_v52 }
  0xa6   :  { %vm627_vm10 = vcmp.eq.s32.totalorder %v1449_v26, 23  ;;  %s2308_s21 = sld [smem:[#allocation2 + $0xc07]]  ;;  %v629_v10 = vstv %s2230_s15  ;;  %v632_v14 = vstv %s2232_s1  ;;  %v635_v47 = vstv %s2240_s18  ;;  %s2314_s6 = sld [smem:[#allocation2 + $0xc80]] }
  0xa7   :  { %v638_v11 = vstv %s2242_s2  ;;  %s2316_s8 = sld [smem:[#allocation2 + $0xc81]]  ;;  %v630_v12 = vsel %vm627_vm10, %v629_v10, %v605_v54  ;;  %v633_v13 = vsel %vm627_vm10, %v632_v14, %v608_v59  ;;  %v636_v15 = vsel %vm627_vm10, %v635_v47, %v611_v60  ;;  %s2326_s9 = sld [smem:[#allocation2 + $0xc82]] }
  0xa8   :  { %v639_v16 = vsel %vm627_vm10, %v638_v11, %v614_v61  ;;  %s2328_s10 = sld [smem:[#allocation2 + $0xc83]]  ;;  %v641_v17 = vstv %s2250_s26  ;;  %v644_v18 = vstv %s2252_s19  ;;  %v647_v19 = vstv %s2260_s5  ;;  %s2334_s12 = sld [smem:[#allocation2 + $0xc84]] }
  0xa9   :  { %v650_v20 = vstv %s2262_s4  ;;  %s2336_s24 = sld [smem:[#allocation2 + $0xc85]]  ;;  %v642_v21 = vsel %vm627_vm10, %v641_v17, %v617_v6  ;;  %v645_v22 = vsel %vm627_vm10, %v644_v18, %v620_v7  ;;  %v648_v23 = vsel %vm627_vm10, %v647_v19, %v623_v5  ;;  %s2346_s13 = sld [smem:[#allocation2 + $0xc86]] }
  0xaa   :  { %v651_v24 = vsel %vm627_vm10, %v650_v20, %v626_v9  ;;  %s2348_s16 = sld [smem:[#allocation2 + $0xc87]]  ;;  %vm652_vm11 = vcmp.eq.s32.totalorder %v1449_v26, 24  ;;  %v654_v25 = vstv %s2270_s11  ;;  %v657_v63 = vstv %s2277_s25  ;;  %s2354_s7 = sld [smem:[#allocation2 + $0xd00]] }
  0xab   :  { %v660_v27 = vstv %s2279_s28  ;;  %s2356_s27 = sld [smem:[#allocation2 + $0xd01]]  ;;  %v655_v31 = vsel %vm652_vm11, %v654_v25, %v630_v12  ;;  %v658_v28 = vsel %vm652_vm11, %v657_v63, %v633_v13  ;;  %v663_v30 = vstv %s2288_s14  ;;  %s2365_s22 = sld [smem:[#allocation2 + $0xd02]] }
  0xac   :  { %v661_v29 = vsel %vm652_vm11, %v660_v27, %v636_v15  ;;  %s2367_s29 = sld [smem:[#allocation2 + $0xd03]]  ;;  %v664_v32 = vsel %vm652_vm11, %v663_v30, %v639_v16  ;;  %v666_v33 = vstv %s2290_s20  ;;  %v669_v34 = vstv %s2297_s0  ;;  %s2374_s3 = sld [smem:[#allocation2 + $0xd04]] }
  0xad   :  { %v672_v35 = vstv %s2299_s30  ;;  %s2376_s17 = sld [smem:[#allocation2 + $0xd05]]  ;;  %v667_v36 = vsel %vm652_vm11, %v666_v33, %v642_v21  ;;  %v670_v37 = vsel %vm652_vm11, %v669_v34, %v645_v22  ;;  %v675_v55 = vstv %s2308_s21  ;;  %s2385_s23 = sld [smem:[#allocation2 + $0xd06]] }
  0xae   :  { %v673_v38 = vsel %vm652_vm11, %v672_v35, %v648_v23  ;;  %s2387_s15 = sld [smem:[#allocation2 + $0xd07]]  ;;  %v676_v40 = vsel %vm652_vm11, %v675_v55, %v651_v24  ;;  %vm677_vm12 = vcmp.eq.s32.totalorder %v1449_v26, 25  ;;  %v679_v41 = vstv %s2314_s6  ;;  %s2394_s1 = sld [smem:[#allocation2 + $0xd80]] }
  0xaf   :  { %v682_v42 = vstv %s2316_s8  ;;  %s2396_s18 = sld [smem:[#allocation2 + $0xd81]]  ;;  %v680_v39 = vsel %vm677_vm12, %v679_v41, %v655_v31  ;;  %v685_v4 = vstv %s2326_s9  ;;  %v688_v3 = vstv %s2328_s10  ;;  %s2404_s2 = sld [smem:[#allocation2 + $0xd82]] }
  0xb0   :  { %v683_v8 = vsel %vm677_vm12, %v682_v42, %v658_v28  ;;  %s2406_s26 = sld [smem:[#allocation2 + $0xd83]]  ;;  %v686_v43 = vsel %vm677_vm12, %v685_v4, %v661_v29  ;;  %v689_v44 = vsel %vm677_vm12, %v688_v3, %v664_v32  ;;  %v691_v45 = vstv %s2334_s12  ;;  %s2414_s19 = sld [smem:[#allocation2 + $0xd84]] }
  0xb1   :  { %v694_v46 = vstv %s2336_s24  ;;  %s2416_s5 = sld [smem:[#allocation2 + $0xd85]]  ;;  %v692_v48 = vsel %vm677_vm12, %v691_v45, %v667_v36  ;;  %v697_v50 = vstv %s2346_s13  ;;  %v700_v51 = vstv %s2348_s16  ;;  %s2424_s4 = sld [smem:[#allocation2 + $0xd86]] }
  0xb2   :  { %v695_v49 = vsel %vm677_vm12, %v694_v46, %v670_v37  ;;  %s2426_s11 = sld [smem:[#allocation2 + $0xd87]]  ;;  %v698_v52 = vsel %vm677_vm12, %v697_v50, %v673_v38  ;;  %v701_v53 = vsel %vm677_vm12, %v700_v51, %v676_v40  ;;  %vm702_vm13 = vcmp.eq.s32.totalorder %v1449_v26, 26  ;;  %s2434_s25 = sld [smem:[#allocation2 + $0xe00]] }
  0xb3   :  { %v704_v54 = vstv %s2354_s7  ;;  %v707_v57 = vstv %s2356_s27  ;;  %v710_v58 = vstv %s2365_s22  ;;  %v713_v59 = vstv %s2367_s29  ;;  %s2441_s28 = sld [smem:[#allocation2 + $0xe01]]  ;;  %s2443_s14 = sld [smem:[#allocation2 + $0xe02]] }
  0xb4   :  { %v705_v56 = vsel %vm702_vm13, %v704_v54, %v680_v39  ;;  %v708_v60 = vsel %vm702_vm13, %v707_v57, %v683_v8  ;;  %v711_v61 = vsel %vm702_vm13, %v710_v58, %v686_v43  ;;  %v714_v62 = vsel %vm702_vm13, %v713_v59, %v689_v44  ;;  %s2452_s20 = sld [smem:[#allocation2 + $0xe03]]  ;;  %s2454_s0 = sld [smem:[#allocation2 + $0xe04]] }
  0xb5   :  { %v716_v6 = vstv %s2374_s3  ;;  %v719_v1 = vstv %s2376_s17  ;;  %v722_v2 = vstv %s2385_s23  ;;  %v725_v7 = vstv %s2387_s15  ;;  %s2461_s30 = sld [smem:[#allocation2 + $0xe05]]  ;;  %s2463_s21 = sld [smem:[#allocation2 + $0xe06]] }
  0xb6   :  { %v717_v0 = vsel %vm702_vm13, %v716_v6, %v692_v48  ;;  %v720_v5 = vsel %vm702_vm13, %v719_v1, %v695_v49  ;;  %v723_v9 = vsel %vm702_vm13, %v722_v2, %v698_v52  ;;  %v726_v10 = vsel %vm702_vm13, %v725_v7, %v701_v53  ;;  %s2472_s6 = sld [smem:[#allocation2 + $0xe07]]  ;;  %s2478_s8 = sld [smem:[#allocation2 + $0xe80]] }
  0xb7   :  { %vm727_vm14 = vcmp.eq.s32.totalorder %v1449_v26, 27  ;;  %v729_v14 = vstv %s2394_s1  ;;  %v732_v47 = vstv %s2396_s18  ;;  %v735_v11 = vstv %s2404_s2  ;;  %s2480_s9 = sld [smem:[#allocation2 + $0xe81]]  ;;  %s2490_s10 = sld [smem:[#allocation2 + $0xe82]] }
  0xb8   :  { %v738_v12 = vstv %s2406_s26  ;;  %v730_v13 = vsel %vm727_vm14, %v729_v14, %v705_v56  ;;  %v733_v15 = vsel %vm727_vm14, %v732_v47, %v708_v60  ;;  %v736_v16 = vsel %vm727_vm14, %v735_v11, %v711_v61  ;;  %s2492_s12 = sld [smem:[#allocation2 + $0xe83]]  ;;  %s2498_s24 = sld [smem:[#allocation2 + $0xe84]] }
  0xb9   :  { %v739_v17 = vsel %vm727_vm14, %v738_v12, %v714_v62  ;;  %v741_v18 = vstv %s2414_s19  ;;  %v744_v19 = vstv %s2416_s5  ;;  %v747_v20 = vstv %s2424_s4  ;;  %s2500_s13 = sld [smem:[#allocation2 + $0xe85]]  ;;  %s2510_s16 = sld [smem:[#allocation2 + $0xe86]] }
  0xba   :  { %v750_v21 = vstv %s2426_s11  ;;  %v742_v22 = vsel %vm727_vm14, %v741_v18, %v717_v0  ;;  %v745_v23 = vsel %vm727_vm14, %v744_v19, %v720_v5  ;;  %v748_v24 = vsel %vm727_vm14, %v747_v20, %v723_v9  ;;  %s2512_s7 = sld [smem:[#allocation2 + $0xe87]]  ;;  %s2518_s27 = sld [smem:[#allocation2 + $0xf00]] }
  0xbb   :  { %v751_v25 = vsel %vm727_vm14, %v750_v21, %v726_v10  ;;  %vm752_vm15 = vcmp.eq.s32.totalorder %v1449_v26, 28  ;;  %v754_v63 = vstv %s2434_s25  ;;  %v757_v27 = vstv %s2441_s28  ;;  %s2520_s22 = sld [smem:[#allocation2 + $0xf01]]  ;;  %s2529_s29 = sld [smem:[#allocation2 + $0xf02]] }
  0xbc   :  { %v760_v31 = vstv %s2443_s14  ;;  %v755_v28 = vsel %vm752_vm15, %v754_v63, %v730_v13  ;;  %v758_v29 = vsel %vm752_vm15, %v757_v27, %v733_v15  ;;  %v763_v32 = vstv %s2452_s20  ;;  %s2531_s3 = sld [smem:[#allocation2 + $0xf03]]  ;;  %s2538_s17 = sld [smem:[#allocation2 + $0xf04]] }
  0xbd   :  { %v761_v30 = vsel %vm752_vm15, %v760_v31, %v736_v16  ;;  %v764_v33 = vsel %vm752_vm15, %v763_v32, %v739_v17  ;;  %v766_v34 = vstv %s2454_s0  ;;  %v769_v35 = vstv %s2461_s30  ;;  %s2540_s23 = sld [smem:[#allocation2 + $0xf05]]  ;;  %s2549_s15 = sld [smem:[#allocation2 + $0xf06]] }
  0xbe   :  { %v772_v36 = vstv %s2463_s21  ;;  %v767_v37 = vsel %vm752_vm15, %v766_v34, %v742_v22  ;;  %v770_v38 = vsel %vm752_vm15, %v769_v35, %v745_v23  ;;  %v775_v40 = vstv %s2472_s6  ;;  %s2551_s1 = sld [smem:[#allocation2 + $0xf07]]  ;;  %s2558_s18 = sld [smem:[#allocation2 + $0xf80]] }
  0xbf   :  { %v773_v55 = vsel %vm752_vm15, %v772_v36, %v748_v24  ;;  %v776_v41 = vsel %vm752_vm15, %v775_v40, %v751_v25  ;;  %vm777_vm0 = vcmp.eq.s32.totalorder %v1449_v26, 29  ;;  %v779_v42 = vstv %s2478_s8  ;;  %s2560_s2 = sld [smem:[#allocation2 + $0xf81]]  ;;  %s2568_s26 = sld [smem:[#allocation2 + $0xf82]] }
  0xc0   :  { %v782_v39 = vstv %s2480_s9  ;;  %vm852_vm1 = vcmask 64512   ;;  %v780_v8 = vsel %vm777_vm0, %v779_v42, %v755_v28  ;;  %v785_v3 = vstv %s2490_s10  ;;  %s2570_s19 = sld [smem:[#allocation2 + $0xf83]]  ;;  %s2578_s5 = sld [smem:[#allocation2 + $0xf84]] }
  0xc1   :  { %v783_v4 = vsel %vm777_vm0, %v782_v39, %v758_v29  ;;  %v788_v43 = vstv %s2492_s12  ;;  %v786_v44 = vsel %vm777_vm0, %v785_v3, %v761_v30  ;;  %v791_v46 = vstv %s2498_s24  ;;  %s2580_s4 = sld [smem:[#allocation2 + $0xf85]]  ;;  %s2588_s11 = sld [smem:[#allocation2 + $0xf86]] }
  0xc2   :  { %v789_v45 = vsel %vm777_vm0, %v788_v43, %v764_v33  ;;  %v794_v48 = vstv %s2500_s13  ;;  %v792_v49 = vsel %vm777_vm0, %v791_v46, %v767_v37  ;;  %v797_v51 = vstv %s2510_s16  ;;  %s2590_s25 = sld [smem:[#allocation2 + $0xf87]]  ;;  %s1190_s28 = smov [#allocation5]  }
  0xc3   :  { %v795_v50 = vsel %vm777_vm0, %v794_v48, %v770_v38  ;;  %v800_v52 = vstv %s2512_s7  ;;  %v798_v53 = vsel %vm777_vm0, %v797_v51, %v773_v55  ;;  %vm802_vm2 = vcmp.eq.s32.totalorder %v1449_v26, 30  ;;  %s873_s14 = sshll.u32 %s1190_s28, 4  ;;  %s874_s14 = int_to_ptr.vmem [resolvable:$true] %s873_s14 }
  0xc4   :  { %v801_v54 = vsel %vm777_vm0, %v800_v52, %v776_v41  ;;  %v804_v56 = vstv %s2518_s27  ;;  %v807_v58 = vstv %s2520_s22  ;;  %v810_v59 = vstv %s2529_s29  ;;  %s1160_s20 = scalar_lea.vmem %s874_s14, 1024  ;;  %p1165_p4 = scmp.lt.s32.totalorder %s874_s14, %s874_s14 }
  0xc5   :  { %v805_v57 = vsel %vm802_vm2, %v804_v56, %v780_v8  ;;  %v813_v60 = vstv %s2531_s3  ;;  %v808_v61 = vsel %vm802_vm2, %v807_v58, %v783_v4  ;;  %v811_v62 = vsel %vm802_vm2, %v810_v59, %v786_v44  ;;  %p1161_p3 = scmp.ne.s32.totalorder %s874_s14, %s1160_s20  ;;  %p1166_p5 = scmp.lt.s32.totalorder %s1160_s20, %s1160_s20 }
  0xc6   :  { %v814_v6 = vsel %vm802_vm2, %v813_v60, %v789_v45  ;;  %v816_v0 = vstv %s2538_s17  ;;  %v819_v2 = vstv %s2540_s23  ;;  %v822_v7 = vstv %s2549_s15 }
  0xc7   :  { %v817_v1 = vsel %vm802_vm2, %v816_v0, %v792_v49  ;;  %v825_v5 = vstv %s2551_s1  ;;  %v820_v9 = vsel %vm802_vm2, %v819_v2, %v795_v50  ;;  %v823_v10 = vsel %vm802_vm2, %v822_v7, %v798_v53  ;;  %p1167_p6 = por %p1166_p5, %p1165_p4 }
  0xc8   :  { %v826_v14 = vsel %vm802_vm2, %v825_v5, %v801_v54  ;;  %vm827_vm3 = vcmp.eq.s32.totalorder %v1449_v26, 31  ;;  %v829_v47 = vstv %s2558_s18  ;;  %v832_v11 = vstv %s2560_s2 }
  0xc9   :  { %v835_v12 = vstv %s2568_s26  ;;  %v838_v13 = vstv %s2570_s19  ;;  %v830_v15 = vsel %vm827_vm3, %v829_v47, %v805_v57  ;;  %v833_v16 = vsel %vm827_vm3, %v832_v11, %v808_v61  ;;  %p1168_p7 = pnand %p1167_p6, %p1161_p3 }
  0xca   :  { %v836_v17 = vsel %vm827_vm3, %v835_v12, %v811_v62  ;;  %v839_v18 = vsel %vm827_vm3, %v838_v13, %v814_v6  ;;  %v841_v19 = vstv %s2578_s5  ;;  %v844_v20 = vstv %s2580_s4  ;;  %853 = vst.msk [vmem:[#allocation5] sm:$0xff] %vm852_vm1, %v830_v15  ;;  %855 = vst.msk [vmem:[#allocation5 + $0x8] sm:$0xff] %vm852_vm1, %v833_v16 }
  0xcb   :  { %v847_v21 = vstv %s2588_s11  ;;  %v850_v22 = vstv %s2590_s25  ;;  %857 = vst.msk [vmem:[#allocation5 + $0x10] sm:$0xff] %vm852_vm1, %v836_v17  ;;  %859 = vst.msk [vmem:[#allocation5 + $0x18] sm:$0xff] %vm852_vm1, %v839_v18  ;;  %v842_v23 = vsel %vm827_vm3, %v841_v19, %v817_v1  ;;  %v845_v24 = vsel %vm827_vm3, %v844_v20, %v820_v9 }
  0xcc   :  { %v848_v25 = vsel %vm827_vm3, %v847_v21, %v823_v10  ;;  %v851_v63 = vsel %vm827_vm3, %v850_v22, %v826_v14  ;;  %861 = vst.msk [vmem:[#allocation5 + $0x20] sm:$0xff] %vm852_vm1, %v842_v23  ;;  %863 = vst.msk [vmem:[#allocation5 + $0x28] sm:$0xff] %vm852_vm1, %v845_v24 }
  0xcd   :  { %865 = vst.msk [vmem:[#allocation5 + $0x30] sm:$0xff] %vm852_vm1, %v848_v25  ;;  %867 = vst.msk [vmem:[#allocation5 + $0x38] sm:$0xff] %vm852_vm1, %v851_v63 }
  0xce   :  { %1171 = shalt.err (!%p1168_p7)
}
  0xcf   :  { %s2922_s21 = sld [smem:[#allocation75_spill]] }
  0xd5   :  { %s1172_s6 = scalar_lea.hbm %s2922_s21, 1024 }
  0xd6   :  { %p1173_p8 = scmp.ne.s32.totalorder %s2922_s21, %s1172_s6  ;;  %p1176_p9 = scmp.lt.u32.totalorder %s1172_s6, %s2922_s21 }
  0xd8   :  { %p1178_p10 = pnand %p1176_p9, %p1173_p8 }
  0xda   :  { %1181 = shalt.err (!%p1178_p10)
}
  0xdb   :  { %s2923_s24 = smov 8   ;;  %s2924_s13 = smov 128  }
  0xdc   :  { %879 = dma.vmem_to_hbm [thread:$0]  %s874_s14, 1024, %s2922_s21, [#allocation3], %s2924_s13, %s2924_s13, %s2923_s24  }
  0xdd   :  { %1184 = dma.done.wait [#allocation3], 1024  }
  0xde   :  { %1185 = vsyncadd [#allocation3], 4294966272 }
  0xdf   :  { %883 = vsyncpa [#allocation3], 1 }
  0xe0   :  { %884 = vsyncpa [#allocation4], 1 }

</bundles_post_ra>
